<compile_context>
chip_gen: v6e
topology: v6e:2x2x1
jax: 0.10.0
libtpu: 0.0.40
codegen_flags: <defaults>
</compile_context>

<pallas_src>
import math

import jax
import jax.numpy as jnp
from jax.experimental import pallas as pl
from jax.experimental.pallas import tpu as pltpu

# --- small config consistent with MaskGITIndex (scaled-down defaults) ---
B = 2            # batch
N_POS = 16       # sequence length (n_pos)
EMBED_DIM = 32   # embed_dim
NUM_HEADS = 4    # num_heads -> head_dim = 8
FC_DIM = 64      # fc_dim
N_LAYERS = 2     # n_layers
C_DIM = 32       # c_dim
N_TOKENS = 64    # n_tokens (vocab)
V_PAD = max(128, ((N_TOKENS + 127) // 128) * 128)   # lane-dense padded vocab width
EPS = 1e-5


# ----------------------------- in-kernel helpers -----------------------------

def _erf(x):
    # Abramowitz & Stegun 7.1.26 rational approximation (|err| < 1.5e-7);
    # matches torch.nn.GELU()'s exact erf to f32 precision, lowers with only
    # mul/add/exp/where (VPU + EUP slots).
    a1, a2, a3, a4, a5 = 0.254829592, -0.284496736, 1.421413741, -1.453152027, 1.061405429
    p = 0.3275911
    ax = jnp.abs(x)
    t = 1.0 / (1.0 + p * ax)
    poly = ((((a5 * t + a4) * t + a3) * t + a2) * t + a1) * t
    y = 1.0 - poly * jnp.exp(-ax * ax)
    return jnp.where(x >= 0, y, -y)


def _gelu(x):
    # exact erf-GELU (== torch.nn.GELU())
    return 0.5 * x * (1.0 + _erf(x * 0.7071067811865476))


def _layernorm(x, g, b):
    mean = jnp.mean(x, axis=-1, keepdims=True)
    xc = x - mean
    var = jnp.mean(xc * xc, axis=-1, keepdims=True)
    return xc * jax.lax.rsqrt(var + EPS) * g + b


# ----------------------------- fused Pallas kernel -----------------------------

def _maskgit_fused_kernel(x_ref, c_ref, gmat_ref, gvec_ref, lvec_ref,
                          wA_ref, w2_ref, obias_ref, o_ref):
    # Single program: the whole batch is resident; activations are (B*S, D).
    Bb, S, D = x_ref.shape
    BS = Bb * S
    H = NUM_HEADS
    dh = D // H
    F = FC_DIM
    scale = 1.0 / math.sqrt(dh)

    # -- unpack packed global weights (static slices; no data-dependent indexing) --
    tet = gmat_ref[0:D, 0:V_PAD]                           # (D, V_pad) token_embed.T, lane-padded
    c_proj_w = gmat_ref[0:C_DIM, V_PAD:V_PAD + D]          # (C, D)
    proj_w = gmat_ref[0:D, V_PAD + D:V_PAD + 2 * D]        # (D, D)
    c_proj_b = gvec_ref[0:1, 0:D]
    proj_b = gvec_ref[1:2, 0:D]
    proj_ln_g = gvec_ref[2:3, 0:D]
    proj_ln_b = gvec_ref[3:4, 0:D]

    # class conditioning projected to embed_dim, broadcast-added to every position.
    c_emb = jnp.dot(c_ref[...], c_proj_w, preferred_element_type=jnp.float32) + c_proj_b  # (B, D)
    h = (x_ref[...] + c_emb[:, None, :]).reshape(BS, D)                                   # (B*S, D)

    # NOTE: if D/F/V grow to realistic sizes, cast matmul operands to bf16 here
    # (keep LN/softmax/GELU in f32) to use the bf16-native MXU on v6e/v7x.
    for l in range(N_LAYERS):  # static unroll
        ln1_g = lvec_ref[l, 0:1, 0:D]
        ln1_b = lvec_ref[l, 1:2, 0:D]
        bqkv = lvec_ref[l, 2:3, 0:3 * D]
        bo = lvec_ref[l, 3:4, 0:D]
        ln2_g = lvec_ref[l, 4:5, 0:D]
        ln2_b = lvec_ref[l, 5:6, 0:D]
        b1 = lvec_ref[l, 6:7, 0:F]
        b2 = lvec_ref[l, 7:8, 0:D]
        wqkv = wA_ref[l, :, 0:3 * D]          # (D, 3D)
        wo = wA_ref[l, :, 3 * D:4 * D]        # (D, D)
        w1 = wA_ref[l, :, 4 * D:4 * D + F]    # (D, F)

        # ---- pre-LN multi-head self-attention ----
        xn = _layernorm(h, ln1_g, ln1_b)
        qkv = jnp.dot(xn, wqkv, preferred_element_type=jnp.float32) + bqkv     # (B*S, 3D)

        s_list, v_list = [], []
        for hh in range(H):  # static; per-head QK^T batched over B
            q_h = qkv[:, hh * dh:(hh + 1) * dh].reshape(Bb, S, dh)
            k_h = qkv[:, D + hh * dh:D + (hh + 1) * dh].reshape(Bb, S, dh)
            v_list.append(qkv[:, 2 * D + hh * dh:2 * D + (hh + 1) * dh].reshape(Bb, S, dh))
            s_list.append(jnp.einsum("bqd,bkd->bqk", q_h, k_h,
                                     preferred_element_type=jnp.float32))
        # single fused softmax over all heads and batch elements
        s_all = jnp.concatenate(s_list, axis=0) * scale                        # (H*B, S, S)
        m = jnp.max(s_all, axis=-1, keepdims=True)
        p_all = jnp.exp(s_all - m)
        p_all = p_all / jnp.sum(p_all, axis=-1, keepdims=True)                 # exact divide

        heads = []
        for hh in range(H):
            o_h = jnp.einsum("bqk,bkd->bqd", p_all[hh * Bb:(hh + 1) * Bb], v_list[hh],
                             preferred_element_type=jnp.float32)               # (B, S, dh)
            heads.append(o_h.reshape(BS, dh))
        a = jnp.concatenate(heads, axis=-1)                                    # (B*S, D)
        a = jnp.dot(a, wo, preferred_element_type=jnp.float32) + bo
        h = h + a

        # ---- pre-LN MLP ----
        xn = _layernorm(h, ln2_g, ln2_b)
        f = jnp.dot(xn, w1, preferred_element_type=jnp.float32) + b1
        f = _gelu(f)
        f = jnp.dot(f, w2_ref[l], preferred_element_type=jnp.float32) + b2
        h = h + f

    # ---- proj_out: Linear -> GELU -> LayerNorm ----
    hp = jnp.dot(h, proj_w, preferred_element_type=jnp.float32) + proj_b
    hp = _gelu(hp)
    hp = _layernorm(hp, proj_ln_g, proj_ln_b)

    # ---- logits = hp @ token_embed.T + bias : lane-dense 128-wide store ----
    logits = jnp.dot(hp, tet, preferred_element_type=jnp.float32)              # (B*S, V_pad)
    o_ref[...] = logits.reshape(Bb, S, V_PAD) + obias_ref[...][None, :, :]


# ----------------------------- wrapper -----------------------------

def maskgit_index_forward(packed, masked_embedding, c):
    # TODO(synk): the TransformerEncoder source was not included in the reference;
    # implemented as a standard pre-LN transformer encoder where the class
    # conditioning c (B, c_dim) is linearly projected into embed_dim and added to
    # every position.  Dropout is the identity (eval mode).
    Bb, S, _ = masked_embedding.shape
    vmem = pl.BlockSpec(memory_space=pltpu.MemorySpace.VMEM)  # whole array, VMEM resident
    out = pl.pallas_call(
        _maskgit_fused_kernel,
        out_shape=jax.ShapeDtypeStruct((Bb, S, V_PAD), jnp.float32),
        in_specs=[vmem] * 8,
        out_specs=vmem,
    )(
        masked_embedding, c,
        packed["gmat"], packed["gvec"], packed["lvec"],
        packed["wA"], packed["w2"], packed["obias"],
    )
    return out[..., :N_TOKENS]   # strip the lane padding outside the kernel


# ----------------------------- parameters -----------------------------

def init_params(key):
    ks = iter(jax.random.split(key, 16))

    def w(shape, scale=0.02):
        return (scale * jax.random.normal(next(ks), shape)).astype(jnp.float32)

    L, D, F, C, V, S = N_LAYERS, EMBED_DIM, FC_DIM, C_DIM, N_TOKENS, N_POS
    return {
        "c_proj_w": w((C, D)),
        "c_proj_b": jnp.zeros((D,), jnp.float32),
        "ln1_g": jnp.ones((L, D), jnp.float32),
        "ln1_b": jnp.zeros((L, D), jnp.float32),
        "wqkv": w((L, D, 3 * D)),     # in_proj.T, packed [q | k | v] on the out axis
        "bqkv": jnp.zeros((L, 3 * D), jnp.float32),
        "wo": w((L, D, D)),
        "bo": jnp.zeros((L, D), jnp.float32),
        "ln2_g": jnp.ones((L, D), jnp.float32),
        "ln2_b": jnp.zeros((L, D), jnp.float32),
        "w1": w((L, D, F)),
        "b1": jnp.zeros((L, F), jnp.float32),
        "w2": w((L, F, D)),
        "b2": jnp.zeros((L, D), jnp.float32),
        # proj_out = [Linear(D, D), GELU, LayerNorm(D)]
        "proj_w": w((D, D)),
        "proj_b": jnp.zeros((D,), jnp.float32),
        "proj_ln_g": jnp.ones((D,), jnp.float32),
        "proj_ln_b": jnp.zeros((D,), jnp.float32),
        # token_embed ~ trunc_normal(0, 0.02), shape (n_tokens, embed_dim) like PyTorch
        "token_embed": w((V, D)),
        # self.bias = zeros([n_pos, n_tokens]) in the PyTorch module
        "out_bias": jnp.zeros((S, V), jnp.float32),
    }


def pack_params(p):
    """Pack the logical params into a handful of tile-aligned kernel inputs (done once)."""
    L, D, F, C, V, S = N_LAYERS, EMBED_DIM, FC_DIM, C_DIM, N_TOKENS, N_POS
    rows = max(C, D)

    # [token_embed.T (lane-padded to V_PAD) | c_proj_w | proj_w]
    gmat = jnp.zeros((rows, V_PAD + 2 * D), jnp.float32)
    gmat = gmat.at[:D, 0:V].set(p["token_embed"].T)
    gmat = gmat.at[:C, V_PAD:V_PAD + D].set(p["c_proj_w"])
    gmat = gmat.at[:D, V_PAD + D:V_PAD + 2 * D].set(p["proj_w"])

    # global small vectors, one sublane row each
    gvec = jnp.zeros((8, 128), jnp.float32)
    gvec = gvec.at[0, :D].set(p["c_proj_b"])
    gvec = gvec.at[1, :D].set(p["proj_b"])
    gvec = gvec.at[2, :D].set(p["proj_ln_g"])
    gvec = gvec.at[3, :D].set(p["proj_ln_b"])

    # per-layer small vectors, one sublane row each
    lvec = jnp.zeros((L, 8, 128), jnp.float32)
    lvec = lvec.at[:, 0, :D].set(p["ln1_g"])
    lvec = lvec.at[:, 1, :D].set(p["ln1_b"])
    lvec = lvec.at[:, 2, :3 * D].set(p["bqkv"])
    lvec = lvec.at[:, 3, :D].set(p["bo"])
    lvec = lvec.at[:, 4, :D].set(p["ln2_g"])
    lvec = lvec.at[:, 5, :D].set(p["ln2_b"])
    lvec = lvec.at[:, 6, :F].set(p["b1"])
    lvec = lvec.at[:, 7, :D].set(p["b2"])

    # per-layer D-row weight matrices packed along lanes: [wqkv | wo | w1]
    wA = jnp.concatenate([p["wqkv"], p["wo"], p["w1"]], axis=-1)   # (L, D, 3D + D + F)

    # output bias lane-padded to V_PAD
    obias = jnp.zeros((S, V_PAD), jnp.float32).at[:, :V].set(p["out_bias"])

    return {"gmat": gmat, "gvec": gvec, "lvec": lvec,
            "wA": wA, "w2": p["w2"], "obias": obias}


# ----------------------------- pure-JAX reference -----------------------------

def maskgit_index_reference(params, masked_embedding, c):
    Bb, S, D = masked_embedding.shape
    H, dh = NUM_HEADS, D // NUM_HEADS

    def ln(x, g, b):
        m = jnp.mean(x, -1, keepdims=True)
        xc = x - m
        v = jnp.mean(xc * xc, -1, keepdims=True)
        return xc * jax.lax.rsqrt(v + EPS) * g + b

    c_emb = c @ params["c_proj_w"] + params["c_proj_b"]
    h = masked_embedding + c_emb[:, None, :]
    for l in range(N_LAYERS):
        x = ln(h, params["ln1_g"][l], params["ln1_b"][l])
        qkv = x @ params["wqkv"][l] + params["bqkv"][l]
        q, k, v = jnp.split(qkv, 3, axis=-1)
        q = q.reshape(Bb, S, H, dh)
        k = k.reshape(Bb, S, H, dh)
        v = v.reshape(Bb, S, H, dh)
        s = jnp.einsum("bqhd,bkhd->bhqk", q, k) / math.sqrt(dh)
        p = jax.nn.softmax(s, axis=-1)
        a = jnp.einsum("bhqk,bkhd->bqhd", p, v).reshape(Bb, S, D)
        a = a @ params["wo"][l] + params["bo"][l]
        h = h + a
        x = ln(h, params["ln2_g"][l], params["ln2_b"][l])
        f = jax.nn.gelu(x @ params["w1"][l] + params["b1"][l], approximate=False)
        f = f @ params["w2"][l] + params["b2"][l]
        h = h + f
    x = jax.nn.gelu(h @ params["proj_w"] + params["proj_b"], approximate=False)
    x = ln(x, params["proj_ln_g"], params["proj_ln_b"])
    return x @ params["token_embed"].T + params["out_bias"]


# ----------------------------- main -----------------------------

if __name__ == "__main__":
    key = jax.random.PRNGKey(0)
    kp, kx, kc = jax.random.split(key, 3)
    params = init_params(kp)
    packed = pack_params(params)   # packed ONCE, outside the jitted forward
    masked_embedding = jax.random.normal(kx, (B, N_POS, EMBED_DIM), dtype=jnp.float32)
    c = jax.random.normal(kc, (B, C_DIM), dtype=jnp.float32)

    fwd = jax.jit(maskgit_index_forward)
    logits = fwd(packed, masked_embedding, c)
    jax.block_until_ready(logits)

    assert logits.shape == (B, N_POS, N_TOKENS), logits.shape
    assert bool(jnp.all(jnp.isfinite(logits)))

    # sanity-check the fused kernel against a pure-JAX reference
    ref = maskgit_index_reference(params, masked_embedding, c)
    max_err = float(jnp.max(jnp.abs(logits - ref)))
    assert max_err < 2e-2, f"max abs diff vs reference: {max_err}"

    print("KERNEL_OK")
</pallas_src>

<mosaic_0001>
module attributes {stable_mosaic.version = 11 : i64} {
  func.func @_maskgit_fused_kernel(%arg0: memref<2x16x32xf32, #tpu.memory_space<vmem>>, %arg1: memref<2x32xf32, #tpu.memory_space<vmem>>, %arg2: memref<32x192xf32, #tpu.memory_space<vmem>>, %arg3: memref<8x128xf32, #tpu.memory_space<vmem>>, %arg4: memref<2x8x128xf32, #tpu.memory_space<vmem>>, %arg5: memref<2x32x192xf32, #tpu.memory_space<vmem>>, %arg6: memref<2x64x32xf32, #tpu.memory_space<vmem>>, %arg7: memref<16x128xf32, #tpu.memory_space<vmem>>, %arg8: memref<2x16x128xf32, #tpu.memory_space<vmem>>) attributes {dimension_semantics = [], scalar_prefetch = 0 : i64, scratch_operands = 0 : i64, tpu.core_type = #tpu.core_type<tc>} {
    %c0 = arith.constant 0 : index
    %c0_0 = arith.constant 0 : index
    %0 = vector.load %arg2[%c0, %c0_0] : memref<32x192xf32, #tpu.memory_space<vmem>>, vector<32x128xf32>
    %c0_1 = arith.constant 0 : index
    %c128 = arith.constant 128 : index
    %1 = vector.load %arg2[%c0_1, %c128] : memref<32x192xf32, #tpu.memory_space<vmem>>, vector<32x32xf32>
    %c0_2 = arith.constant 0 : index
    %c160 = arith.constant 160 : index
    %2 = vector.load %arg2[%c0_2, %c160] : memref<32x192xf32, #tpu.memory_space<vmem>>, vector<32x32xf32>
    %c0_3 = arith.constant 0 : index
    %c0_4 = arith.constant 0 : index
    %3 = vector.load %arg3[%c0_3, %c0_4] : memref<8x128xf32, #tpu.memory_space<vmem>>, vector<1x32xf32>
    %c1 = arith.constant 1 : index
    %c0_5 = arith.constant 0 : index
    %4 = vector.load %arg3[%c1, %c0_5] : memref<8x128xf32, #tpu.memory_space<vmem>>, vector<1x32xf32>
    %c2 = arith.constant 2 : index
    %c0_6 = arith.constant 0 : index
    %5 = vector.load %arg3[%c2, %c0_6] : memref<8x128xf32, #tpu.memory_space<vmem>>, vector<1x32xf32>
    %c3 = arith.constant 3 : index
    %c0_7 = arith.constant 0 : index
    %6 = vector.load %arg3[%c3, %c0_7] : memref<8x128xf32, #tpu.memory_space<vmem>>, vector<1x32xf32>
    %c0_8 = arith.constant 0 : index
    %c0_9 = arith.constant 0 : index
    %7 = vector.load %arg1[%c0_8, %c0_9] : memref<2x32xf32, #tpu.memory_space<vmem>>, vector<2x32xf32>
    %cst = arith.constant dense<0.000000e+00> : vector<2x32xf32>
    %8 = tpu.matmul %7, %1, %cst {dimension_numbers = #tpu.dot_dimension_numbers<[1], [0], [0], [1], [0, 0, 1, 1], [], []>} : vector<2x32xf32>, vector<32x32xf32>, vector<2x32xf32> -> vector<2x32xf32>
    %9 = vector.broadcast %3 : vector<1x32xf32> to vector<2x32xf32>
    %10 = arith.addf %8, %9 : vector<2x32xf32>
    %c0_10 = arith.constant 0 : index
    %c0_11 = arith.constant 0 : index
    %c0_12 = arith.constant 0 : index
    %11 = vector.load %arg0[%c0_10, %c0_11, %c0_12] : memref<2x16x32xf32, #tpu.memory_space<vmem>>, vector<2x16x32xf32>
    %12 = vector.shape_cast %10 : vector<2x32xf32> to vector<2x1x32xf32>
    %13 = vector.broadcast %12 : vector<2x1x32xf32> to vector<2x16x32xf32>
    %14 = arith.addf %11, %13 : vector<2x16x32xf32>
    %15 = vector.shape_cast %14 : vector<2x16x32xf32> to vector<32x32xf32>
    %c0_13 = arith.constant 0 : index
    %c0_14 = arith.constant 0 : index
    %c0_15 = arith.constant 0 : index
    %16 = vector.load %arg4[%c0_13, %c0_14, %c0_15] : memref<2x8x128xf32, #tpu.memory_space<vmem>>, vector<1x1x32xf32>
    %17 = vector.shape_cast %16 : vector<1x1x32xf32> to vector<1x32xf32>
    %c0_16 = arith.constant 0 : index
    %c1_17 = arith.constant 1 : index
    %c0_18 = arith.constant 0 : index
    %18 = vector.load %arg4[%c0_16, %c1_17, %c0_18] : memref<2x8x128xf32, #tpu.memory_space<vmem>>, vector<1x1x32xf32>
    %19 = vector.shape_cast %18 : vector<1x1x32xf32> to vector<1x32xf32>
    %c0_19 = arith.constant 0 : index
    %c2_20 = arith.constant 2 : index
    %c0_21 = arith.constant 0 : index
    %20 = vector.load %arg4[%c0_19, %c2_20, %c0_21] : memref<2x8x128xf32, #tpu.memory_space<vmem>>, vector<1x1x96xf32>
    %21 = vector.shape_cast %20 : vector<1x1x96xf32> to vector<1x96xf32>
    %c0_22 = arith.constant 0 : index
    %c3_23 = arith.constant 3 : index
    %c0_24 = arith.constant 0 : index
    %22 = vector.load %arg4[%c0_22, %c3_23, %c0_24] : memref<2x8x128xf32, #tpu.memory_space<vmem>>, vector<1x1x32xf32>
    %23 = vector.shape_cast %22 : vector<1x1x32xf32> to vector<1x32xf32>
    %c0_25 = arith.constant 0 : index
    %c4 = arith.constant 4 : index
    %c0_26 = arith.constant 0 : index
    %24 = vector.load %arg4[%c0_25, %c4, %c0_26] : memref<2x8x128xf32, #tpu.memory_space<vmem>>, vector<1x1x32xf32>
    %25 = vector.shape_cast %24 : vector<1x1x32xf32> to vector<1x32xf32>
    %c0_27 = arith.constant 0 : index
    %c5 = arith.constant 5 : index
    %c0_28 = arith.constant 0 : index
    %26 = vector.load %arg4[%c0_27, %c5, %c0_28] : memref<2x8x128xf32, #tpu.memory_space<vmem>>, vector<1x1x32xf32>
    %27 = vector.shape_cast %26 : vector<1x1x32xf32> to vector<1x32xf32>
    %c0_29 = arith.constant 0 : index
    %c6 = arith.constant 6 : index
    %c0_30 = arith.constant 0 : index
    %28 = vector.load %arg4[%c0_29, %c6, %c0_30] : memref<2x8x128xf32, #tpu.memory_space<vmem>>, vector<1x1x64xf32>
    %29 = vector.shape_cast %28 : vector<1x1x64xf32> to vector<1x64xf32>
    %c0_31 = arith.constant 0 : index
    %c7 = arith.constant 7 : index
    %c0_32 = arith.constant 0 : index
    %30 = vector.load %arg4[%c0_31, %c7, %c0_32] : memref<2x8x128xf32, #tpu.memory_space<vmem>>, vector<1x1x32xf32>
    %31 = vector.shape_cast %30 : vector<1x1x32xf32> to vector<1x32xf32>
    %c0_33 = arith.constant 0 : index
    %c0_34 = arith.constant 0 : index
    %c0_35 = arith.constant 0 : index
    %32 = vector.load %arg5[%c0_33, %c0_34, %c0_35] : memref<2x32x192xf32, #tpu.memory_space<vmem>>, vector<1x32x96xf32>
    %33 = vector.shape_cast %32 : vector<1x32x96xf32> to vector<32x96xf32>
    %c0_36 = arith.constant 0 : index
    %c0_37 = arith.constant 0 : index
    %c96 = arith.constant 96 : index
    %34 = vector.load %arg5[%c0_36, %c0_37, %c96] : memref<2x32x192xf32, #tpu.memory_space<vmem>>, vector<1x32x32xf32>
    %35 = vector.shape_cast %34 : vector<1x32x32xf32> to vector<32x32xf32>
    %c0_38 = arith.constant 0 : index
    %c0_39 = arith.constant 0 : index
    %c128_40 = arith.constant 128 : index
    %36 = vector.load %arg5[%c0_38, %c0_39, %c128_40] : memref<2x32x192xf32, #tpu.memory_space<vmem>>, vector<1x32x64xf32>
    %37 = vector.shape_cast %36 : vector<1x32x64xf32> to vector<32x64xf32>
    %cst_41 = arith.constant dense<0.000000e+00> : vector<32xf32>
    %38 = vector.multi_reduction <add>, %15, %cst_41 [1] : vector<32x32xf32> to vector<32xf32>
    %39 = vector.shape_cast %38 : vector<32xf32> to vector<32x1xf32>
    %cst_42 = arith.constant 3.200000e+01 : f32
    %40 = vector.broadcast %cst_42 : f32 to vector<32x1xf32>
    %41 = arith.divf %39, %40 : vector<32x1xf32>
    %42 = vector.broadcast %41 : vector<32x1xf32> to vector<32x32xf32>
    %43 = arith.subf %15, %42 : vector<32x32xf32>
    %44 = arith.mulf %43, %43 : vector<32x32xf32>
    %cst_43 = arith.constant dense<0.000000e+00> : vector<32xf32>
    %45 = vector.multi_reduction <add>, %44, %cst_43 [1] : vector<32x32xf32> to vector<32xf32>
    %46 = vector.shape_cast %45 : vector<32xf32> to vector<32x1xf32>
    %cst_44 = arith.constant 3.200000e+01 : f32
    %47 = vector.broadcast %cst_44 : f32 to vector<32x1xf32>
    %48 = arith.divf %46, %47 : vector<32x1xf32>
    %cst_45 = arith.constant 9.99999974E-6 : f32
    %49 = vector.broadcast %cst_45 : f32 to vector<32x1xf32>
    %50 = arith.addf %48, %49 : vector<32x1xf32>
    %51 = math.rsqrt %50 : vector<32x1xf32>
    %52 = vector.broadcast %51 : vector<32x1xf32> to vector<32x32xf32>
    %53 = arith.mulf %43, %52 : vector<32x32xf32>
    %54 = vector.broadcast %17 : vector<1x32xf32> to vector<32x32xf32>
    %55 = arith.mulf %53, %54 : vector<32x32xf32>
    %56 = vector.broadcast %19 : vector<1x32xf32> to vector<32x32xf32>
    %57 = arith.addf %55, %56 : vector<32x32xf32>
    %cst_46 = arith.constant dense<0.000000e+00> : vector<32x96xf32>
    %58 = tpu.matmul %57, %33, %cst_46 {dimension_numbers = #tpu.dot_dimension_numbers<[1], [0], [0], [1], [0, 0, 1, 1], [], []>} : vector<32x32xf32>, vector<32x96xf32>, vector<32x96xf32> -> vector<32x96xf32>
    %59 = vector.broadcast %21 : vector<1x96xf32> to vector<32x96xf32>
    %60 = arith.addf %58, %59 : vector<32x96xf32>
    %61 = vector.extract_strided_slice %60 {offsets = [0, 0], sizes = [32, 8], strides = [1, 1]} : vector<32x96xf32> to vector<32x8xf32>
    %62 = vector.shape_cast %61 : vector<32x8xf32> to vector<2x16x8xf32>
    %63 = vector.extract_strided_slice %60 {offsets = [0, 32], sizes = [32, 8], strides = [1, 1]} : vector<32x96xf32> to vector<32x8xf32>
    %64 = vector.shape_cast %63 : vector<32x8xf32> to vector<2x16x8xf32>
    %65 = vector.extract_strided_slice %60 {offsets = [0, 64], sizes = [32, 8], strides = [1, 1]} : vector<32x96xf32> to vector<32x8xf32>
    %66 = vector.shape_cast %65 : vector<32x8xf32> to vector<2x16x8xf32>
    "tpu.trace_start"() <{level = 10 : i32, message = "bqd,bkd->bqk"}> : () -> ()
    %cst_47 = arith.constant dense<0.000000e+00> : vector<2x16x16xf32>
    %67 = tpu.matmul %62, %64, %cst_47 {dimension_numbers = #tpu.dot_dimension_numbers<[2], [2], [1], [1], [0, 0, 0, 1, 1, 1], [0], [0]>} : vector<2x16x8xf32>, vector<2x16x8xf32>, vector<2x16x16xf32> -> vector<2x16x16xf32>
    "tpu.trace_stop"() : () -> ()
    %68 = vector.extract_strided_slice %60 {offsets = [0, 8], sizes = [32, 8], strides = [1, 1]} : vector<32x96xf32> to vector<32x8xf32>
    %69 = vector.shape_cast %68 : vector<32x8xf32> to vector<2x16x8xf32>
    %70 = vector.extract_strided_slice %60 {offsets = [0, 40], sizes = [32, 8], strides = [1, 1]} : vector<32x96xf32> to vector<32x8xf32>
    %71 = vector.shape_cast %70 : vector<32x8xf32> to vector<2x16x8xf32>
    %72 = vector.extract_strided_slice %60 {offsets = [0, 72], sizes = [32, 8], strides = [1, 1]} : vector<32x96xf32> to vector<32x8xf32>
    %73 = vector.shape_cast %72 : vector<32x8xf32> to vector<2x16x8xf32>
    "tpu.trace_start"() <{level = 10 : i32, message = "bqd,bkd->bqk"}> : () -> ()
    %cst_48 = arith.constant dense<0.000000e+00> : vector<2x16x16xf32>
    %74 = tpu.matmul %69, %71, %cst_48 {dimension_numbers = #tpu.dot_dimension_numbers<[2], [2], [1], [1], [0, 0, 0, 1, 1, 1], [0], [0]>} : vector<2x16x8xf32>, vector<2x16x8xf32>, vector<2x16x16xf32> -> vector<2x16x16xf32>
    "tpu.trace_stop"() : () -> ()
    %75 = vector.extract_strided_slice %60 {offsets = [0, 16], sizes = [32, 8], strides = [1, 1]} : vector<32x96xf32> to vector<32x8xf32>
    %76 = vector.shape_cast %75 : vector<32x8xf32> to vector<2x16x8xf32>
    %77 = vector.extract_strided_slice %60 {offsets = [0, 48], sizes = [32, 8], strides = [1, 1]} : vector<32x96xf32> to vector<32x8xf32>
    %78 = vector.shape_cast %77 : vector<32x8xf32> to vector<2x16x8xf32>
    %79 = vector.extract_strided_slice %60 {offsets = [0, 80], sizes = [32, 8], strides = [1, 1]} : vector<32x96xf32> to vector<32x8xf32>
    %80 = vector.shape_cast %79 : vector<32x8xf32> to vector<2x16x8xf32>
    "tpu.trace_start"() <{level = 10 : i32, message = "bqd,bkd->bqk"}> : () -> ()
    %cst_49 = arith.constant dense<0.000000e+00> : vector<2x16x16xf32>
    %81 = tpu.matmul %76, %78, %cst_49 {dimension_numbers = #tpu.dot_dimension_numbers<[2], [2], [1], [1], [0, 0, 0, 1, 1, 1], [0], [0]>} : vector<2x16x8xf32>, vector<2x16x8xf32>, vector<2x16x16xf32> -> vector<2x16x16xf32>
    "tpu.trace_stop"() : () -> ()
    %82 = vector.extract_strided_slice %60 {offsets = [0, 24], sizes = [32, 8], strides = [1, 1]} : vector<32x96xf32> to vector<32x8xf32>
    %83 = vector.shape_cast %82 : vector<32x8xf32> to vector<2x16x8xf32>
    %84 = vector.extract_strided_slice %60 {offsets = [0, 56], sizes = [32, 8], strides = [1, 1]} : vector<32x96xf32> to vector<32x8xf32>
    %85 = vector.shape_cast %84 : vector<32x8xf32> to vector<2x16x8xf32>
    %86 = vector.extract_strided_slice %60 {offsets = [0, 88], sizes = [32, 8], strides = [1, 1]} : vector<32x96xf32> to vector<32x8xf32>
    %87 = vector.shape_cast %86 : vector<32x8xf32> to vector<2x16x8xf32>
    "tpu.trace_start"() <{level = 10 : i32, message = "bqd,bkd->bqk"}> : () -> ()
    %cst_50 = arith.constant dense<0.000000e+00> : vector<2x16x16xf32>
    %88 = tpu.matmul %83, %85, %cst_50 {dimension_numbers = #tpu.dot_dimension_numbers<[2], [2], [1], [1], [0, 0, 0, 1, 1, 1], [0], [0]>} : vector<2x16x8xf32>, vector<2x16x8xf32>, vector<2x16x16xf32> -> vector<2x16x16xf32>
    "tpu.trace_stop"() : () -> ()
    %89 = tpu.concatenate %67, %74, %81, %88 in 0 : vector<2x16x16xf32>, vector<2x16x16xf32>, vector<2x16x16xf32>, vector<2x16x16xf32> -> vector<8x16x16xf32>
    %cst_51 = arith.constant 0.353553385 : f32
    %90 = vector.broadcast %cst_51 : f32 to vector<8x16x16xf32>
    %91 = arith.mulf %89, %90 : vector<8x16x16xf32>
    %cst_52 = arith.constant dense<0xFF800000> : vector<8x16xf32>
    %92 = vector.multi_reduction <maximumf>, %91, %cst_52 [2] : vector<8x16x16xf32> to vector<8x16xf32>
    %93 = vector.shape_cast %92 : vector<8x16xf32> to vector<8x16x1xf32>
    %94 = vector.broadcast %93 : vector<8x16x1xf32> to vector<8x16x16xf32>
    %95 = arith.subf %91, %94 : vector<8x16x16xf32>
    %96 = math.exp %95 : vector<8x16x16xf32>
    %cst_53 = arith.constant dense<0.000000e+00> : vector<8x16xf32>
    %97 = vector.multi_reduction <add>, %96, %cst_53 [2] : vector<8x16x16xf32> to vector<8x16xf32>
    %98 = vector.shape_cast %97 : vector<8x16xf32> to vector<8x16x1xf32>
    %99 = vector.broadcast %98 : vector<8x16x1xf32> to vector<8x16x16xf32>
    %100 = arith.divf %96, %99 : vector<8x16x16xf32>
    %101 = vector.extract_strided_slice %100 {offsets = [0, 0, 0], sizes = [2, 16, 16], strides = [1, 1, 1]} : vector<8x16x16xf32> to vector<2x16x16xf32>
    "tpu.trace_start"() <{level = 10 : i32, message = "bqk,bkd->bqd"}> : () -> ()
    %cst_54 = arith.constant dense<0.000000e+00> : vector<2x16x8xf32>
    %102 = tpu.matmul %101, %66, %cst_54 {dimension_numbers = #tpu.dot_dimension_numbers<[2], [1], [1], [2], [0, 0, 0, 1, 1, 2], [0], [0]>} : vector<2x16x16xf32>, vector<2x16x8xf32>, vector<2x16x8xf32> -> vector<2x16x8xf32>
    "tpu.trace_stop"() : () -> ()
    %103 = vector.shape_cast %102 : vector<2x16x8xf32> to vector<32x8xf32>
    %104 = vector.extract_strided_slice %100 {offsets = [2, 0, 0], sizes = [2, 16, 16], strides = [1, 1, 1]} : vector<8x16x16xf32> to vector<2x16x16xf32>
    "tpu.trace_start"() <{level = 10 : i32, message = "bqk,bkd->bqd"}> : () -> ()
    %cst_55 = arith.constant dense<0.000000e+00> : vector<2x16x8xf32>
    %105 = tpu.matmul %104, %73, %cst_55 {dimension_numbers = #tpu.dot_dimension_numbers<[2], [1], [1], [2], [0, 0, 0, 1, 1, 2], [0], [0]>} : vector<2x16x16xf32>, vector<2x16x8xf32>, vector<2x16x8xf32> -> vector<2x16x8xf32>
    "tpu.trace_stop"() : () -> ()
    %106 = vector.shape_cast %105 : vector<2x16x8xf32> to vector<32x8xf32>
    %107 = vector.extract_strided_slice %100 {offsets = [4, 0, 0], sizes = [2, 16, 16], strides = [1, 1, 1]} : vector<8x16x16xf32> to vector<2x16x16xf32>
    "tpu.trace_start"() <{level = 10 : i32, message = "bqk,bkd->bqd"}> : () -> ()
    %cst_56 = arith.constant dense<0.000000e+00> : vector<2x16x8xf32>
    %108 = tpu.matmul %107, %80, %cst_56 {dimension_numbers = #tpu.dot_dimension_numbers<[2], [1], [1], [2], [0, 0, 0, 1, 1, 2], [0], [0]>} : vector<2x16x16xf32>, vector<2x16x8xf32>, vector<2x16x8xf32> -> vector<2x16x8xf32>
    "tpu.trace_stop"() : () -> ()
    %109 = vector.shape_cast %108 : vector<2x16x8xf32> to vector<32x8xf32>
    %110 = vector.extract_strided_slice %100 {offsets = [6, 0, 0], sizes = [2, 16, 16], strides = [1, 1, 1]} : vector<8x16x16xf32> to vector<2x16x16xf32>
    "tpu.trace_start"() <{level = 10 : i32, message = "bqk,bkd->bqd"}> : () -> ()
    %cst_57 = arith.constant dense<0.000000e+00> : vector<2x16x8xf32>
    %111 = tpu.matmul %110, %87, %cst_57 {dimension_numbers = #tpu.dot_dimension_numbers<[2], [1], [1], [2], [0, 0, 0, 1, 1, 2], [0], [0]>} : vector<2x16x16xf32>, vector<2x16x8xf32>, vector<2x16x8xf32> -> vector<2x16x8xf32>
    "tpu.trace_stop"() : () -> ()
    %112 = vector.shape_cast %111 : vector<2x16x8xf32> to vector<32x8xf32>
    %113 = tpu.concatenate %103, %106, %109, %112 in 1 : vector<32x8xf32>, vector<32x8xf32>, vector<32x8xf32>, vector<32x8xf32> -> vector<32x32xf32>
    %cst_58 = arith.constant dense<0.000000e+00> : vector<32x32xf32>
    %114 = tpu.matmul %113, %35, %cst_58 {dimension_numbers = #tpu.dot_dimension_numbers<[1], [0], [0], [1], [0, 0, 1, 1], [], []>} : vector<32x32xf32>, vector<32x32xf32>, vector<32x32xf32> -> vector<32x32xf32>
    %115 = vector.broadcast %23 : vector<1x32xf32> to vector<32x32xf32>
    %116 = arith.addf %114, %115 : vector<32x32xf32>
    %117 = arith.addf %15, %116 : vector<32x32xf32>
    %cst_59 = arith.constant dense<0.000000e+00> : vector<32xf32>
    %118 = vector.multi_reduction <add>, %117, %cst_59 [1] : vector<32x32xf32> to vector<32xf32>
    %119 = vector.shape_cast %118 : vector<32xf32> to vector<32x1xf32>
    %cst_60 = arith.constant 3.200000e+01 : f32
    %120 = vector.broadcast %cst_60 : f32 to vector<32x1xf32>
    %121 = arith.divf %119, %120 : vector<32x1xf32>
    %122 = vector.broadcast %121 : vector<32x1xf32> to vector<32x32xf32>
    %123 = arith.subf %117, %122 : vector<32x32xf32>
    %124 = arith.mulf %123, %123 : vector<32x32xf32>
    %cst_61 = arith.constant dense<0.000000e+00> : vector<32xf32>
    %125 = vector.multi_reduction <add>, %124, %cst_61 [1] : vector<32x32xf32> to vector<32xf32>
    %126 = vector.shape_cast %125 : vector<32xf32> to vector<32x1xf32>
    %cst_62 = arith.constant 3.200000e+01 : f32
    %127 = vector.broadcast %cst_62 : f32 to vector<32x1xf32>
    %128 = arith.divf %126, %127 : vector<32x1xf32>
    %cst_63 = arith.constant 9.99999974E-6 : f32
    %129 = vector.broadcast %cst_63 : f32 to vector<32x1xf32>
    %130 = arith.addf %128, %129 : vector<32x1xf32>
    %131 = math.rsqrt %130 : vector<32x1xf32>
    %132 = vector.broadcast %131 : vector<32x1xf32> to vector<32x32xf32>
    %133 = arith.mulf %123, %132 : vector<32x32xf32>
    %134 = vector.broadcast %25 : vector<1x32xf32> to vector<32x32xf32>
    %135 = arith.mulf %133, %134 : vector<32x32xf32>
    %136 = vector.broadcast %27 : vector<1x32xf32> to vector<32x32xf32>
    %137 = arith.addf %135, %136 : vector<32x32xf32>
    %cst_64 = arith.constant dense<0.000000e+00> : vector<32x64xf32>
    %138 = tpu.matmul %137, %37, %cst_64 {dimension_numbers = #tpu.dot_dimension_numbers<[1], [0], [0], [1], [0, 0, 1, 1], [], []>} : vector<32x32xf32>, vector<32x64xf32>, vector<32x64xf32> -> vector<32x64xf32>
    %139 = vector.broadcast %29 : vector<1x64xf32> to vector<32x64xf32>
    %140 = arith.addf %138, %139 : vector<32x64xf32>
    %cst_65 = arith.constant 5.000000e-01 : f32
    %141 = vector.broadcast %cst_65 : f32 to vector<32x64xf32>
    %142 = arith.mulf %141, %140 : vector<32x64xf32>
    %cst_66 = arith.constant 0.707106769 : f32
    %143 = vector.broadcast %cst_66 : f32 to vector<32x64xf32>
    %144 = arith.mulf %140, %143 : vector<32x64xf32>
    %145 = math.absf %144 : vector<32x64xf32>
    %cst_67 = arith.constant 0.327591091 : f32
    %146 = vector.broadcast %cst_67 : f32 to vector<32x64xf32>
    %147 = arith.mulf %146, %145 : vector<32x64xf32>
    %cst_68 = arith.constant 1.000000e+00 : f32
    %148 = vector.broadcast %cst_68 : f32 to vector<32x64xf32>
    %149 = arith.addf %148, %147 : vector<32x64xf32>
    %cst_69 = arith.constant 1.000000e+00 : f32
    %150 = vector.broadcast %cst_69 : f32 to vector<32x64xf32>
    %151 = arith.divf %150, %149 : vector<32x64xf32>
    %cst_70 = arith.constant 1.06140542 : f32
    %152 = vector.broadcast %cst_70 : f32 to vector<32x64xf32>
    %153 = arith.mulf %152, %151 : vector<32x64xf32>
    %cst_71 = arith.constant -1.45315206 : f32
    %154 = vector.broadcast %cst_71 : f32 to vector<32x64xf32>
    %155 = arith.addf %153, %154 : vector<32x64xf32>
    %156 = arith.mulf %155, %151 : vector<32x64xf32>
    %cst_72 = arith.constant 1.42141378 : f32
    %157 = vector.broadcast %cst_72 : f32 to vector<32x64xf32>
    %158 = arith.addf %156, %157 : vector<32x64xf32>
    %159 = arith.mulf %158, %151 : vector<32x64xf32>
    %cst_73 = arith.constant -0.284496725 : f32
    %160 = vector.broadcast %cst_73 : f32 to vector<32x64xf32>
    %161 = arith.addf %159, %160 : vector<32x64xf32>
    %162 = arith.mulf %161, %151 : vector<32x64xf32>
    %cst_74 = arith.constant 0.254829586 : f32
    %163 = vector.broadcast %cst_74 : f32 to vector<32x64xf32>
    %164 = arith.addf %162, %163 : vector<32x64xf32>
    %165 = arith.mulf %164, %151 : vector<32x64xf32>
    %cst_75 = arith.constant 0.000000e+00 : f32
    %166 = vector.broadcast %cst_75 : f32 to vector<32x64xf32>
    %167 = arith.subf %166, %145 : vector<32x64xf32>
    %168 = arith.mulf %167, %145 : vector<32x64xf32>
    %169 = math.exp %168 : vector<32x64xf32>
    %170 = arith.mulf %165, %169 : vector<32x64xf32>
    %cst_76 = arith.constant 1.000000e+00 : f32
    %171 = vector.broadcast %cst_76 : f32 to vector<32x64xf32>
    %172 = arith.subf %171, %170 : vector<32x64xf32>
    %cst_77 = arith.constant 0.000000e+00 : f32
    %173 = vector.broadcast %cst_77 : f32 to vector<32x64xf32>
    %174 = arith.cmpf oge, %144, %173 : vector<32x64xf32>
    %cst_78 = arith.constant 0.000000e+00 : f32
    %175 = vector.broadcast %cst_78 : f32 to vector<32x64xf32>
    %176 = arith.subf %175, %172 : vector<32x64xf32>
    %177 = arith.select %174, %172, %176 : vector<32x64xi1>, vector<32x64xf32>
    %cst_79 = arith.constant 1.000000e+00 : f32
    %178 = vector.broadcast %cst_79 : f32 to vector<32x64xf32>
    %179 = arith.addf %178, %177 : vector<32x64xf32>
    %180 = arith.mulf %142, %179 : vector<32x64xf32>
    %c0_80 = arith.constant 0 : index
    %c0_81 = arith.constant 0 : index
    %c0_82 = arith.constant 0 : index
    %181 = vector.load %arg6[%c0_80, %c0_81, %c0_82] : memref<2x64x32xf32, #tpu.memory_space<vmem>>, vector<1x64x32xf32>
    %182 = vector.shape_cast %181 : vector<1x64x32xf32> to vector<64x32xf32>
    %cst_83 = arith.constant dense<0.000000e+00> : vector<32x32xf32>
    %183 = tpu.matmul %180, %182, %cst_83 {dimension_numbers = #tpu.dot_dimension_numbers<[1], [0], [0], [1], [0, 0, 1, 1], [], []>} : vector<32x64xf32>, vector<64x32xf32>, vector<32x32xf32> -> vector<32x32xf32>
    %184 = vector.broadcast %31 : vector<1x32xf32> to vector<32x32xf32>
    %185 = arith.addf %183, %184 : vector<32x32xf32>
    %186 = arith.addf %117, %185 : vector<32x32xf32>
    %c1_84 = arith.constant 1 : index
    %c0_85 = arith.constant 0 : index
    %c0_86 = arith.constant 0 : index
    %187 = vector.load %arg4[%c1_84, %c0_85, %c0_86] : memref<2x8x128xf32, #tpu.memory_space<vmem>>, vector<1x1x32xf32>
    %188 = vector.shape_cast %187 : vector<1x1x32xf32> to vector<1x32xf32>
    %c1_87 = arith.constant 1 : index
    %c1_88 = arith.constant 1 : index
    %c0_89 = arith.constant 0 : index
    %189 = vector.load %arg4[%c1_87, %c1_88, %c0_89] : memref<2x8x128xf32, #tpu.memory_space<vmem>>, vector<1x1x32xf32>
    %190 = vector.shape_cast %189 : vector<1x1x32xf32> to vector<1x32xf32>
    %c1_90 = arith.constant 1 : index
    %c2_91 = arith.constant 2 : index
    %c0_92 = arith.constant 0 : index
    %191 = vector.load %arg4[%c1_90, %c2_91, %c0_92] : memref<2x8x128xf32, #tpu.memory_space<vmem>>, vector<1x1x96xf32>
    %192 = vector.shape_cast %191 : vector<1x1x96xf32> to vector<1x96xf32>
    %c1_93 = arith.constant 1 : index
    %c3_94 = arith.constant 3 : index
    %c0_95 = arith.constant 0 : index
    %193 = vector.load %arg4[%c1_93, %c3_94, %c0_95] : memref<2x8x128xf32, #tpu.memory_space<vmem>>, vector<1x1x32xf32>
    %194 = vector.shape_cast %193 : vector<1x1x32xf32> to vector<1x32xf32>
    %c1_96 = arith.constant 1 : index
    %c4_97 = arith.constant 4 : index
    %c0_98 = arith.constant 0 : index
    %195 = vector.load %arg4[%c1_96, %c4_97, %c0_98] : memref<2x8x128xf32, #tpu.memory_space<vmem>>, vector<1x1x32xf32>
    %196 = vector.shape_cast %195 : vector<1x1x32xf32> to vector<1x32xf32>
    %c1_99 = arith.constant 1 : index
    %c5_100 = arith.constant 5 : index
    %c0_101 = arith.constant 0 : index
    %197 = vector.load %arg4[%c1_99, %c5_100, %c0_101] : memref<2x8x128xf32, #tpu.memory_space<vmem>>, vector<1x1x32xf32>
    %198 = vector.shape_cast %197 : vector<1x1x32xf32> to vector<1x32xf32>
    %c1_102 = arith.constant 1 : index
    %c6_103 = arith.constant 6 : index
    %c0_104 = arith.constant 0 : index
    %199 = vector.load %arg4[%c1_102, %c6_103, %c0_104] : memref<2x8x128xf32, #tpu.memory_space<vmem>>, vector<1x1x64xf32>
    %200 = vector.shape_cast %199 : vector<1x1x64xf32> to vector<1x64xf32>
    %c1_105 = arith.constant 1 : index
    %c7_106 = arith.constant 7 : index
    %c0_107 = arith.constant 0 : index
    %201 = vector.load %arg4[%c1_105, %c7_106, %c0_107] : memref<2x8x128xf32, #tpu.memory_space<vmem>>, vector<1x1x32xf32>
    %202 = vector.shape_cast %201 : vector<1x1x32xf32> to vector<1x32xf32>
    %c1_108 = arith.constant 1 : index
    %c0_109 = arith.constant 0 : index
    %c0_110 = arith.constant 0 : index
    %203 = vector.load %arg5[%c1_108, %c0_109, %c0_110] : memref<2x32x192xf32, #tpu.memory_space<vmem>>, vector<1x32x96xf32>
    %204 = vector.shape_cast %203 : vector<1x32x96xf32> to vector<32x96xf32>
    %c1_111 = arith.constant 1 : index
    %c0_112 = arith.constant 0 : index
    %c96_113 = arith.constant 96 : index
    %205 = vector.load %arg5[%c1_111, %c0_112, %c96_113] : memref<2x32x192xf32, #tpu.memory_space<vmem>>, vector<1x32x32xf32>
    %206 = vector.shape_cast %205 : vector<1x32x32xf32> to vector<32x32xf32>
    %c1_114 = arith.constant 1 : index
    %c0_115 = arith.constant 0 : index
    %c128_116 = arith.constant 128 : index
    %207 = vector.load %arg5[%c1_114, %c0_115, %c128_116] : memref<2x32x192xf32, #tpu.memory_space<vmem>>, vector<1x32x64xf32>
    %208 = vector.shape_cast %207 : vector<1x32x64xf32> to vector<32x64xf32>
    %cst_117 = arith.constant dense<0.000000e+00> : vector<32xf32>
    %209 = vector.multi_reduction <add>, %186, %cst_117 [1] : vector<32x32xf32> to vector<32xf32>
    %210 = vector.shape_cast %209 : vector<32xf32> to vector<32x1xf32>
    %cst_118 = arith.constant 3.200000e+01 : f32
    %211 = vector.broadcast %cst_118 : f32 to vector<32x1xf32>
    %212 = arith.divf %210, %211 : vector<32x1xf32>
    %213 = vector.broadcast %212 : vector<32x1xf32> to vector<32x32xf32>
    %214 = arith.subf %186, %213 : vector<32x32xf32>
    %215 = arith.mulf %214, %214 : vector<32x32xf32>
    %cst_119 = arith.constant dense<0.000000e+00> : vector<32xf32>
    %216 = vector.multi_reduction <add>, %215, %cst_119 [1] : vector<32x32xf32> to vector<32xf32>
    %217 = vector.shape_cast %216 : vector<32xf32> to vector<32x1xf32>
    %cst_120 = arith.constant 3.200000e+01 : f32
    %218 = vector.broadcast %cst_120 : f32 to vector<32x1xf32>
    %219 = arith.divf %217, %218 : vector<32x1xf32>
    %cst_121 = arith.constant 9.99999974E-6 : f32
    %220 = vector.broadcast %cst_121 : f32 to vector<32x1xf32>
    %221 = arith.addf %219, %220 : vector<32x1xf32>
    %222 = math.rsqrt %221 : vector<32x1xf32>
    %223 = vector.broadcast %222 : vector<32x1xf32> to vector<32x32xf32>
    %224 = arith.mulf %214, %223 : vector<32x32xf32>
    %225 = vector.broadcast %188 : vector<1x32xf32> to vector<32x32xf32>
    %226 = arith.mulf %224, %225 : vector<32x32xf32>
    %227 = vector.broadcast %190 : vector<1x32xf32> to vector<32x32xf32>
    %228 = arith.addf %226, %227 : vector<32x32xf32>
    %cst_122 = arith.constant dense<0.000000e+00> : vector<32x96xf32>
    %229 = tpu.matmul %228, %204, %cst_122 {dimension_numbers = #tpu.dot_dimension_numbers<[1], [0], [0], [1], [0, 0, 1, 1], [], []>} : vector<32x32xf32>, vector<32x96xf32>, vector<32x96xf32> -> vector<32x96xf32>
    %230 = vector.broadcast %192 : vector<1x96xf32> to vector<32x96xf32>
    %231 = arith.addf %229, %230 : vector<32x96xf32>
    %232 = vector.extract_strided_slice %231 {offsets = [0, 0], sizes = [32, 8], strides = [1, 1]} : vector<32x96xf32> to vector<32x8xf32>
    %233 = vector.shape_cast %232 : vector<32x8xf32> to vector<2x16x8xf32>
    %234 = vector.extract_strided_slice %231 {offsets = [0, 32], sizes = [32, 8], strides = [1, 1]} : vector<32x96xf32> to vector<32x8xf32>
    %235 = vector.shape_cast %234 : vector<32x8xf32> to vector<2x16x8xf32>
    %236 = vector.extract_strided_slice %231 {offsets = [0, 64], sizes = [32, 8], strides = [1, 1]} : vector<32x96xf32> to vector<32x8xf32>
    %237 = vector.shape_cast %236 : vector<32x8xf32> to vector<2x16x8xf32>
    "tpu.trace_start"() <{level = 10 : i32, message = "bqd,bkd->bqk"}> : () -> ()
    %cst_123 = arith.constant dense<0.000000e+00> : vector<2x16x16xf32>
    %238 = tpu.matmul %233, %235, %cst_123 {dimension_numbers = #tpu.dot_dimension_numbers<[2], [2], [1], [1], [0, 0, 0, 1, 1, 1], [0], [0]>} : vector<2x16x8xf32>, vector<2x16x8xf32>, vector<2x16x16xf32> -> vector<2x16x16xf32>
    "tpu.trace_stop"() : () -> ()
    %239 = vector.extract_strided_slice %231 {offsets = [0, 8], sizes = [32, 8], strides = [1, 1]} : vector<32x96xf32> to vector<32x8xf32>
    %240 = vector.shape_cast %239 : vector<32x8xf32> to vector<2x16x8xf32>
    %241 = vector.extract_strided_slice %231 {offsets = [0, 40], sizes = [32, 8], strides = [1, 1]} : vector<32x96xf32> to vector<32x8xf32>
    %242 = vector.shape_cast %241 : vector<32x8xf32> to vector<2x16x8xf32>
    %243 = vector.extract_strided_slice %231 {offsets = [0, 72], sizes = [32, 8], strides = [1, 1]} : vector<32x96xf32> to vector<32x8xf32>
    %244 = vector.shape_cast %243 : vector<32x8xf32> to vector<2x16x8xf32>
    "tpu.trace_start"() <{level = 10 : i32, message = "bqd,bkd->bqk"}> : () -> ()
    %cst_124 = arith.constant dense<0.000000e+00> : vector<2x16x16xf32>
    %245 = tpu.matmul %240, %242, %cst_124 {dimension_numbers = #tpu.dot_dimension_numbers<[2], [2], [1], [1], [0, 0, 0, 1, 1, 1], [0], [0]>} : vector<2x16x8xf32>, vector<2x16x8xf32>, vector<2x16x16xf32> -> vector<2x16x16xf32>
    "tpu.trace_stop"() : () -> ()
    %246 = vector.extract_strided_slice %231 {offsets = [0, 16], sizes = [32, 8], strides = [1, 1]} : vector<32x96xf32> to vector<32x8xf32>
    %247 = vector.shape_cast %246 : vector<32x8xf32> to vector<2x16x8xf32>
    %248 = vector.extract_strided_slice %231 {offsets = [0, 48], sizes = [32, 8], strides = [1, 1]} : vector<32x96xf32> to vector<32x8xf32>
    %249 = vector.shape_cast %248 : vector<32x8xf32> to vector<2x16x8xf32>
    %250 = vector.extract_strided_slice %231 {offsets = [0, 80], sizes = [32, 8], strides = [1, 1]} : vector<32x96xf32> to vector<32x8xf32>
    %251 = vector.shape_cast %250 : vector<32x8xf32> to vector<2x16x8xf32>
    "tpu.trace_start"() <{level = 10 : i32, message = "bqd,bkd->bqk"}> : () -> ()
    %cst_125 = arith.constant dense<0.000000e+00> : vector<2x16x16xf32>
    %252 = tpu.matmul %247, %249, %cst_125 {dimension_numbers = #tpu.dot_dimension_numbers<[2], [2], [1], [1], [0, 0, 0, 1, 1, 1], [0], [0]>} : vector<2x16x8xf32>, vector<2x16x8xf32>, vector<2x16x16xf32> -> vector<2x16x16xf32>
    "tpu.trace_stop"() : () -> ()
    %253 = vector.extract_strided_slice %231 {offsets = [0, 24], sizes = [32, 8], strides = [1, 1]} : vector<32x96xf32> to vector<32x8xf32>
    %254 = vector.shape_cast %253 : vector<32x8xf32> to vector<2x16x8xf32>
    %255 = vector.extract_strided_slice %231 {offsets = [0, 56], sizes = [32, 8], strides = [1, 1]} : vector<32x96xf32> to vector<32x8xf32>
    %256 = vector.shape_cast %255 : vector<32x8xf32> to vector<2x16x8xf32>
    %257 = vector.extract_strided_slice %231 {offsets = [0, 88], sizes = [32, 8], strides = [1, 1]} : vector<32x96xf32> to vector<32x8xf32>
    %258 = vector.shape_cast %257 : vector<32x8xf32> to vector<2x16x8xf32>
    "tpu.trace_start"() <{level = 10 : i32, message = "bqd,bkd->bqk"}> : () -> ()
    %cst_126 = arith.constant dense<0.000000e+00> : vector<2x16x16xf32>
    %259 = tpu.matmul %254, %256, %cst_126 {dimension_numbers = #tpu.dot_dimension_numbers<[2], [2], [1], [1], [0, 0, 0, 1, 1, 1], [0], [0]>} : vector<2x16x8xf32>, vector<2x16x8xf32>, vector<2x16x16xf32> -> vector<2x16x16xf32>
    "tpu.trace_stop"() : () -> ()
    %260 = tpu.concatenate %238, %245, %252, %259 in 0 : vector<2x16x16xf32>, vector<2x16x16xf32>, vector<2x16x16xf32>, vector<2x16x16xf32> -> vector<8x16x16xf32>
    %cst_127 = arith.constant 0.353553385 : f32
    %261 = vector.broadcast %cst_127 : f32 to vector<8x16x16xf32>
    %262 = arith.mulf %260, %261 : vector<8x16x16xf32>
    %cst_128 = arith.constant dense<0xFF800000> : vector<8x16xf32>
    %263 = vector.multi_reduction <maximumf>, %262, %cst_128 [2] : vector<8x16x16xf32> to vector<8x16xf32>
    %264 = vector.shape_cast %263 : vector<8x16xf32> to vector<8x16x1xf32>
    %265 = vector.broadcast %264 : vector<8x16x1xf32> to vector<8x16x16xf32>
    %266 = arith.subf %262, %265 : vector<8x16x16xf32>
    %267 = math.exp %266 : vector<8x16x16xf32>
    %cst_129 = arith.constant dense<0.000000e+00> : vector<8x16xf32>
    %268 = vector.multi_reduction <add>, %267, %cst_129 [2] : vector<8x16x16xf32> to vector<8x16xf32>
    %269 = vector.shape_cast %268 : vector<8x16xf32> to vector<8x16x1xf32>
    %270 = vector.broadcast %269 : vector<8x16x1xf32> to vector<8x16x16xf32>
    %271 = arith.divf %267, %270 : vector<8x16x16xf32>
    %272 = vector.extract_strided_slice %271 {offsets = [0, 0, 0], sizes = [2, 16, 16], strides = [1, 1, 1]} : vector<8x16x16xf32> to vector<2x16x16xf32>
    "tpu.trace_start"() <{level = 10 : i32, message = "bqk,bkd->bqd"}> : () -> ()
    %cst_130 = arith.constant dense<0.000000e+00> : vector<2x16x8xf32>
    %273 = tpu.matmul %272, %237, %cst_130 {dimension_numbers = #tpu.dot_dimension_numbers<[2], [1], [1], [2], [0, 0, 0, 1, 1, 2], [0], [0]>} : vector<2x16x16xf32>, vector<2x16x8xf32>, vector<2x16x8xf32> -> vector<2x16x8xf32>
    "tpu.trace_stop"() : () -> ()
    %274 = vector.shape_cast %273 : vector<2x16x8xf32> to vector<32x8xf32>
    %275 = vector.extract_strided_slice %271 {offsets = [2, 0, 0], sizes = [2, 16, 16], strides = [1, 1, 1]} : vector<8x16x16xf32> to vector<2x16x16xf32>
    "tpu.trace_start"() <{level = 10 : i32, message = "bqk,bkd->bqd"}> : () -> ()
    %cst_131 = arith.constant dense<0.000000e+00> : vector<2x16x8xf32>
    %276 = tpu.matmul %275, %244, %cst_131 {dimension_numbers = #tpu.dot_dimension_numbers<[2], [1], [1], [2], [0, 0, 0, 1, 1, 2], [0], [0]>} : vector<2x16x16xf32>, vector<2x16x8xf32>, vector<2x16x8xf32> -> vector<2x16x8xf32>
    "tpu.trace_stop"() : () -> ()
    %277 = vector.shape_cast %276 : vector<2x16x8xf32> to vector<32x8xf32>
    %278 = vector.extract_strided_slice %271 {offsets = [4, 0, 0], sizes = [2, 16, 16], strides = [1, 1, 1]} : vector<8x16x16xf32> to vector<2x16x16xf32>
    "tpu.trace_start"() <{level = 10 : i32, message = "bqk,bkd->bqd"}> : () -> ()
    %cst_132 = arith.constant dense<0.000000e+00> : vector<2x16x8xf32>
    %279 = tpu.matmul %278, %251, %cst_132 {dimension_numbers = #tpu.dot_dimension_numbers<[2], [1], [1], [2], [0, 0, 0, 1, 1, 2], [0], [0]>} : vector<2x16x16xf32>, vector<2x16x8xf32>, vector<2x16x8xf32> -> vector<2x16x8xf32>
    "tpu.trace_stop"() : () -> ()
    %280 = vector.shape_cast %279 : vector<2x16x8xf32> to vector<32x8xf32>
    %281 = vector.extract_strided_slice %271 {offsets = [6, 0, 0], sizes = [2, 16, 16], strides = [1, 1, 1]} : vector<8x16x16xf32> to vector<2x16x16xf32>
    "tpu.trace_start"() <{level = 10 : i32, message = "bqk,bkd->bqd"}> : () -> ()
    %cst_133 = arith.constant dense<0.000000e+00> : vector<2x16x8xf32>
    %282 = tpu.matmul %281, %258, %cst_133 {dimension_numbers = #tpu.dot_dimension_numbers<[2], [1], [1], [2], [0, 0, 0, 1, 1, 2], [0], [0]>} : vector<2x16x16xf32>, vector<2x16x8xf32>, vector<2x16x8xf32> -> vector<2x16x8xf32>
    "tpu.trace_stop"() : () -> ()
    %283 = vector.shape_cast %282 : vector<2x16x8xf32> to vector<32x8xf32>
    %284 = tpu.concatenate %274, %277, %280, %283 in 1 : vector<32x8xf32>, vector<32x8xf32>, vector<32x8xf32>, vector<32x8xf32> -> vector<32x32xf32>
    %cst_134 = arith.constant dense<0.000000e+00> : vector<32x32xf32>
    %285 = tpu.matmul %284, %206, %cst_134 {dimension_numbers = #tpu.dot_dimension_numbers<[1], [0], [0], [1], [0, 0, 1, 1], [], []>} : vector<32x32xf32>, vector<32x32xf32>, vector<32x32xf32> -> vector<32x32xf32>
    %286 = vector.broadcast %194 : vector<1x32xf32> to vector<32x32xf32>
    %287 = arith.addf %285, %286 : vector<32x32xf32>
    %288 = arith.addf %186, %287 : vector<32x32xf32>
    %cst_135 = arith.constant dense<0.000000e+00> : vector<32xf32>
    %289 = vector.multi_reduction <add>, %288, %cst_135 [1] : vector<32x32xf32> to vector<32xf32>
    %290 = vector.shape_cast %289 : vector<32xf32> to vector<32x1xf32>
    %cst_136 = arith.constant 3.200000e+01 : f32
    %291 = vector.broadcast %cst_136 : f32 to vector<32x1xf32>
    %292 = arith.divf %290, %291 : vector<32x1xf32>
    %293 = vector.broadcast %292 : vector<32x1xf32> to vector<32x32xf32>
    %294 = arith.subf %288, %293 : vector<32x32xf32>
    %295 = arith.mulf %294, %294 : vector<32x32xf32>
    %cst_137 = arith.constant dense<0.000000e+00> : vector<32xf32>
    %296 = vector.multi_reduction <add>, %295, %cst_137 [1] : vector<32x32xf32> to vector<32xf32>
    %297 = vector.shape_cast %296 : vector<32xf32> to vector<32x1xf32>
    %cst_138 = arith.constant 3.200000e+01 : f32
    %298 = vector.broadcast %cst_138 : f32 to vector<32x1xf32>
    %299 = arith.divf %297, %298 : vector<32x1xf32>
    %cst_139 = arith.constant 9.99999974E-6 : f32
    %300 = vector.broadcast %cst_139 : f32 to vector<32x1xf32>
    %301 = arith.addf %299, %300 : vector<32x1xf32>
    %302 = math.rsqrt %301 : vector<32x1xf32>
    %303 = vector.broadcast %302 : vector<32x1xf32> to vector<32x32xf32>
    %304 = arith.mulf %294, %303 : vector<32x32xf32>
    %305 = vector.broadcast %196 : vector<1x32xf32> to vector<32x32xf32>
    %306 = arith.mulf %304, %305 : vector<32x32xf32>
    %307 = vector.broadcast %198 : vector<1x32xf32> to vector<32x32xf32>
    %308 = arith.addf %306, %307 : vector<32x32xf32>
    %cst_140 = arith.constant dense<0.000000e+00> : vector<32x64xf32>
    %309 = tpu.matmul %308, %208, %cst_140 {dimension_numbers = #tpu.dot_dimension_numbers<[1], [0], [0], [1], [0, 0, 1, 1], [], []>} : vector<32x32xf32>, vector<32x64xf32>, vector<32x64xf32> -> vector<32x64xf32>
    %310 = vector.broadcast %200 : vector<1x64xf32> to vector<32x64xf32>
    %311 = arith.addf %309, %310 : vector<32x64xf32>
    %cst_141 = arith.constant 5.000000e-01 : f32
    %312 = vector.broadcast %cst_141 : f32 to vector<32x64xf32>
    %313 = arith.mulf %312, %311 : vector<32x64xf32>
    %cst_142 = arith.constant 0.707106769 : f32
    %314 = vector.broadcast %cst_142 : f32 to vector<32x64xf32>
    %315 = arith.mulf %311, %314 : vector<32x64xf32>
    %316 = math.absf %315 : vector<32x64xf32>
    %cst_143 = arith.constant 0.327591091 : f32
    %317 = vector.broadcast %cst_143 : f32 to vector<32x64xf32>
    %318 = arith.mulf %317, %316 : vector<32x64xf32>
    %cst_144 = arith.constant 1.000000e+00 : f32
    %319 = vector.broadcast %cst_144 : f32 to vector<32x64xf32>
    %320 = arith.addf %319, %318 : vector<32x64xf32>
    %cst_145 = arith.constant 1.000000e+00 : f32
    %321 = vector.broadcast %cst_145 : f32 to vector<32x64xf32>
    %322 = arith.divf %321, %320 : vector<32x64xf32>
    %cst_146 = arith.constant 1.06140542 : f32
    %323 = vector.broadcast %cst_146 : f32 to vector<32x64xf32>
    %324 = arith.mulf %323, %322 : vector<32x64xf32>
    %cst_147 = arith.constant -1.45315206 : f32
    %325 = vector.broadcast %cst_147 : f32 to vector<32x64xf32>
    %326 = arith.addf %324, %325 : vector<32x64xf32>
    %327 = arith.mulf %326, %322 : vector<32x64xf32>
    %cst_148 = arith.constant 1.42141378 : f32
    %328 = vector.broadcast %cst_148 : f32 to vector<32x64xf32>
    %329 = arith.addf %327, %328 : vector<32x64xf32>
    %330 = arith.mulf %329, %322 : vector<32x64xf32>
    %cst_149 = arith.constant -0.284496725 : f32
    %331 = vector.broadcast %cst_149 : f32 to vector<32x64xf32>
    %332 = arith.addf %330, %331 : vector<32x64xf32>
    %333 = arith.mulf %332, %322 : vector<32x64xf32>
    %cst_150 = arith.constant 0.254829586 : f32
    %334 = vector.broadcast %cst_150 : f32 to vector<32x64xf32>
    %335 = arith.addf %333, %334 : vector<32x64xf32>
    %336 = arith.mulf %335, %322 : vector<32x64xf32>
    %cst_151 = arith.constant 0.000000e+00 : f32
    %337 = vector.broadcast %cst_151 : f32 to vector<32x64xf32>
    %338 = arith.subf %337, %316 : vector<32x64xf32>
    %339 = arith.mulf %338, %316 : vector<32x64xf32>
    %340 = math.exp %339 : vector<32x64xf32>
    %341 = arith.mulf %336, %340 : vector<32x64xf32>
    %cst_152 = arith.constant 1.000000e+00 : f32
    %342 = vector.broadcast %cst_152 : f32 to vector<32x64xf32>
    %343 = arith.subf %342, %341 : vector<32x64xf32>
    %cst_153 = arith.constant 0.000000e+00 : f32
    %344 = vector.broadcast %cst_153 : f32 to vector<32x64xf32>
    %345 = arith.cmpf oge, %315, %344 : vector<32x64xf32>
    %cst_154 = arith.constant 0.000000e+00 : f32
    %346 = vector.broadcast %cst_154 : f32 to vector<32x64xf32>
    %347 = arith.subf %346, %343 : vector<32x64xf32>
    %348 = arith.select %345, %343, %347 : vector<32x64xi1>, vector<32x64xf32>
    %cst_155 = arith.constant 1.000000e+00 : f32
    %349 = vector.broadcast %cst_155 : f32 to vector<32x64xf32>
    %350 = arith.addf %349, %348 : vector<32x64xf32>
    %351 = arith.mulf %313, %350 : vector<32x64xf32>
    %c1_156 = arith.constant 1 : index
    %c0_157 = arith.constant 0 : index
    %c0_158 = arith.constant 0 : index
    %352 = vector.load %arg6[%c1_156, %c0_157, %c0_158] : memref<2x64x32xf32, #tpu.memory_space<vmem>>, vector<1x64x32xf32>
    %353 = vector.shape_cast %352 : vector<1x64x32xf32> to vector<64x32xf32>
    %cst_159 = arith.constant dense<0.000000e+00> : vector<32x32xf32>
    %354 = tpu.matmul %351, %353, %cst_159 {dimension_numbers = #tpu.dot_dimension_numbers<[1], [0], [0], [1], [0, 0, 1, 1], [], []>} : vector<32x64xf32>, vector<64x32xf32>, vector<32x32xf32> -> vector<32x32xf32>
    %355 = vector.broadcast %202 : vector<1x32xf32> to vector<32x32xf32>
    %356 = arith.addf %354, %355 : vector<32x32xf32>
    %357 = arith.addf %288, %356 : vector<32x32xf32>
    %cst_160 = arith.constant dense<0.000000e+00> : vector<32x32xf32>
    %358 = tpu.matmul %357, %2, %cst_160 {dimension_numbers = #tpu.dot_dimension_numbers<[1], [0], [0], [1], [0, 0, 1, 1], [], []>} : vector<32x32xf32>, vector<32x32xf32>, vector<32x32xf32> -> vector<32x32xf32>
    %359 = vector.broadcast %4 : vector<1x32xf32> to vector<32x32xf32>
    %360 = arith.addf %358, %359 : vector<32x32xf32>
    %cst_161 = arith.constant 5.000000e-01 : f32
    %361 = vector.broadcast %cst_161 : f32 to vector<32x32xf32>
    %362 = arith.mulf %361, %360 : vector<32x32xf32>
    %cst_162 = arith.constant 0.707106769 : f32
    %363 = vector.broadcast %cst_162 : f32 to vector<32x32xf32>
    %364 = arith.mulf %360, %363 : vector<32x32xf32>
    %365 = math.absf %364 : vector<32x32xf32>
    %cst_163 = arith.constant 0.327591091 : f32
    %366 = vector.broadcast %cst_163 : f32 to vector<32x32xf32>
    %367 = arith.mulf %366, %365 : vector<32x32xf32>
    %cst_164 = arith.constant 1.000000e+00 : f32
    %368 = vector.broadcast %cst_164 : f32 to vector<32x32xf32>
    %369 = arith.addf %368, %367 : vector<32x32xf32>
    %cst_165 = arith.constant 1.000000e+00 : f32
    %370 = vector.broadcast %cst_165 : f32 to vector<32x32xf32>
    %371 = arith.divf %370, %369 : vector<32x32xf32>
    %cst_166 = arith.constant 1.06140542 : f32
    %372 = vector.broadcast %cst_166 : f32 to vector<32x32xf32>
    %373 = arith.mulf %372, %371 : vector<32x32xf32>
    %cst_167 = arith.constant -1.45315206 : f32
    %374 = vector.broadcast %cst_167 : f32 to vector<32x32xf32>
    %375 = arith.addf %373, %374 : vector<32x32xf32>
    %376 = arith.mulf %375, %371 : vector<32x32xf32>
    %cst_168 = arith.constant 1.42141378 : f32
    %377 = vector.broadcast %cst_168 : f32 to vector<32x32xf32>
    %378 = arith.addf %376, %377 : vector<32x32xf32>
    %379 = arith.mulf %378, %371 : vector<32x32xf32>
    %cst_169 = arith.constant -0.284496725 : f32
    %380 = vector.broadcast %cst_169 : f32 to vector<32x32xf32>
    %381 = arith.addf %379, %380 : vector<32x32xf32>
    %382 = arith.mulf %381, %371 : vector<32x32xf32>
    %cst_170 = arith.constant 0.254829586 : f32
    %383 = vector.broadcast %cst_170 : f32 to vector<32x32xf32>
    %384 = arith.addf %382, %383 : vector<32x32xf32>
    %385 = arith.mulf %384, %371 : vector<32x32xf32>
    %cst_171 = arith.constant 0.000000e+00 : f32
    %386 = vector.broadcast %cst_171 : f32 to vector<32x32xf32>
    %387 = arith.subf %386, %365 : vector<32x32xf32>
    %388 = arith.mulf %387, %365 : vector<32x32xf32>
    %389 = math.exp %388 : vector<32x32xf32>
    %390 = arith.mulf %385, %389 : vector<32x32xf32>
    %cst_172 = arith.constant 1.000000e+00 : f32
    %391 = vector.broadcast %cst_172 : f32 to vector<32x32xf32>
    %392 = arith.subf %391, %390 : vector<32x32xf32>
    %cst_173 = arith.constant 0.000000e+00 : f32
    %393 = vector.broadcast %cst_173 : f32 to vector<32x32xf32>
    %394 = arith.cmpf oge, %364, %393 : vector<32x32xf32>
    %cst_174 = arith.constant 0.000000e+00 : f32
    %395 = vector.broadcast %cst_174 : f32 to vector<32x32xf32>
    %396 = arith.subf %395, %392 : vector<32x32xf32>
    %397 = arith.select %394, %392, %396 : vector<32x32xi1>, vector<32x32xf32>
    %cst_175 = arith.constant 1.000000e+00 : f32
    %398 = vector.broadcast %cst_175 : f32 to vector<32x32xf32>
    %399 = arith.addf %398, %397 : vector<32x32xf32>
    %400 = arith.mulf %362, %399 : vector<32x32xf32>
    %cst_176 = arith.constant dense<0.000000e+00> : vector<32xf32>
    %401 = vector.multi_reduction <add>, %400, %cst_176 [1] : vector<32x32xf32> to vector<32xf32>
    %402 = vector.shape_cast %401 : vector<32xf32> to vector<32x1xf32>
    %cst_177 = arith.constant 3.200000e+01 : f32
    %403 = vector.broadcast %cst_177 : f32 to vector<32x1xf32>
    %404 = arith.divf %402, %403 : vector<32x1xf32>
    %405 = vector.broadcast %404 : vector<32x1xf32> to vector<32x32xf32>
    %406 = arith.subf %400, %405 : vector<32x32xf32>
    %407 = arith.mulf %406, %406 : vector<32x32xf32>
    %cst_178 = arith.constant dense<0.000000e+00> : vector<32xf32>
    %408 = vector.multi_reduction <add>, %407, %cst_178 [1] : vector<32x32xf32> to vector<32xf32>
    %409 = vector.shape_cast %408 : vector<32xf32> to vector<32x1xf32>
    %cst_179 = arith.constant 3.200000e+01 : f32
    %410 = vector.broadcast %cst_179 : f32 to vector<32x1xf32>
    %411 = arith.divf %409, %410 : vector<32x1xf32>
    %cst_180 = arith.constant 9.99999974E-6 : f32
    %412 = vector.broadcast %cst_180 : f32 to vector<32x1xf32>
    %413 = arith.addf %411, %412 : vector<32x1xf32>
    %414 = math.rsqrt %413 : vector<32x1xf32>
    %415 = vector.broadcast %414 : vector<32x1xf32> to vector<32x32xf32>
    %416 = arith.mulf %406, %415 : vector<32x32xf32>
    %417 = vector.broadcast %5 : vector<1x32xf32> to vector<32x32xf32>
    %418 = arith.mulf %416, %417 : vector<32x32xf32>
    %419 = vector.broadcast %6 : vector<1x32xf32> to vector<32x32xf32>
    %420 = arith.addf %418, %419 : vector<32x32xf32>
    %cst_181 = arith.constant dense<0.000000e+00> : vector<32x128xf32>
    %421 = tpu.matmul %420, %0, %cst_181 {dimension_numbers = #tpu.dot_dimension_numbers<[1], [0], [0], [1], [0, 0, 1, 1], [], []>} : vector<32x32xf32>, vector<32x128xf32>, vector<32x128xf32> -> vector<32x128xf32>
    %422 = vector.shape_cast %421 : vector<32x128xf32> to vector<2x16x128xf32>
    %c0_182 = arith.constant 0 : index
    %c0_183 = arith.constant 0 : index
    %423 = vector.load %arg7[%c0_182, %c0_183] : memref<16x128xf32, #tpu.memory_space<vmem>>, vector<16x128xf32>
    %424 = vector.shape_cast %423 : vector<16x128xf32> to vector<1x16x128xf32>
    %425 = vector.broadcast %424 : vector<1x16x128xf32> to vector<2x16x128xf32>
    %426 = arith.addf %422, %425 : vector<2x16x128xf32>
    %c0_184 = arith.constant 0 : index
    %c0_185 = arith.constant 0 : index
    %c0_186 = arith.constant 0 : index
    %427 = vector.load %arg8[%c0_184, %c0_185, %c0_186] : memref<2x16x128xf32, #tpu.memory_space<vmem>>, vector<2x16x128xf32>
    tpu.vector_store %arg8[%c0_184, %c0_185, %c0_186], %426 {strides = array<i32>} : memref<2x16x128xf32, #tpu.memory_space<vmem>>, vector<2x16x128xf32>,
    return
  }
}

</mosaic_0001>

<bundles_post_ra>
// kernel: maskgit_index_forward.1
= control target key start
LH: loop header
LB: loop body
LE: loop exit
PB: predicated region body
PF: predicated region fallthrough
CT: control target
= control target key end

     0   :  { %13 = vsyncpa [#allocation3], 0  ;;  %s7803_s0 = inlined_call_operand.hbm [shape: f32[2,16,32], index: 0, kind: input, shape index: {}]   ;;  %s7804_s1 = inlined_call_operand.vmem [shape: f32[2,32], index: 1, kind: input, shape index: {}]   ;;  %s7805_s2 = inlined_call_operand.vmem [shape: f32[32,192], index: 2, kind: input, shape index: {}]   ;;  %s7806_s3 = inlined_call_operand.vmem [shape: f32[8,128], index: 3, kind: input, shape index: {}]   ;;  %s7807_s4 = inlined_call_operand.hbm [shape: f32[2,8,128], index: 4, kind: input, shape index: {}]   ;;  %s7808_s5 = inlined_call_operand.vmem [shape: f32[2,32,192], index: 5, kind: input, shape index: {}]   ;;  %s7809_s6 = inlined_call_operand.vmem [shape: f32[2,64,32], index: 6, kind: input, shape index: {}]   ;;  %s7810_s7 = inlined_call_operand.hbm [shape: f32[16,128], index: 7, kind: input, shape index: {}]   ;;  %s7811_s8 = inlined_call_operand.hbm [shape: f32[2,16,128], index: 8, kind: output, shape index: {}]  }
   0x1   :  { %14 = vsyncpa [#allocation6], 0 }
   0x2   :  { %15 = vsyncpa [#allocation4], 0  ;;  %s6479_s27 = smov [#allocation5]   ;;  %s6480_s29 = smov [#allocation2]  }
   0x3   :  { %s39_s28 = sshll.u32 %s6479_s27, 4  ;;  %s21_s30 = sshll.u32 %s6480_s29, 4  ;;  %s40_s28 = int_to_ptr.vmem [resolvable:$true] %s39_s28  ;;  %s22_s30 = int_to_ptr.vmem [resolvable:$true] %s21_s30 }
   0x4   :  { %s6401_s9 = scalar_lea.vmem %s40_s28, 256  ;;  %p6406_p1 = scmp.lt.s32.totalorder %s40_s28, %s40_s28 }
   0x5   :  { %p6402_p0 = scmp.ne.s32.totalorder %s40_s28, %s6401_s9  ;;  %p6407_p2 = scmp.lt.s32.totalorder %s6401_s9, %s6401_s9 }
   0x7   :  { %p6408_p3 = por %p6407_p2, %p6406_p1 }
   0x9   :  { %p6409_p4 = pnand %p6408_p3, %p6402_p0 }
   0xb   :  { %6412 = shalt.err (!%p6409_p4)
}
   0xc   :  { %s6481_s10 = smov 128   ;;  %s6482_s11 = smov 8  }
   0xd   :  { %45 = dma.hbm_to_vmem [thread:$0]  %s7807_s4, 256, %s40_s28, [#allocation6], %s6481_s10, %s6481_s10, %s6482_s11  }
   0xe   :  { %s6421_s14 = scalar_lea.vmem %s22_s30, 512  ;;  %p6426_p6 = scmp.lt.s32.totalorder %s22_s30, %s22_s30 }
   0xf   :  { %p6422_p5 = scmp.ne.s32.totalorder %s22_s30, %s6421_s14  ;;  %p6427_p7 = scmp.lt.s32.totalorder %s6421_s14, %s6421_s14 }
  0x11   :  { %p6428_p8 = por %p6427_p7, %p6426_p6 }
  0x13   :  { %p6429_p9 = pnand %p6428_p8, %p6422_p5 }
  0x15   :  { %6432 = shalt.err (!%p6429_p9)
}
  0x16   :  { %27 = dma.hbm_to_vmem [thread:$0]  %s7803_s0, 512, %s22_s30, [#allocation3], %s6481_s10, %s6481_s10, %s6482_s11  }
  0x17   :  { %s6483_s17 = smov [#allocation7]  }
  0x18   :  { %s55_s18 = sshll.u32 %s6483_s17, 4  ;;  %s56_s18 = int_to_ptr.vmem [resolvable:$true] %s55_s18 }
  0x19   :  { %s6441_s19 = scalar_lea.vmem %s56_s18, 256  ;;  %p6446_p11 = scmp.lt.s32.totalorder %s56_s18, %s56_s18 }
  0x1a   :  { %p6442_p10 = scmp.ne.s32.totalorder %s56_s18, %s6441_s19  ;;  %p6447_p12 = scmp.lt.s32.totalorder %s6441_s19, %s6441_s19 }
  0x1c   :  { %p6448_p13 = por %p6447_p12, %p6446_p11 }
  0x1e   :  { %p6449_p0 = pnand %p6448_p13, %p6442_p10 }
  0x20   :  { %6452 = shalt.err (!%p6449_p0)
}
  0x21   :  { %61 = dma.hbm_to_vmem [thread:$0]  %s7810_s7, 256, %s56_s18, [#allocation6], %s6481_s10, %s6481_s10, %s6482_s11  }
  0x22   :  { %6473 = dma.done.wait [#allocation3], 512  }
  0x23   :  { %6474 = vsyncadd [#allocation3], 4294966784 }
  0x24   :  { %6475 = dma.done.wait [#allocation6], 512  }
  0x25   :  { %6476 = vsyncadd [#allocation6], 4294966784  ;;  %v6484_v0 = vmov 0.0   ;;  %vm6485_vm0 = vmmov 0   ;;  %v78_v1 = vld [vmem:[%s7805_s2 + $0x38] sm:$0xff]  ;;  %v77_v2 = vld [vmem:[%s7805_s2 + $0x28] sm:$0xff]  ;;  %v170_v8 = vlaneseq }
  0x26   :  { %5759 = vmatprep.subr.mxu0 %v6484_v0  ;;  %5767 = vmatprep.mubr.msk.f32.mxu0 %vm6485_vm0, %v6484_v0  ;;  %v76_v3 = vld [vmem:[%s7805_s2 + $0x18] sm:$0xff]  ;;  %v75_v4 = vld [vmem:[%s7805_s2 + $0x8] sm:$0xff]  ;;  %v83_v5 = vld [vmem:[%s7804_s1] sm:$0x3]  ;;  %vm88_vm1 = vcmask 261120   ;;  %vm395_vm2 = vcmask 64512  }
  0x27   :  { %5760 = vmatpush3.msra.mxu0 %v78_v1  ;;  %v6486_v6 = vmov 1966171168   ;;  %v171_v10 = vshrl.u32 %v170_v8, 7  ;;  %v5365_v11 = vld [vmem:[%s7806_s3] ss:$0 sm:$0xff]  ;;  %v164_v23 = vld [vmem:[#allocation2 + $0x10] sm:$0xff] }
  0x28   :  { %5761 = vmatprep.subr.mxu0 %v6484_v0  ;;  %v168_v7 = vunpack.c.l.s4 %v6486_v6  ;;  %v162_v20 = vld [vmem:[#allocation2] sm:$0xff]  ;;  %v163_v24 = vld [vmem:[#allocation2 + $0x8] sm:$0xff]  ;;  %v165_v27 = vld [vmem:[#allocation2 + $0x18] sm:$0xff]  ;;  %s6487_s18 = smov 80   ;;  %s6488_s19 = smov 96   ;;  %vm1130_vm3 = vcmask 130048  }
  0x29   :  { %5762 = vmatpush3.msra.mxu0 %v77_v2  ;;  %v191_v17 = vsub.s32 0, %v171_v10  ;;  %v6611_v55 = vld [vmem:[%s7808_s5 + $0x30] sm:$0xff]  ;;  %v6616_v56 = vld [vmem:[%s7808_s5 + $0x20] sm:$0xff]  ;;  %s6489_s4 = smov 88   ;;  %s6490_s20 = smov 120   ;;  %vm2059_vm4 = vcmask 195584  }
  0x2a   :  { %5763 = vmatprep.subr.mxu0 %v6484_v0  ;;  %v169_v9 = vunpack.c.0.s8 %v168_v7  ;;  %5770 = vmatprep.subr.mxu1 %v6611_v55  ;;  %v6623_v57 = vld [vmem:[%s7808_s5 + $0x10] sm:$0xff]  ;;  %v6632_v58 = vld [vmem:[%s7808_s5] sm:$0xff]  ;;  %s6491_s0 = smov 112   ;;  %s6492_s21 = smov 72   ;;  %vm2474_vm7 = vcmask 523264  }
  0x2b   :  { %5764 = vmatpush3.msra.mxu0 %v76_v3  ;;  %5771 = vmatpush3.msra.mxu1 %v6611_v55  ;;  %v5367_v8 = vld [vmem:[#allocation5] ss:$0 sm:$0xff]  ;;  %s6493_s22 = smov 104   ;;  %s6494_s23 = smov 64  }
  0x2c   :  { %5765 = vmatprep.subr.mxu0 %v6484_v0  ;;  %v172_v12 = vsub.s32 %v169_v9, %v171_v10  ;;  %5772 = vmatprep.subr.mxu1 %v6616_v56  ;;  %v5368_v10 = vld [vmem:[#allocation5 + $0x1] ss:$0 sm:$0xff]  ;;  %s6495_s24 = smov 56   ;;  %s6496_s7 = smov 48  }
  0x2d   :  { %5766 = vmatpush3.msra.mxu0 %v75_v4  ;;  %5773 = vmatpush3.msra.mxu1 %v6616_v56  ;;  %s6497_s25 = smov 40   ;;  %s6498_s26 = smov 32  }
  0x2e   :  { %5768 = vmatmul.mubr.msk.f32.vlgmr.msra.gmra.mxu0 %vm88_vm1, %v83_v5  ;;  %5774 = vmatprep.subr.mxu1 %v6623_v57  ;;  %s6499_s27 = smov 16   ;;  %s6500_s28 = smov 24  }
  0x2f   :  { %5775 = vmatpush3.msra.mxu1 %v6623_v57 }
  0x30   :  { %5776 = vmatprep.subr.mxu1 %v6632_v58 }
  0x31   :  { %5777 = vmatpush3.msra.mxu1 %v6632_v58 }
  0xee   :  { %v158_v13 = vpop.f32.mrf.mxu0 }
  0xef   :  { %v159_v14 = vadd.f32 %v5365_v11, %v158_v13 }
  0xf0   :  { %v5769_v15 = vpop.f32.mrf.mxu0 }
  0xf1   :  { %v173_v16 = vrot.slane %v159_v14, %v172_v12 }
  0xf3   :  { %v174_v18 = vcombine.high %v173_v16, %v173_v16  ;;  %v181_v19 = vrot.slane %v173_v16, %v172_v12 }
  0xf5   :  { %v188_v21 = vrot.slane %v174_v18, %v172_v12  ;;  %v192_v22 = vrot.slane %v181_v19, %v191_v17 }
  0xf7   :  { %v6584_v25 = vadd.f32 %v192_v22, %v162_v20  ;;  %v196_v26 = vrot.slane %v188_v21, %v191_v17  ;;  %v6590_v30 = vadd.f32 %v192_v22, %v163_v24 }
  0xf9   :  { %v219_v28 = vsel %vm88_vm1, %v6584_v25, 0.0  ;;  %v6588_v29 = vadd.f32 %v196_v26, %v164_v23  ;;  %v6594_v32 = vadd.f32 %v196_v26, %v165_v27  ;;  %v222_v33 = vsel %vm88_vm1, %v6590_v30, 0.0  ;;  %v5369_v26 = vld [vmem:[#allocation5 + $0x2] ss:$0 sm:$0xff] }
  0xfa   :  { %220 = vadd.xlane.f32.xlu0 %v219_v28 }
  0xfb   :  { %v225_v31 = vsel %vm88_vm1, %v6588_v29, 0.0  ;;  %v228_v34 = vsel %vm88_vm1, %v6594_v32, 0.0 }
  0xfc   :  { %226 = vadd.xlane.f32.xlu1 %v225_v31 }
  0xfe   :  { %223 = vadd.xlane.f32.xlu0 %v222_v33 }
 0x100   :  { %229 = vadd.xlane.f32.xlu1 %v228_v34 }
 0x183   :  { %v221_v35 = vpop.xlane.xlu0 %220 }
 0x184   :  { %v232_v36 = vmul.f32 0.03125, %v221_v35 }
 0x185   :  { %v227_v37 = vpop.xlane.xlu1 %226 }
 0x186   :  { %v236_v38 = vsub.f32 %v6584_v25, %v232_v36  ;;  %v234_v39 = vmul.f32 0.03125, %v227_v37 }
 0x187   :  { %v224_v40 = vpop.xlane.xlu0 %223 }
 0x188   :  { %v238_v41 = vsub.f32 %v6588_v29, %v234_v39  ;;  %v233_v42 = vmul.f32 0.03125, %v224_v40  ;;  %v240_v43 = vmul.f32 %v236_v38, %v236_v38 }
 0x189   :  { %v230_v44 = vpop.xlane.xlu1 %229 }
 0x18a   :  { %v237_v45 = vsub.f32 %v6590_v30, %v233_v42  ;;  %v235_v46 = vmul.f32 0.03125, %v230_v44  ;;  %v244_v47 = vsel %vm88_vm1, %v240_v43, 0.0  ;;  %v242_v48 = vmul.f32 %v238_v41, %v238_v41 }
 0x18b   :  { %245 = vadd.xlane.f32.xlu0 %v244_v47 }
 0x18c   :  { %v239_v49 = vsub.f32 %v6594_v32, %v235_v46  ;;  %v241_v50 = vmul.f32 %v237_v45, %v237_v45  ;;  %v250_v52 = vsel %vm88_vm1, %v242_v48, 0.0 }
 0x18e   :  { %v247_v51 = vsel %vm88_vm1, %v241_v50, 0.0  ;;  %v243_v53 = vmul.f32 %v239_v49, %v239_v49 }
 0x18f   :  { %248 = vadd.xlane.f32.xlu1 %v247_v51  ;;  %251 = vadd.xlane.f32.xlu0 %v250_v52 }
 0x190   :  { %v253_v54 = vsel %vm88_vm1, %v243_v53, 0.0 }
 0x193   :  { %254 = vadd.xlane.f32.xlu1 %v253_v54 }
 0x214   :  { %v246_v59 = vpop.xlane.xlu0 %245 }
 0x215   :  { %v256_v60 = vmul.f32 0.03125, %v246_v59 }
 0x217   :  { %v260_v61 = vadd.f32 1e-05, %v256_v60 }
 0x218   :  { %v252_v62 = vpop.xlane.xlu0 %251  ;;  %v249_v63 = vpop.xlane.xlu1 %248 }
 0x219   :  { %6173 = vrsqrt.f32 %v260_v61  ;;  %v258_v0 = vmul.f32 0.03125, %v252_v62  ;;  %v257_v1 = vmul.f32 0.03125, %v249_v63 }
 0x21b   :  { %v262_v2 = vadd.f32 1e-05, %v258_v0  ;;  %v261_v3 = vadd.f32 1e-05, %v257_v1 }
 0x21c   :  { %v255_v4 = vpop.xlane.xlu1 %254 }
 0x21d   :  { %6175 = vrsqrt.f32 %v262_v2  ;;  %v259_v5 = vmul.f32 0.03125, %v255_v4 }
 0x21e   :  { %6177 = vrsqrt.f32 %v261_v3 }
 0x21f   :  { %v263_v6 = vadd.f32 1e-05, %v259_v5 }
 0x221   :  { %6179 = vrsqrt.f32 %v263_v6 }
 0x226   :  { %v6174_v7 = vpop.eup %6173 }
 0x227   :  { %v268_v9 = vmul.f32 %v6174_v7, %v236_v38 }
 0x229   :  { %v276_v11 = vmul.f32 %v5367_v8, %v268_v9 }
 0x22a   :  { %v6176_v12 = vpop.eup %6175 }
 0x22b   :  { %v6178_v13 = vpop.eup %6177  ;;  %v284_v14 = vadd.f32 %v5368_v10, %v276_v11  ;;  %v270_v15 = vmul.f32 %v6176_v12, %v238_v41 }
 0x22c   :  { %v269_v16 = vmul.f32 %v6178_v13, %v237_v45 }
 0x22d   :  { %5778 = vmatprep.mubr.msk.f32.mxu1 %vm88_vm1, %v284_v14  ;;  %v278_v17 = vmul.f32 %v5367_v8, %v270_v15 }
 0x22e   :  { %v6180_v18 = vpop.eup %6179  ;;  %v277_v19 = vmul.f32 %v5367_v8, %v269_v16 }
 0x22f   :  { %v286_v20 = vadd.f32 %v5368_v10, %v278_v17  ;;  %v271_v21 = vmul.f32 %v6180_v18, %v239_v49 }
 0x230   :  { %v285_v22 = vadd.f32 %v5368_v10, %v277_v19 }
 0x231   :  { %v279_v23 = vmul.f32 %v5367_v8, %v271_v21 }
 0x232   :  { %5779 = vmatmul.mubr.msk.f32.vlgmr.msra.gmra.mxu1 %vm88_vm1, %v285_v22 }
 0x233   :  { %5781 = vmatprep.mubr.msk.f32.mxu1 %vm88_vm1, %v286_v20  ;;  %v287_v24 = vadd.f32 %v5368_v10, %v279_v23 }
 0x236   :  { %5782 = vmatmul.mubr.msk.f32.gmra.mxu1 %vm88_vm1, %v287_v24 }
 0x2f2   :  { %v5780_v27 = vpop.f32.mrf.mxu1 }
 0x2f3   :  { %v6640_v28 = vadd.f32 %v5780_v27, %v5369_v26 }
 0x2f4   :  { %v370_v31 = vpop.f32.mrf.mxu1 }
 0x2f5   :  { %v6642_v33 = vadd.f32 %v5369_v26, %v370_v31  ;;  %756 = vrot.lane.b32.xlu1 %v6640_v28, %s6487_s18  ;;  %393 = vrot.lane.b32.xlu0 %v6640_v28, %s6488_s19 }
 0x2f6   :  { %v5783_v34 = vpop.f32.mrf.mxu1 }
 0x2f7   :  { %5788 = vmatprep.mubr.msk.f32.mxu0 %vm395_vm2, %v6642_v33  ;;  %v6666_v37 = vadd.f32 %v5783_v34, %v5369_v26 }
 0x2f8   :  { %v380_v35 = vpop.f32.mrf.mxu1 }
 0x2f9   :  { %v6650_v36 = vadd.f32 %v5369_v26, %v380_v35  ;;  %574 = vrot.lane.b32.xlu0 %v6640_v28, %s6489_s4  ;;  %391 = vrot.lane.b32.xlu1 %v6642_v33, %s6488_s19 }
 0x2fb   :  { %5795 = vmatprep.mubr.msk.f32.mxu1 %vm395_vm2, %v6650_v36 }
 0x2fd   :  { %570 = vrot.lane.b32.xlu0 %v6640_v28, %s6490_s20  ;;  %572 = vrot.lane.b32.xlu1 %v6642_v33, %s6489_s4 }
 0x301   :  { %754 = vrot.lane.b32.xlu0 %v6642_v33, %s6487_s18  ;;  %568 = vrot.lane.b32.xlu1 %v6642_v33, %s6490_s20 }
 0x305   :  { %750 = vrot.lane.b32.xlu1 %v6642_v33, %s6491_s0  ;;  %665 = vrot.lane.b32.xlu0 %v6666_v37, %s6489_s4 }
 0x309   :  { %661 = vrot.lane.b32.xlu0 %v6666_v37, %s6490_s20  ;;  %483 = vrot.lane.b32.xlu1 %v6666_v37, %s6488_s19 }
 0x30d   :  { %752 = vrot.lane.b32.xlu0 %v6640_v28, %s6491_s0  ;;  %847 = vrot.lane.b32.xlu1 %v6666_v37, %s6487_s18 }
 0x311   :  { %663 = vrot.lane.b32.xlu0 %v6650_v36, %s6489_s4  ;;  %481 = vrot.lane.b32.xlu1 %v6650_v36, %s6488_s19 }
 0x315   :  { %936 = vrot.lane.b32.xlu0 %v6642_v33, %s6492_s21  ;;  %938 = vrot.lane.b32.xlu1 %v6640_v28, %s6492_s21 }
 0x319   :  { %845 = vrot.lane.b32.xlu0 %v6650_v36, %s6487_s18  ;;  %1029 = vrot.lane.b32.xlu1 %v6666_v37, %s6492_s21 }
 0x31d   :  { %843 = vrot.lane.b32.xlu0 %v6666_v37, %s6491_s0  ;;  %659 = vrot.lane.b32.xlu1 %v6650_v36, %s6490_s20 }
 0x321   :  { %934 = vrot.lane.b32.xlu0 %v6640_v28, %s6493_s22  ;;  %932 = vrot.lane.b32.xlu1 %v6642_v33, %s6493_s22 }
 0x325   :  { %1023 = vrot.lane.b32.xlu0 %v6650_v36, %s6493_s22  ;;  %841 = vrot.lane.b32.xlu1 %v6650_v36, %s6491_s0 }
 0x329   :  { %1309 = vrot.lane.b32.xlu0 %v6640_v28, %s6494_s23  ;;  %1027 = vrot.lane.b32.xlu1 %v6650_v36, %s6492_s21 }
 0x32d   :  { %1570 = vrot.lane.b32.xlu0 %v6666_v37, %s6495_s24  ;;  %1025 = vrot.lane.b32.xlu1 %v6666_v37, %s6493_s22 }
 0x331   :  { %1394 = vrot.lane.b32.xlu0 %v6650_v36, %s6494_s23  ;;  %1307 = vrot.lane.b32.xlu1 %v6642_v33, %s6494_s23 }
 0x335   :  { %1568 = vrot.lane.b32.xlu0 %v6650_v36, %s6495_s24  ;;  %1396 = vrot.lane.b32.xlu1 %v6666_v37, %s6494_s23 }
 0x339   :  { %1483 = vrot.lane.b32.xlu1 %v6640_v28, %s6495_s24 }
 0x33d   :  { %1481 = vrot.lane.b32.xlu1 %v6642_v33, %s6495_s24 }
 0x341   :  { %1657 = vrot.lane.b32.xlu1 %v6640_v28, %s6496_s7 }
 0x345   :  { %1655 = vrot.lane.b32.xlu1 %v6642_v33, %s6496_s7 }
 0x367   :  { %v394_v38 = vpop.permute.xlu0 %393  ;;  %v757_v39 = vpop.permute.xlu1 %756 }
 0x368   :  { %5784 = vmatprep.subr.msk.mxu0 %vm395_vm2, %v394_v38 }
 0x369   :  { %5785 = vmatpush3.xpose.msk.msra.mxu0 %vm395_vm2, %v394_v38 }
 0x36b   :  { %v575_v40 = vpop.permute.xlu0 %574  ;;  %v392_v41 = vpop.permute.xlu1 %391 }
 0x36c   :  { %5786 = vmatprep.subr.msk.mxu0 %vm395_vm2, %v392_v41 }
 0x36d   :  { %5787 = vmatpush3.xpose.msk.msra.mxu0 %vm395_vm2, %v392_v41 }
 0x36e   :  { %5798 = vmatprep.subr.msk.mxu0 %vm395_vm2, %v575_v40 }
 0x36f   :  { %v571_v42 = vpop.permute.xlu0 %570  ;;  %v573_v43 = vpop.permute.xlu1 %572 }
 0x370   :  { %5789 = vmatmul.mubr.msk.f32.vlgmr.msra.gmra.mxu0 %vm395_vm2, %v6640_v28 }
 0x371   :  { %5799 = vmatpush3.xpose.msk.msra.mxu0 %vm395_vm2, %v575_v40 }
 0x372   :  { %5800 = vmatprep.subr.msk.mxu0 %vm395_vm2, %v573_v43 }
 0x373   :  { %v755_v44 = vpop.permute.xlu0 %754  ;;  %v569_v45 = vpop.permute.xlu1 %568 }
 0x374   :  { %5802 = vmatprep.mubr.msk.f32.mxu0 %vm395_vm2, %v569_v45 }
 0x375   :  { %5801 = vmatpush3.xpose.msk.msra.mxu0 %vm395_vm2, %v573_v43 }
 0x376   :  { %5812 = vmatprep.subr.msk.mxu0 %vm395_vm2, %v757_v39 }
 0x377   :  { %v666_v46 = vpop.permute.xlu0 %665  ;;  %v751_v47 = vpop.permute.xlu1 %750 }
 0x378   :  { %5803 = vmatmul.mubr.msk.f32.vlgmr.msra.gmra.mxu0 %vm395_vm2, %v571_v42 }
 0x379   :  { %5813 = vmatpush3.xpose.msk.msra.mxu0 %vm395_vm2, %v757_v39  ;;  %5816 = vmatprep.mubr.msk.f32.mxu0 %vm395_vm2, %v751_v47 }
 0x37a   :  { %5814 = vmatprep.subr.msk.mxu0 %vm395_vm2, %v755_v44 }
 0x37b   :  { %v662_v48 = vpop.permute.xlu0 %661  ;;  %v484_v49 = vpop.permute.xlu1 %483 }
 0x37c   :  { %5791 = vmatprep.subr.msk.mxu1 %vm395_vm2, %v484_v49 }
 0x37d   :  { %5792 = vmatpush3.xpose.msk.msra.mxu1 %vm395_vm2, %v484_v49  ;;  %5815 = vmatpush3.xpose.msk.msra.mxu0 %vm395_vm2, %v755_v44 }
 0x37f   :  { %v753_v50 = vpop.permute.xlu0 %752  ;;  %v848_v51 = vpop.permute.xlu1 %847 }
 0x380   :  { %5817 = vmatmul.mubr.msk.f32.vlgmr.msra.gmra.mxu0 %vm395_vm2, %v753_v50 }
 0x383   :  { %v664_v52 = vpop.permute.xlu0 %663  ;;  %v482_v53 = vpop.permute.xlu1 %481 }
 0x384   :  { %5793 = vmatprep.subr.msk.mxu1 %vm395_vm2, %v482_v53 }
 0x385   :  { %5794 = vmatpush3.xpose.msk.msra.mxu1 %vm395_vm2, %v482_v53 }
 0x386   :  { %5805 = vmatprep.subr.msk.mxu1 %vm395_vm2, %v666_v46 }
 0x387   :  { %v937_v54 = vpop.permute.xlu0 %936  ;;  %v939_v59 = vpop.permute.xlu1 %938 }
 0x388   :  { %5796 = vmatmul.mubr.msk.f32.vlgmr.msra.gmra.mxu1 %vm395_vm2, %v6666_v37  ;;  %5826 = vmatprep.subr.msk.mxu0 %vm395_vm2, %v939_v59 }
 0x389   :  { %5806 = vmatpush3.xpose.msk.msra.mxu1 %vm395_vm2, %v666_v46  ;;  %5827 = vmatpush3.xpose.msk.msra.mxu0 %vm395_vm2, %v939_v59 }
 0x38a   :  { %5807 = vmatprep.subr.msk.mxu1 %vm395_vm2, %v664_v52  ;;  %5828 = vmatprep.subr.msk.mxu0 %vm395_vm2, %v937_v54 }
 0x38b   :  { %v846_v60 = vpop.permute.xlu0 %845  ;;  %v1030_v61 = vpop.permute.xlu1 %1029 }
 0x38d   :  { %5808 = vmatpush3.xpose.msk.msra.mxu1 %vm395_vm2, %v664_v52  ;;  %5829 = vmatpush3.xpose.msk.msra.mxu0 %vm395_vm2, %v937_v54 }
 0x38e   :  { %5819 = vmatprep.subr.msk.mxu1 %vm395_vm2, %v848_v51 }
 0x38f   :  { %v844_v62 = vpop.permute.xlu0 %843  ;;  %v660_v63 = vpop.permute.xlu1 %659 }
 0x390   :  { %5809 = vmatprep.mubr.msk.f32.mxu1 %vm395_vm2, %v660_v63 }
 0x391   :  { %5810 = vmatmul.mubr.msk.f32.vlgmr.msra.gmra.mxu1 %vm395_vm2, %v662_v48 }
 0x392   :  { %5820 = vmatpush3.xpose.msk.msra.mxu1 %vm395_vm2, %v848_v51 }
 0x393   :  { %5821 = vmatprep.subr.msk.mxu1 %vm395_vm2, %v846_v60  ;;  %v935_v0 = vpop.permute.xlu0 %934  ;;  %v933_v1 = vpop.permute.xlu1 %932 }
 0x394   :  { %5830 = vmatprep.mubr.msk.f32.mxu0 %vm395_vm2, %v933_v1 }
 0x395   :  { %5831 = vmatmul.mubr.msk.f32.vlgmr.msra.gmra.mxu0 %vm395_vm2, %v935_v0 }
 0x396   :  { %5822 = vmatpush3.xpose.msk.msra.mxu1 %vm395_vm2, %v846_v60 }
 0x397   :  { %5833 = vmatprep.subr.msk.mxu1 %vm395_vm2, %v1030_v61  ;;  %v1024_v2 = vpop.permute.xlu0 %1023  ;;  %v842_v3 = vpop.permute.xlu1 %841 }
 0x398   :  { %5823 = vmatprep.mubr.msk.f32.mxu1 %vm395_vm2, %v842_v3 }
 0x399   :  { %5824 = vmatmul.mubr.msk.f32.vlgmr.msra.gmra.mxu1 %vm395_vm2, %v844_v62 }
 0x39a   :  { %5834 = vmatpush3.xpose.msk.msra.mxu1 %vm395_vm2, %v1030_v61  ;;  %5837 = vmatprep.mubr.msk.f32.mxu1 %vm395_vm2, %v1024_v2 }
 0x39b   :  { %v1310_v4 = vpop.permute.xlu0 %1309  ;;  %v1028_v5 = vpop.permute.xlu1 %1027 }
 0x39c   :  { %5835 = vmatprep.subr.msk.mxu1 %vm395_vm2, %v1028_v5  ;;  %5840 = vmatprep.subr.mxu0 %v1310_v4 }
 0x39d   :  { %5841 = vmatpush3.msra.mxu0 %v1310_v4 }
 0x39e   :  { %5836 = vmatpush3.xpose.msk.msra.mxu1 %vm395_vm2, %v1028_v5 }
 0x39f   :  { %v1026_v6 = vpop.permute.xlu1 %1025  ;;  %v6776_v7 = vpop.permute.xlu0 %1570 }
 0x3a1   :  { %5838 = vmatmul.mubr.msk.f32.vlgmr.msra.gmra.mxu1 %vm395_vm2, %v1026_v6 }
 0x3a3   :  { %v1308_v8 = vpop.permute.xlu1 %1307  ;;  %v1395_v10 = vpop.permute.xlu0 %1394 }
 0x3a4   :  { %5842 = vmatprep.subr.mxu0 %v1308_v8 }
 0x3a5   :  { %5843 = vmatpush3.msra.mxu0 %v1308_v8 }
 0x3a7   :  { %v1397_v9 = vpop.permute.xlu1 %1396 }
 0x3a8   :  { %5847 = vmatprep.subr.mxu1 %v1397_v9 }
 0x3a9   :  { %5848 = vmatpush3.msra.mxu1 %v1397_v9 }
 0x3aa   :  { %5849 = vmatprep.subr.mxu1 %v1395_v10 }
 0x3ab   :  { %5850 = vmatpush3.msra.mxu1 %v1395_v10  ;;  %v6778_v11 = vpop.permute.xlu1 %1483 }
 0x3ac   :  { %5854 = vmatprep.subr.mxu0 %v6778_v11  ;;  %5861 = vmatprep.subr.mxu1 %v6776_v7 }
 0x3af   :  { %v6854_v9 = vpop.permute.xlu1 %1481 }
 0x3b3   :  { %v6856_v10 = vpop.permute.xlu1 %1657 }
 0x430   :  { %v5790_v12 = vpop.f32.mrf.mxu0 }
 0x431   :  { %v6782_v13 = vmul.f32 0.35355338, %v5790_v12  ;;  %v6858_v12 = vpop.permute.xlu1 %1655 }
 0x432   :  { %v470_v14 = vpop.f32.mrf.mxu0 }
 0x433   :  { %v6784_v15 = vmul.f32 0.35355338, %v470_v14  ;;  %v1134_v16 = vsel %vm1130_vm3, %v6782_v13, -inf  ;;  %v6860_v14 = vpop.permute.xlu0 %1568 }
 0x434   :  { %1135 = vmax.xlane.f32.xlu1 %v1134_v16 }
 0x435   :  { %v1131_v17 = vsel %vm1130_vm3, %v6784_v15, -inf }
 0x436   :  { %1132 = vmax.xlane.f32.xlu0 %v1131_v17 }
 0x438   :  { %v5804_v18 = vpop.f32.mrf.mxu0 }
 0x439   :  { %v6790_v19 = vmul.f32 0.35355338, %v5804_v18 }
 0x43a   :  { %v650_v21 = vpop.f32.mrf.mxu0 }
 0x43b   :  { %v1146_v20 = vsel %vm1130_vm3, %v6790_v19, -inf  ;;  %v6808_v41 = vmul.f32 0.35355338, %v650_v21 }
 0x43c   :  { %1147 = vmax.xlane.f32.xlu1 %v1146_v20 }
 0x43d   :  { %v1143_v45 = vsel %vm1130_vm3, %v6808_v41, -inf }
 0x440   :  { %v5818_v22 = vpop.f32.mrf.mxu0 }
 0x441   :  { %v6794_v23 = vmul.f32 0.35355338, %v5818_v22 }
 0x442   :  { %v832_v24 = vpop.f32.mrf.mxu0 }
 0x443   :  { %v6796_v26 = vmul.f32 0.35355338, %v832_v24  ;;  %v1158_v27 = vsel %vm1130_vm3, %v6794_v23, -inf }
 0x444   :  { %1159 = vmax.xlane.f32.xlu1 %v1158_v27 }
 0x445   :  { %v1155_v31 = vsel %vm1130_vm3, %v6796_v26, -inf }
 0x448   :  { %v5797_v34 = vpop.f32.mrf.mxu1  ;;  %1156 = vmax.xlane.f32.xlu1 %v1155_v31 }
 0x449   :  { %v6802_v35 = vmul.f32 0.35355338, %v5797_v34 }
 0x44a   :  { %v559_v38 = vpop.f32.mrf.mxu1 }
 0x44b   :  { %v6804_v39 = vmul.f32 0.35355338, %v559_v38  ;;  %v1140_v40 = vsel %vm1130_vm3, %v6802_v35, -inf }
 0x44c   :  { %1141 = vmax.xlane.f32.xlu0 %v1140_v40 }
 0x44d   :  { %v1137_v42 = vsel %vm1130_vm3, %v6804_v39, -inf }
 0x450   :  { %1138 = vmax.xlane.f32.xlu0 %v1137_v42 }
 0x451   :  { %v5811_v43 = vpop.f32.mrf.mxu1 }
 0x452   :  { %v6812_v44 = vmul.f32 0.35355338, %v5811_v43 }
 0x453   :  { %v741_v46 = vpop.f32.mrf.mxu1 }
 0x454   :  { %1144 = vmax.xlane.f32.xlu0 %v1143_v45  ;;  %v6818_v49 = vmul.f32 0.35355338, %v741_v46  ;;  %v1152_v51 = vsel %vm1130_vm3, %v6812_v44, -inf }
 0x455   :  { %v5832_v47 = vpop.f32.mrf.mxu0 }
 0x456   :  { %v6816_v48 = vmul.f32 0.35355338, %v5832_v47  ;;  %v1149_v60 = vsel %vm1130_vm3, %v6818_v49, -inf }
 0x457   :  { %v1014_v50 = vpop.f32.mrf.mxu0 }
 0x458   :  { %v6822_v52 = vmul.f32 0.35355338, %v1014_v50  ;;  %1153 = vmax.xlane.f32.xlu0 %v1152_v51  ;;  %v1170_v53 = vsel %vm1130_vm3, %v6816_v48, -inf }
 0x459   :  { %v5825_v54 = vpop.f32.mrf.mxu1  ;;  %1171 = vmax.xlane.f32.xlu1 %v1170_v53 }
 0x45a   :  { %v6826_v59 = vmul.f32 0.35355338, %v5825_v54  ;;  %v1167_v62 = vsel %vm1130_vm3, %v6822_v52, -inf }
 0x45b   :  { %v923_v61 = vpop.f32.mrf.mxu1 }
 0x45c   :  { %1150 = vmax.xlane.f32.xlu0 %v1149_v60  ;;  %v6832_v63 = vmul.f32 0.35355338, %v923_v61  ;;  %v1164_v0 = vsel %vm1130_vm3, %v6826_v59, -inf }
 0x45d   :  { %1168 = vmax.xlane.f32.xlu1 %v1167_v62 }
 0x45e   :  { %v1161_v4 = vsel %vm1130_vm3, %v6832_v63, -inf }
 0x460   :  { %1165 = vmax.xlane.f32.xlu0 %v1164_v0 }
 0x461   :  { %v5839_v1 = vpop.f32.mrf.mxu1 }
 0x462   :  { %v6836_v2 = vmul.f32 0.35355338, %v5839_v1 }
 0x463   :  { %v1105_v3 = vpop.f32.mrf.mxu1 }
 0x464   :  { %v6840_v5 = vmul.f32 0.35355338, %v1105_v3  ;;  %1162 = vmax.xlane.f32.xlu0 %v1161_v4  ;;  %v1176_v6 = vsel %vm1130_vm3, %v6836_v2, -inf }
 0x465   :  { %1177 = vmax.xlane.f32.xlu1 %v1176_v6 }
 0x466   :  { %v1173_v8 = vsel %vm1130_vm3, %v6840_v5, -inf }
 0x468   :  { %1174 = vmax.xlane.f32.xlu0 %v1173_v8 }
 0x476   :  { %1831 = vrot.lane.b32.xlu1 %v6640_v28, %s6497_s25 }
 0x47a   :  { %1829 = vrot.lane.b32.xlu1 %v6642_v33, %s6497_s25 }
 0x47e   :  { %1744 = vrot.lane.b32.xlu0 %v6666_v37, %s6496_s7 }
 0x482   :  { %1742 = vrot.lane.b32.xlu0 %v6650_v36, %s6496_s7 }
 0x4bd   :  { %v1136_v16 = vpop.xlane.xlu1 %1135 }
 0x4be   :  { %v1180_v28 = vsub.f32 %v6782_v13, %v1136_v16 }
 0x4bf   :  { %v1133_v17 = vpop.xlane.xlu0 %1132 }
 0x4c0   :  { %v1197_v18 = vmul.f32 1.442695, %v1180_v28  ;;  %v1179_v33 = vsub.f32 %v6784_v15, %v1133_v17 }
 0x4c2   :  { %6181 = vpow2.f32 %v1197_v18  ;;  %v1195_v20 = vmul.f32 1.442695, %v1179_v33 }
 0x4c4   :  { %6183 = vpow2.f32 %v1195_v20 }
 0x4c5   :  { %v1148_v21 = vpop.xlane.xlu1 %1147 }
 0x4c6   :  { %v1184_v22 = vsub.f32 %v6790_v19, %v1148_v21 }
 0x4c8   :  { %v1205_v24 = vmul.f32 1.442695, %v1184_v22 }
 0x4ca   :  { %6185 = vpow2.f32 %v1205_v24 }
 0x4cd   :  { %v1160_v38 = vpop.xlane.xlu1 %1159 }
 0x4ce   :  { %v1188_v47 = vsub.f32 %v6794_v23, %v1160_v38 }
 0x4cf   :  { %v6865_v27 = vpop.eup %6181 }
 0x4d0   :  { %v1230_v31 = vsel %vm1130_vm3, %v6865_v27, 0.0  ;;  %v1213_v60 = vmul.f32 1.442695, %v1188_v47 }
 0x4d1   :  { %v6869_v34 = vpop.eup %6183  ;;  %1231 = vadd.xlane.f32.xlu1 %v1230_v31  ;;  %v1157_v50 = vpop.xlane.xlu1 %1156 }
 0x4d2   :  { %v1227_v13 = vsel %vm1130_vm3, %v6869_v34, 0.0 }
 0x4d3   :  { %1228 = vadd.xlane.f32.xlu0 %v1227_v13 }
 0x4d5   :  { %v1142_v15 = vpop.xlane.xlu0 %1141 }
 0x4d6   :  { %v1182_v40 = vsub.f32 %v6802_v35, %v1142_v15  ;;  %v1187_v35 = vsub.f32 %v6796_v26, %v1157_v50 }
 0x4d7   :  { %v6874_v42 = vpop.eup %6185 }
 0x4d8   :  { %v1201_v19 = vmul.f32 1.442695, %v1182_v40  ;;  %v1242_v43 = vsel %vm1130_vm3, %v6874_v42, 0.0  ;;  %v1211_v3 = vmul.f32 1.442695, %v1187_v35 }
 0x4d9   :  { %v1139_v45 = vpop.xlane.xlu0 %1138  ;;  %1243 = vadd.xlane.f32.xlu1 %v1242_v43 }
 0x4da   :  { %6187 = vpow2.f32 %v1201_v19  ;;  %v1181_v46 = vsub.f32 %v6804_v39, %v1139_v45 }
 0x4dc   :  { %v1199_v51 = vmul.f32 1.442695, %v1181_v46 }
 0x4dd   :  { %v1145_v53 = vpop.xlane.xlu0 %1144 }
 0x4de   :  { %6189 = vpow2.f32 %v1199_v51  ;;  %v1183_v54 = vsub.f32 %v6808_v41, %v1145_v53 }
 0x4e0   :  { %v1203_v61 = vmul.f32 1.442695, %v1183_v54 }
 0x4e1   :  { %v1154_v62 = vpop.xlane.xlu0 %1153 }
 0x4e2   :  { %6191 = vpow2.f32 %v1203_v61  ;;  %v1186_v0 = vsub.f32 %v6812_v44, %v1154_v62  ;;  %v1172_v1 = vpop.xlane.xlu1 %1171 }
 0x4e3   :  { %6193 = vpow2.f32 %v1213_v60  ;;  %v1192_v23 = vsub.f32 %v6816_v48, %v1172_v1 }
 0x4e4   :  { %v1209_v39 = vmul.f32 1.442695, %v1186_v0 }
 0x4e5   :  { %v1151_v4 = vpop.xlane.xlu0 %1150  ;;  %v1221_v26 = vmul.f32 1.442695, %v1192_v23 }
 0x4e6   :  { %6195 = vpow2.f32 %v1209_v39  ;;  %v1185_v6 = vsub.f32 %v6818_v49, %v1151_v4  ;;  %v1169_v8 = vpop.xlane.xlu1 %1168 }
 0x4e7   :  { %v6885_v41 = vpop.eup %6187  ;;  %6197 = vpow2.f32 %v1211_v3  ;;  %v1191_v28 = vsub.f32 %v6822_v52, %v1169_v8 }
 0x4e8   :  { %v1207_v16 = vmul.f32 1.442695, %v1185_v6  ;;  %v1236_v44 = vsel %vm1130_vm3, %v6885_v41, 0.0 }
 0x4e9   :  { %1237 = vadd.xlane.f32.xlu0 %v1236_v44  ;;  %v1166_v17 = vpop.xlane.xlu0 %1165  ;;  %v1219_v49 = vmul.f32 1.442695, %v1191_v28 }
 0x4ea   :  { %6199 = vpow2.f32 %v1207_v16  ;;  %v1190_v48 = vsub.f32 %v6826_v59, %v1166_v17 }
 0x4eb   :  { %v6891_v18 = vpop.eup %6189  ;;  %6201 = vpow2.f32 %v1221_v26 }
 0x4ec   :  { %v1217_v33 = vmul.f32 1.442695, %v1190_v48  ;;  %v1233_v20 = vsel %vm1130_vm3, %v6891_v18, 0.0 }
 0x4ed   :  { %1234 = vadd.xlane.f32.xlu0 %v1233_v20  ;;  %v1163_v21 = vpop.xlane.xlu0 %1162 }
 0x4ee   :  { %6203 = vpow2.f32 %v1217_v33  ;;  %v1189_v52 = vsub.f32 %v6832_v63, %v1163_v21  ;;  %v1178_v22 = vpop.xlane.xlu1 %1177 }
 0x4ef   :  { %v6896_v24 = vpop.eup %6191  ;;  %v1194_v31 = vsub.f32 %v6836_v2, %v1178_v22  ;;  %6205 = vpow2.f32 %v1219_v49 }
 0x4f0   :  { %v1215_v59 = vmul.f32 1.442695, %v1189_v52  ;;  %v1239_v13 = vsel %vm1130_vm3, %v6896_v24, 0.0  ;;  %v6901_v15 = vpop.eup %6193 }
 0x4f1   :  { %v1225_v38 = vmul.f32 1.442695, %v1194_v31  ;;  %v1175_v40 = vpop.xlane.xlu0 %1174  ;;  %1240 = vadd.xlane.f32.xlu1 %v1239_v13  ;;  %v1254_v46 = vsel %vm1130_vm3, %v6901_v15, 0.0 }
 0x4f2   :  { %6207 = vpow2.f32 %v1215_v59  ;;  %v1193_v19 = vsub.f32 %v6840_v5, %v1175_v40  ;;  %v6946_v4 = vpop.permute.xlu1 %1831 }
 0x4f3   :  { %v6904_v43 = vpop.eup %6195  ;;  %6209 = vpow2.f32 %v1225_v38 }
 0x4f4   :  { %v6906_v63 = vpop.eup %6197  ;;  %v1223_v45 = vmul.f32 1.442695, %v1193_v19  ;;  %v1248_v2 = vsel %vm1130_vm3, %v6904_v43, 0.0 }
 0x4f5   :  { %1249 = vadd.xlane.f32.xlu0 %v1248_v2  ;;  %1255 = vadd.xlane.f32.xlu1 %v1254_v46  ;;  %v1251_v50 = vsel %vm1130_vm3, %v6906_v63, 0.0  ;;  %v6948_v6 = vpop.permute.xlu0 %1744 }
 0x4f6   :  { %6211 = vpow2.f32 %v1223_v45  ;;  %v6950_v8 = vpop.permute.xlu1 %1829 }
 0x4f7   :  { %v6912_v47 = vpop.eup %6199 }
 0x4f8   :  { %v1245_v5 = vsel %vm1130_vm3, %v6912_v47, 0.0  ;;  %v6918_v51 = vpop.eup %6201 }
 0x4f9   :  { %1246 = vadd.xlane.f32.xlu0 %v1245_v5  ;;  %1252 = vadd.xlane.f32.xlu1 %v1251_v50  ;;  %v1266_v35 = vsel %vm1130_vm3, %v6918_v51, 0.0  ;;  %v6952_v26 = vpop.permute.xlu0 %1742 }
 0x4fb   :  { %v6920_v53 = vpop.eup %6203 }
 0x4fc   :  { %v1260_v54 = vsel %vm1130_vm3, %v6920_v53, 0.0  ;;  %v6926_v60 = vpop.eup %6205 }
 0x4fd   :  { %1261 = vadd.xlane.f32.xlu0 %v1260_v54  ;;  %1267 = vadd.xlane.f32.xlu1 %v1266_v35  ;;  %v1263_v0 = vsel %vm1130_vm3, %v6926_v60, 0.0 }
 0x4ff   :  { %v6928_v61 = vpop.eup %6207 }
 0x500   :  { %v1257_v62 = vsel %vm1130_vm3, %v6928_v61, 0.0  ;;  %v6934_v1 = vpop.eup %6209 }
 0x501   :  { %1258 = vadd.xlane.f32.xlu0 %v1257_v62  ;;  %1264 = vadd.xlane.f32.xlu1 %v1263_v0  ;;  %v1272_v23 = vsel %vm1130_vm3, %v6934_v1, 0.0 }
 0x503   :  { %v6936_v3 = vpop.eup %6211 }
 0x504   :  { %v1269_v39 = vsel %vm1130_vm3, %v6936_v3, 0.0 }
 0x505   :  { %1270 = vadd.xlane.f32.xlu0 %v1269_v39  ;;  %1273 = vadd.xlane.f32.xlu1 %v1272_v23 }
 0x516   :  { %1916 = vrot.lane.b32.xlu1 %v6650_v36, %s6497_s25 }
 0x51a   :  { %2076 = vrot.lane.b32.xlu1 %v6616_v56, %s6498_s26 }
 0x51b   :  { %1918 = vrot.lane.b32.xlu0 %v6666_v37, %s6497_s25 }
 0x51e   :  { %2074 = vrot.lane.b32.xlu1 %v6623_v57, %s6498_s26 }
 0x51f   :  { %2078 = vrot.lane.b32.xlu0 %v6611_v55, %s6498_s26 }
 0x523   :  { %2072 = vrot.lane.b32.xlu0 %v6632_v58, %s6498_s26 }
 0x55a   :  { %v1232_v16 = vpop.xlane.xlu1 %1231 }
 0x55b   :  { %6213 = vrcp.f32 %v1232_v16 }
 0x55c   :  { %v1229_v28 = vpop.xlane.xlu0 %1228 }
 0x55d   :  { %6215 = vrcp.f32 %v1229_v28 }
 0x562   :  { %v1244_v49 = vpop.xlane.xlu1 %1243 }
 0x568   :  { %v6214_v44 = vpop.eup %6213 }
 0x569   :  { %v1278_v36 = vmul.f32 %v6214_v44, %v6865_v27 }
 0x56a   :  { %v6216_v17 = vpop.eup %6215 }
 0x56b   :  { %v1276_v48 = vmul.f32 %v6216_v17, %v6869_v34 }
 0x56d   :  { %5844 = vmatprep.mubr.msk.f32.mxu0 %vm1130_vm3, %v1276_v48 }
 0x56e   :  { %5845 = vmatmul.mubr.msk.f32.vlgmr.msra.gmra.mxu0 %vm1130_vm3, %v1278_v36 }
 0x56f   :  { %5855 = vmatpush3.msra.mxu0 %v6778_v11 }
 0x570   :  { %5856 = vmatprep.subr.mxu0 %v6854_v9 }
 0x571   :  { %5857 = vmatpush3.msra.mxu0 %v6854_v9 }
 0x572   :  { %5868 = vmatprep.subr.mxu0 %v6856_v10  ;;  %v1238_v37 = vpop.xlane.xlu0 %1237 }
 0x573   :  { %6217 = vrcp.f32 %v1238_v37 }
 0x576   :  { %v1235_v33 = vpop.xlane.xlu0 %1234 }
 0x577   :  { %6219 = vrcp.f32 %v1235_v33 }
 0x578   :  { %6221 = vrcp.f32 %v1244_v49 }
 0x57a   :  { %v1241_v34 = vpop.xlane.xlu1 %1240 }
 0x57b   :  { %6223 = vrcp.f32 %v1241_v34 }
 0x57e   :  { %v1250_v27 = vpop.xlane.xlu0 %1249  ;;  %v1256_v20 = vpop.xlane.xlu1 %1255 }
 0x57f   :  { %6225 = vrcp.f32 %v1250_v27 }
 0x580   :  { %6227 = vrcp.f32 %v1256_v20  ;;  %v6218_v52 = vpop.eup %6217 }
 0x581   :  { %v1282_v13 = vmul.f32 %v6218_v52, %v6885_v41 }
 0x582   :  { %v1247_v21 = vpop.xlane.xlu0 %1246  ;;  %v1253_v11 = vpop.xlane.xlu1 %1252 }
 0x583   :  { %6229 = vrcp.f32 %v1247_v21 }
 0x584   :  { %v6220_v22 = vpop.eup %6219  ;;  %6231 = vrcp.f32 %v1253_v11 }
 0x585   :  { %v1280_v9 = vmul.f32 %v6220_v22, %v6891_v18  ;;  %v6222_v38 = vpop.eup %6221 }
 0x586   :  { %v1262_v31 = vpop.xlane.xlu0 %1261  ;;  %v1268_v59 = vpop.xlane.xlu1 %1267  ;;  %v1286_v2 = vmul.f32 %v6222_v38, %v6874_v42 }
 0x587   :  { %5851 = vmatprep.mubr.msk.f32.mxu1 %vm1130_vm3, %v1280_v9  ;;  %6233 = vrcp.f32 %v1262_v31 }
 0x588   :  { %v6224_v40 = vpop.eup %6223  ;;  %5852 = vmatmul.mubr.msk.f32.vlgmr.msra.gmra.mxu1 %vm1130_vm3, %v1282_v13  ;;  %6235 = vrcp.f32 %v1268_v59 }
 0x589   :  { %5862 = vmatpush3.msra.mxu1 %v6776_v7  ;;  %v1284_v19 = vmul.f32 %v6224_v40, %v6896_v24 }
 0x58a   :  { %5863 = vmatprep.subr.mxu1 %v6860_v14  ;;  %v1259_v45 = vpop.xlane.xlu0 %1258  ;;  %v1265_v18 = vpop.xlane.xlu1 %1264 }
 0x58b   :  { %5864 = vmatpush3.msra.mxu1 %v6860_v14  ;;  %6237 = vrcp.f32 %v1259_v45  ;;  %5858 = vmatprep.mubr.msk.f32.mxu0 %vm1130_vm3, %v1284_v19 }
 0x58c   :  { %6239 = vrcp.f32 %v1265_v18  ;;  %5875 = vmatprep.subr.mxu1 %v6948_v6  ;;  %5859 = vmatmul.mubr.msk.f32.vlgmr.msra.gmra.mxu0 %vm1130_vm3, %v1286_v2  ;;  %v6226_v7 = vpop.eup %6225 }
 0x58d   :  { %5869 = vmatpush3.msra.mxu0 %v6856_v10  ;;  %v6228_v46 = vpop.eup %6227  ;;  %v1290_v10 = vmul.f32 %v6226_v7, %v6904_v43 }
 0x58e   :  { %5870 = vmatprep.subr.mxu0 %v6858_v12  ;;  %v1271_v41 = vpop.xlane.xlu0 %1270  ;;  %v1274_v24 = vpop.xlane.xlu1 %1273  ;;  %v1294_v54 = vmul.f32 %v6228_v46, %v6901_v15 }
 0x58f   :  { %6241 = vrcp.f32 %v1271_v41  ;;  %5871 = vmatpush3.msra.mxu0 %v6858_v12 }
 0x590   :  { %v6230_v14 = vpop.eup %6229  ;;  %6243 = vrcp.f32 %v1274_v24  ;;  %5882 = vmatprep.subr.mxu0 %v6946_v4 }
 0x591   :  { %v6232_v42 = vpop.eup %6231  ;;  %v1288_v5 = vmul.f32 %v6230_v14, %v6912_v47 }
 0x592   :  { %v1292_v50 = vmul.f32 %v6232_v42, %v6906_v63  ;;  %v1919_v47 = vpop.permute.xlu0 %1918 }
 0x593   :  { %5865 = vmatprep.mubr.msk.f32.mxu1 %vm1130_vm3, %v1288_v5 }
 0x594   :  { %5872 = vmatprep.mubr.msk.f32.mxu0 %vm1130_vm3, %v1292_v50  ;;  %5866 = vmatmul.mubr.msk.f32.vlgmr.msra.gmra.mxu1 %vm1130_vm3, %v1290_v10  ;;  %v6234_v12 = vpop.eup %6233  ;;  %v5422_v10 = vld [vmem:[#allocation5 + $0x3] ss:$0 sm:$0xff] }
 0x595   :  { %5873 = vmatmul.mubr.msk.f32.vlgmr.msra.gmra.mxu0 %vm1130_vm3, %v1294_v54  ;;  %5876 = vmatpush3.msra.mxu1 %v6948_v6  ;;  %v6236_v63 = vpop.eup %6235  ;;  %v1298_v0 = vmul.f32 %v6234_v12, %v6920_v53  ;;  %v1917_v6 = vpop.permute.xlu1 %1916 }
 0x596   :  { %5883 = vmatpush3.msra.mxu0 %v6946_v4  ;;  %5877 = vmatprep.subr.mxu1 %v6952_v26  ;;  %v1302_v39 = vmul.f32 %v6236_v63, %v6918_v51  ;;  %v2079_v51 = vpop.permute.xlu0 %2078 }
 0x597   :  { %5884 = vmatprep.subr.mxu0 %v6950_v8  ;;  %5878 = vmatpush3.msra.mxu1 %v6952_v26 }
 0x598   :  { %v6238_v15 = vpop.eup %6237  ;;  %5885 = vmatpush3.msra.mxu0 %v6950_v8  ;;  %5889 = vmatprep.subr.mxu1 %v1919_v47 }
 0x599   :  { %v6240_v43 = vpop.eup %6239  ;;  %v1296_v35 = vmul.f32 %v6238_v15, %v6928_v61  ;;  %5896 = vmatprep.subr.mxu0 %v2079_v51  ;;  %v2077_v53 = vpop.permute.xlu1 %2076 }
 0x59a   :  { %v1300_v62 = vmul.f32 %v6240_v43, %v6926_v60 }
 0x59b   :  { %5879 = vmatprep.mubr.msk.f32.mxu1 %vm1130_vm3, %v1296_v35 }
 0x59c   :  { %v6242_v23 = vpop.eup %6241  ;;  %5886 = vmatprep.mubr.msk.f32.mxu0 %vm1130_vm3, %v1300_v62  ;;  %5880 = vmatmul.mubr.msk.f32.vlgmr.msra.gmra.mxu1 %vm1130_vm3, %v1298_v0 }
 0x59d   :  { %v6244_v4 = vpop.eup %6243  ;;  %5887 = vmatmul.mubr.msk.f32.vlgmr.msra.gmra.mxu0 %vm1130_vm3, %v1302_v39  ;;  %5890 = vmatpush3.msra.mxu1 %v1919_v47  ;;  %v1304_v61 = vmul.f32 %v6242_v23, %v6936_v3  ;;  %v2073_v3 = vpop.permute.xlu0 %2072 }
 0x59e   :  { %5891 = vmatprep.subr.mxu1 %v1917_v6  ;;  %v1306_v60 = vmul.f32 %v6244_v4, %v6934_v1  ;;  %5897 = vmatpush3.msra.mxu0 %v2079_v51  ;;  %v2075_v1 = vpop.permute.xlu1 %2074 }
 0x59f   :  { %5892 = vmatpush3.msra.mxu1 %v1917_v6  ;;  %5893 = vmatprep.mubr.msk.f32.mxu1 %vm1130_vm3, %v1304_v61 }
 0x5a0   :  { %5894 = vmatmul.mubr.msk.f32.vlgmr.msra.gmra.mxu1 %vm1130_vm3, %v1306_v60  ;;  %5898 = vmatprep.subr.mxu0 %v2077_v53 }
 0x5a1   :  { %5899 = vmatpush3.msra.mxu0 %v2077_v53 }
 0x5a2   :  { %5900 = vmatprep.subr.mxu0 %v2075_v1 }
 0x5a3   :  { %5901 = vmatpush3.msra.mxu0 %v2075_v1 }
 0x5a4   :  { %5902 = vmatprep.subr.mxu0 %v2073_v3 }
 0x5a5   :  { %5903 = vmatpush3.msra.mxu0 %v2073_v3 }
 0x62e   :  { %v5846_v55 = vpop.f32.mrf.mxu0 }
 0x630   :  { %v1385_v56 = vpop.f32.mrf.mxu0 }
 0x648   :  { %v5853_v58 = vpop.f32.mrf.mxu1 }
 0x64a   :  { %v1472_v57 = vpop.f32.mrf.mxu1 }
 0x64c   :  { %v5860_v8 = vpop.f32.mrf.mxu0 }
 0x64d   :  { %2009 = vrot.lane.b32.xlu0 %v5860_v8, %s6482_s11 }
 0x64e   :  { %v1559_v26 = vpop.f32.mrf.mxu0 }
 0x651   :  { %2007 = vrot.lane.b32.xlu0 %v1559_v26, %s6482_s11 }
 0x654   :  { %v5867_v16 = vpop.f32.mrf.mxu1 }
 0x655   :  { %v5874_v28 = vpop.f32.mrf.mxu0  ;;  %2013 = vrot.lane.b32.xlu1 %v5867_v16, %s6482_s11 }
 0x656   :  { %v1646_v44 = vpop.f32.mrf.mxu1 }
 0x657   :  { %2011 = vrot.lane.b32.xlu0 %v1646_v44, %s6482_s11  ;;  %v1733_v17 = vpop.f32.mrf.mxu0 }
 0x659   :  { %2023 = vrot.lane.b32.xlu1 %v1733_v17, %s6499_s27 }
 0x65b   :  { %2025 = vrot.lane.b32.xlu0 %v5874_v28, %s6499_s27 }
 0x65c   :  { %v5881_v48 = vpop.f32.mrf.mxu1 }
 0x65d   :  { %v5888_v36 = vpop.f32.mrf.mxu0 }
 0x65e   :  { %2041 = vrot.lane.b32.xlu1 %v5888_v36, %s6500_s28  ;;  %v1820_v37 = vpop.f32.mrf.mxu1 }
 0x65f   :  { %2027 = vrot.lane.b32.xlu0 %v1820_v37, %s6499_s27  ;;  %v1907_v33 = vpop.f32.mrf.mxu0 }
 0x660   :  { %v5895_v49 = vpop.f32.mrf.mxu1 }
 0x662   :  { %2039 = vrot.lane.b32.xlu1 %v1907_v33, %s6500_s28  ;;  %v1994_v34 = vpop.f32.mrf.mxu1  ;;  %v217_v33 = vld [vmem:[%s7808_s5 + $0x28] sm:$0xff] }
 0x663   :  { %2043 = vrot.lane.b32.xlu0 %v1994_v34, %s6500_s28  ;;  %v216_v34 = vld [vmem:[%s7808_s5 + $0x18] sm:$0xff] }
 0x666   :  { %2029 = vrot.lane.b32.xlu1 %v5881_v48, %s6499_s27 }
 0x66a   :  { %2045 = vrot.lane.b32.xlu1 %v5895_v49, %s6500_s28  ;;  %v218_v49 = vld [vmem:[%s7808_s5 + $0x38] sm:$0xff] }
 0x66b   :  { %5910 = vmatprep.subr.mxu1 %v218_v49 }
 0x66c   :  { %5911 = vmatpush3.msra.mxu1 %v218_v49 }
 0x66d   :  { %5912 = vmatprep.subr.mxu1 %v217_v33 }
 0x66e   :  { %5913 = vmatpush3.msra.mxu1 %v217_v33 }
 0x66f   :  { %5914 = vmatprep.subr.mxu1 %v216_v34 }
 0x670   :  { %5915 = vmatpush3.msra.mxu1 %v216_v34 }
 0x6bf   :  { %v2010_v27 = vpop.permute.xlu0 %2009 }
 0x6c0   :  { %v2052_v59 = vsel %vm395_vm2, %v5846_v55, %v2010_v27  ;;  %v215_v27 = vld [vmem:[%s7808_s5 + $0x8] sm:$0xff] }
 0x6c1   :  { %5916 = vmatprep.subr.mxu1 %v215_v27 }
 0x6c2   :  { %5917 = vmatpush3.msra.mxu1 %v215_v27 }
 0x6c3   :  { %v2008_v20 = vpop.permute.xlu0 %2007 }
 0x6c4   :  { %v2051_v13 = vsel %vm395_vm2, %v1385_v56, %v2008_v20 }
 0x6c7   :  { %v2014_v21 = vpop.permute.xlu1 %2013 }
 0x6c8   :  { %v2054_v14 = vsel %vm395_vm2, %v5853_v58, %v2014_v21 }
 0x6c9   :  { %v2012_v11 = vpop.permute.xlu0 %2011 }
 0x6ca   :  { %v2053_v40 = vsel %vm395_vm2, %v1472_v57, %v2012_v11 }
 0x6cb   :  { %v2024_v52 = vpop.permute.xlu1 %2023 }
 0x6cc   :  { %v2055_v19 = vsel %vm1130_vm3, %v2051_v13, %v2024_v52 }
 0x6cd   :  { %v2026_v22 = vpop.permute.xlu0 %2025 }
 0x6ce   :  { %v2056_v38 = vsel %vm1130_vm3, %v2052_v59, %v2026_v22 }
 0x6d0   :  { %v2042_v9 = vpop.permute.xlu1 %2041 }
 0x6d1   :  { %v2028_v31 = vpop.permute.xlu0 %2027  ;;  %v2061_v41 = vsel %vm2059_vm4, %v2056_v38, %v2042_v9 }
 0x6d2   :  { %v2057_v18 = vsel %vm1130_vm3, %v2053_v40, %v2028_v31 }
 0x6d4   :  { %v2040_v45 = vpop.permute.xlu1 %2039 }
 0x6d5   :  { %v2060_v2 = vsel %vm2059_vm4, %v2055_v19, %v2040_v45  ;;  %v2044_v7 = vpop.permute.xlu0 %2043 }
 0x6d6   :  { %v2062_v24 = vsel %vm2059_vm4, %v2057_v18, %v2044_v7  ;;  %5904 = vmatprep.mubr.msk.f32.mxu0 %vm88_vm1, %v2060_v2  ;;  %v5427_v18 = vld [vmem:[#allocation5 + $0x4] ss:$0 sm:$0xff] }
 0x6d7   :  { %5905 = vmatmul.mubr.msk.f32.vlgmr.msra.gmra.mxu0 %vm88_vm1, %v2061_v41 }
 0x6d8   :  { %5907 = vmatprep.mubr.msk.f32.mxu0 %vm88_vm1, %v2062_v24  ;;  %v2030_v46 = vpop.permute.xlu1 %2029 }
 0x6d9   :  { %v2058_v42 = vsel %vm1130_vm3, %v2054_v14, %v2030_v46  ;;  %v5428_v46 = vld [vmem:[#allocation5 + $0x5] ss:$0 sm:$0xff] }
 0x6dc   :  { %v2046_v5 = vpop.permute.xlu1 %2045 }
 0x6dd   :  { %v2063_v50 = vsel %vm2059_vm4, %v2058_v42, %v2046_v5 }
 0x6de   :  { %5908 = vmatmul.mubr.msk.f32.gmra.mxu0 %vm88_vm1, %v2063_v50 }
 0x797   :  { %v5906_v54 = vpop.f32.mrf.mxu0 }
 0x798   :  { %v2168_v12 = vadd.f32 %v5906_v54, %v5422_v10 }
 0x799   :  { %v2162_v63 = vpop.f32.mrf.mxu0 }
 0x79a   :  { %v7041_v47 = vadd.f32 %v2168_v12, %v6590_v30  ;;  %v2163_v15 = vadd.f32 %v5422_v10, %v2162_v63 }
 0x79c   :  { %v7044_v43 = vadd.f32 %v2163_v15, %v6584_v25  ;;  %v2188_v35 = vsel %vm88_vm1, %v7041_v47, 0.0 }
 0x79d   :  { %2189 = vadd.xlane.f32.xlu1 %v2188_v35 }
 0x79e   :  { %v5909_v62 = vpop.f32.mrf.mxu0  ;;  %v2185_v0 = vsel %vm88_vm1, %v7044_v43, 0.0 }
 0x79f   :  { %2186 = vadd.xlane.f32.xlu0 %v2185_v0  ;;  %v2178_v23 = vadd.f32 %v5909_v62, %v5422_v10  ;;  %v2469_v0 = vld [vmem:[%s7809_s6 + $0x38] sm:$0xff] }
 0x7a0   :  { %v2172_v39 = vpop.f32.mrf.mxu0  ;;  %5924 = vmatprep.subr.mxu0 %v2469_v0 }
 0x7a1   :  { %v2173_v4 = vadd.f32 %v5422_v10, %v2172_v39  ;;  %v7054_v30 = vadd.f32 %v2178_v23, %v6594_v32  ;;  %5925 = vmatpush3.msra.mxu0 %v2469_v0  ;;  %v2468_v39 = vld [vmem:[%s7809_s6 + $0x30] sm:$0xff]  ;;  %v2467_v23 = vld [vmem:[%s7809_s6 + $0x28] sm:$0xff] }
 0x7a2   :  { %5926 = vmatprep.subr.mxu0 %v2468_v39 }
 0x7a3   :  { %v7051_v6 = vadd.f32 %v2173_v4, %v6588_v29  ;;  %v2194_v61 = vsel %vm88_vm1, %v7054_v30, 0.0  ;;  %5927 = vmatpush3.msra.mxu0 %v2468_v39  ;;  %v2466_v4 = vld [vmem:[%s7809_s6 + $0x20] sm:$0xff] }
 0x7a4   :  { %5928 = vmatprep.subr.mxu0 %v2467_v23 }
 0x7a5   :  { %v2191_v25 = vsel %vm88_vm1, %v7051_v6, 0.0  ;;  %5929 = vmatpush3.msra.mxu0 %v2467_v23 }
 0x7a6   :  { %2192 = vadd.xlane.f32.xlu0 %v2191_v25  ;;  %5930 = vmatprep.subr.mxu0 %v2466_v4  ;;  %v2465_v25 = vld [vmem:[%s7809_s6 + $0x18] sm:$0xff] }
 0x7a7   :  { %5931 = vmatpush3.msra.mxu0 %v2466_v4 }
 0x7a8   :  { %5932 = vmatprep.subr.mxu0 %v2465_v25 }
 0x7a9   :  { %5933 = vmatpush3.msra.mxu0 %v2465_v25 }
 0x7aa   :  { %2195 = vadd.xlane.f32.xlu0 %v2194_v61  ;;  %v2464_v61 = vld [vmem:[%s7809_s6 + $0x10] sm:$0xff] }
 0x7ab   :  { %5934 = vmatprep.subr.mxu0 %v2464_v61 }
 0x7ac   :  { %5935 = vmatpush3.msra.mxu0 %v2464_v61 }
 0x826   :  { %v2190_v60 = vpop.xlane.xlu1 %2189 }
 0x827   :  { %v2198_v51 = vmul.f32 0.03125, %v2190_v60  ;;  %v2463_v60 = vld [vmem:[%s7809_s6 + $0x8] sm:$0xff] }
 0x828   :  { %v2187_v53 = vpop.xlane.xlu0 %2186  ;;  %5936 = vmatprep.subr.mxu0 %v2463_v60 }
 0x829   :  { %v2202_v1 = vsub.f32 %v7041_v47, %v2198_v51  ;;  %v2197_v3 = vmul.f32 0.03125, %v2187_v53  ;;  %5937 = vmatpush3.msra.mxu0 %v2463_v60  ;;  %v2462_v51 = vld [vmem:[%s7809_s6] sm:$0xff] }
 0x82a   :  { %5938 = vmatprep.subr.mxu0 %v2462_v51  ;;  %v5429_v53 = vld [vmem:[#allocation5 + $0x6] ss:$0 sm:$0xff] }
 0x82b   :  { %v2201_v29 = vsub.f32 %v7044_v43, %v2197_v3  ;;  %v2206_v55 = vmul.f32 %v2202_v1, %v2202_v1  ;;  %5939 = vmatpush3.msra.mxu0 %v2462_v51 }
 0x82d   :  { %v2212_v32 = vsel %vm88_vm1, %v2206_v55, 0.0  ;;  %v2205_v56 = vmul.f32 %v2201_v29, %v2201_v29 }
 0x82e   :  { %2213 = vadd.xlane.f32.xlu1 %v2212_v32 }
 0x82f   :  { %v2193_v8 = vpop.xlane.xlu0 %2192  ;;  %v2209_v58 = vsel %vm88_vm1, %v2205_v56, 0.0 }
 0x830   :  { %v2199_v26 = vmul.f32 0.03125, %v2193_v8  ;;  %2210 = vadd.xlane.f32.xlu0 %v2209_v58 }
 0x832   :  { %v2203_v57 = vsub.f32 %v7051_v6, %v2199_v26 }
 0x833   :  { %v2196_v16 = vpop.xlane.xlu0 %2195 }
 0x834   :  { %v2200_v28 = vmul.f32 0.03125, %v2196_v16  ;;  %v2207_v44 = vmul.f32 %v2203_v57, %v2203_v57 }
 0x836   :  { %v2204_v17 = vsub.f32 %v7054_v30, %v2200_v28  ;;  %v2215_v48 = vsel %vm88_vm1, %v2207_v44, 0.0 }
 0x837   :  { %2216 = vadd.xlane.f32.xlu0 %v2215_v48 }
 0x838   :  { %v2208_v36 = vmul.f32 %v2204_v17, %v2204_v17 }
 0x83a   :  { %v2218_v37 = vsel %vm88_vm1, %v2208_v36, 0.0 }
 0x83b   :  { %2219 = vadd.xlane.f32.xlu1 %v2218_v37 }
 0x8b7   :  { %v2214_v20 = vpop.xlane.xlu1 %2213 }
 0x8b8   :  { %v2222_v21 = vmul.f32 0.03125, %v2214_v20 }
 0x8b9   :  { %v2211_v11 = vpop.xlane.xlu0 %2210 }
 0x8ba   :  { %v2226_v52 = vadd.f32 1e-05, %v2222_v21  ;;  %v2221_v22 = vmul.f32 0.03125, %v2211_v11 }
 0x8bc   :  { %6245 = vrsqrt.f32 %v2226_v52  ;;  %v2225_v9 = vadd.f32 1e-05, %v2221_v22 }
 0x8be   :  { %6247 = vrsqrt.f32 %v2225_v9 }
 0x8c0   :  { %v2217_v31 = vpop.xlane.xlu0 %2216 }
 0x8c1   :  { %v2223_v59 = vmul.f32 0.03125, %v2217_v31 }
 0x8c3   :  { %v2227_v13 = vadd.f32 1e-05, %v2223_v59 }
 0x8c4   :  { %v2220_v38 = vpop.xlane.xlu1 %2219 }
 0x8c5   :  { %6249 = vrsqrt.f32 %v2227_v13  ;;  %v2224_v40 = vmul.f32 0.03125, %v2220_v38 }
 0x8c7   :  { %v2228_v19 = vadd.f32 1e-05, %v2224_v40 }
 0x8c9   :  { %v6246_v45 = vpop.eup %6245  ;;  %6251 = vrsqrt.f32 %v2228_v19 }
 0x8ca   :  { %v2234_v2 = vmul.f32 %v6246_v45, %v2202_v1 }
 0x8cb   :  { %v6248_v7 = vpop.eup %6247 }
 0x8cc   :  { %v2233_v41 = vmul.f32 %v6248_v7, %v2201_v29  ;;  %v2242_v24 = vmul.f32 %v5427_v18, %v2234_v2 }
 0x8ce   :  { %v2241_v14 = vmul.f32 %v5427_v18, %v2233_v41  ;;  %v2250_v5 = vadd.f32 %v5428_v46, %v2242_v24 }
 0x8d0   :  { %v2249_v42 = vadd.f32 %v5428_v46, %v2241_v14 }
 0x8d2   :  { %v6250_v50 = vpop.eup %6249  ;;  %5918 = vmatprep.mubr.msk.f32.mxu1 %vm88_vm1, %v2249_v42 }
 0x8d3   :  { %5919 = vmatmul.mubr.msk.f32.vlgmr.msra.gmra.mxu1 %vm88_vm1, %v2250_v5  ;;  %v2235_v10 = vmul.f32 %v6250_v50, %v2203_v57 }
 0x8d5   :  { %v2243_v54 = vmul.f32 %v5427_v18, %v2235_v10 }
 0x8d6   :  { %v6252_v12 = vpop.eup %6251 }
 0x8d7   :  { %v2251_v63 = vadd.f32 %v5428_v46, %v2243_v54  ;;  %v2236_v15 = vmul.f32 %v6252_v12, %v2204_v17 }
 0x8d9   :  { %5921 = vmatprep.mubr.msk.f32.mxu1 %vm88_vm1, %v2251_v63  ;;  %v2244_v35 = vmul.f32 %v5427_v18, %v2236_v15 }
 0x8db   :  { %v2252_v62 = vadd.f32 %v5428_v46, %v2244_v35 }
 0x8dd   :  { %5922 = vmatmul.mubr.msk.f32.gmra.mxu1 %vm88_vm1, %v2252_v62 }
 0x993   :  { %v5920_v1 = vpop.f32.mrf.mxu1 }
 0x994   :  { %v7108_v3 = vadd.f32 %v5920_v1, %v5429_v53 }
 0x995   :  { %v2335_v29 = vpop.f32.mrf.mxu1 }
 0x996   :  { %v7111_v55 = vmul.f32 0.70710677, %v7108_v3  ;;  %v7113_v32 = vadd.f32 %v5429_v53, %v2335_v29 }
 0x998   :  { %v2363_v56 = vand.u32 2147483647, %v7111_v55  ;;  %v7117_v8 = vmul.f32 0.70710677, %v7113_v32  ;;  %vm2443_vm5 = vcmp.ge.f32.partialorder %v7111_v55, 0.0  ;;  %v2355_v55 = vmul.f32 0.5, %v7108_v3 }
 0x99a   :  { %v2367_v58 = vmul.f32 0.3275911, %v2363_v56  ;;  %v2362_v26 = vand.u32 2147483647, %v7117_v8  ;;  %v2419_v34 = vsub.f32 0.0, %v2363_v56  ;;  %vm2442_vm6 = vcmp.ge.f32.partialorder %v7117_v8, 0.0 }
 0x99c   :  { %v2371_v57 = vadd.f32 1.0, %v2367_v58  ;;  %v2366_v16 = vmul.f32 0.3275911, %v2362_v26  ;;  %v2418_v11 = vsub.f32 0.0, %v2362_v26  ;;  %v2423_v22 = vmul.f32 %v2419_v34, %v2363_v56 }
 0x99d   :  { %v5923_v28 = vpop.f32.mrf.mxu1 }
 0x99e   :  { %6253 = vrcp.f32 %v2371_v57  ;;  %v2370_v44 = vadd.f32 1.0, %v2366_v16  ;;  %v7120_v17 = vadd.f32 %v5923_v28, %v5429_v53  ;;  %v2422_v59 = vmul.f32 %v2418_v11, %v2362_v26 }
 0x99f   :  { %v2345_v48 = vpop.f32.mrf.mxu1  ;;  %v2428_v38 = vmul.f32 1.442695, %v2423_v22 }
 0x9a0   :  { %v7122_v36 = vadd.f32 %v5429_v53, %v2345_v48  ;;  %6255 = vrcp.f32 %v2370_v44  ;;  %v7125_v37 = vmul.f32 0.70710677, %v7120_v17  ;;  %v2426_v18 = vmul.f32 1.442695, %v2422_v59 }
 0x9a2   :  { %v7128_v49 = vmul.f32 0.70710677, %v7122_v36  ;;  %v2365_v33 = vand.u32 2147483647, %v7125_v37  ;;  %vm2445_vm8 = vcmp.ge.f32.partialorder %v7125_v37, 0.0 }
 0x9a4   :  { %v2364_v27 = vand.u32 2147483647, %v7128_v49  ;;  %v2369_v20 = vmul.f32 0.3275911, %v2365_v33  ;;  %v2421_v2 = vsub.f32 0.0, %v2365_v33  ;;  %vm2444_vm9 = vcmp.ge.f32.partialorder %v7128_v49, 0.0 }
 0x9a6   :  { %v2368_v21 = vmul.f32 0.3275911, %v2364_v27  ;;  %v2373_v52 = vadd.f32 1.0, %v2369_v20  ;;  %v2420_v41 = vsub.f32 0.0, %v2364_v27  ;;  %v2425_v42 = vmul.f32 %v2421_v2, %v2365_v33 }
 0x9a7   :  { %v2354_v2 = vmul.f32 0.5, %v7113_v32 }
 0x9a8   :  { %v2372_v9 = vadd.f32 1.0, %v2368_v21  ;;  %6257 = vrcp.f32 %v2373_v52  ;;  %v2424_v50 = vmul.f32 %v2420_v41, %v2364_v27  ;;  %v2432_v62 = vmul.f32 1.442695, %v2425_v42 }
 0x9aa   :  { %6259 = vrcp.f32 %v2372_v9  ;;  %v2430_v23 = vmul.f32 1.442695, %v2424_v50 }
 0x9ab   :  { %v6254_v31 = vpop.eup %6253  ;;  %6261 = vpow2.f32 %v2428_v38 }
 0x9ac   :  { %v2383_v13 = vmul.f32 1.0614054, %v6254_v31  ;;  %6263 = vpow2.f32 %v2426_v18 }
 0x9ad   :  { %v6256_v40 = vpop.eup %6255  ;;  %6265 = vpow2.f32 %v2432_v62 }
 0x9ae   :  { %v2387_v19 = vadd.f32 -1.4531521, %v2383_v13  ;;  %v2382_v45 = vmul.f32 1.0614054, %v6256_v40  ;;  %6267 = vpow2.f32 %v2430_v23 }
 0x9b0   :  { %v2391_v7 = vmul.f32 %v6254_v31, %v2387_v19  ;;  %v2386_v24 = vadd.f32 -1.4531521, %v2382_v45 }
 0x9b2   :  { %v2395_v46 = vadd.f32 1.4214138, %v2391_v7  ;;  %v2390_v14 = vmul.f32 %v6256_v40, %v2386_v24 }
 0x9b4   :  { %v2399_v5 = vmul.f32 %v6254_v31, %v2395_v46  ;;  %v2394_v10 = vadd.f32 1.4214138, %v2390_v14 }
 0x9b5   :  { %v6258_v54 = vpop.eup %6257 }
 0x9b6   :  { %v2403_v12 = vadd.f32 -0.28449672, %v2399_v5  ;;  %v2398_v15 = vmul.f32 %v6256_v40, %v2394_v10  ;;  %v2385_v35 = vmul.f32 1.0614054, %v6258_v54 }
 0x9b7   :  { %v6260_v63 = vpop.eup %6259 }
 0x9b8   :  { %v2407_v0 = vmul.f32 %v6254_v31, %v2403_v12  ;;  %v2384_v39 = vmul.f32 1.0614054, %v6260_v63  ;;  %v2402_v4 = vadd.f32 -0.28449672, %v2398_v15  ;;  %v2389_v25 = vadd.f32 -1.4531521, %v2385_v35  ;;  %v6262_v56 = vpop.eup %6261 }
 0x9b9   :  { %v6264_v48 = vpop.eup %6263  ;;  %v2357_v35 = vmul.f32 0.5, %v7120_v17 }
 0x9ba   :  { %v2411_v61 = vadd.f32 0.2548296, %v2407_v0  ;;  %v2388_v60 = vadd.f32 -1.4531521, %v2384_v39  ;;  %v2406_v51 = vmul.f32 %v6256_v40, %v2402_v4  ;;  %v2393_v53 = vmul.f32 %v6258_v54, %v2389_v25  ;;  %v6266_v18 = vpop.eup %6265  ;;  %v5434_v39 = vld [vmem:[#allocation5 + $0x7] ss:$0 sm:$0xff] }
 0x9bb   :  { %v6268_v24 = vpop.eup %6267 }
 0x9bc   :  { %v2415_v1 = vmul.f32 %v6254_v31, %v2411_v61  ;;  %v2392_v29 = vmul.f32 %v6260_v63, %v2388_v60  ;;  %v2410_v58 = vadd.f32 0.2548296, %v2406_v51  ;;  %v2397_v26 = vadd.f32 1.4214138, %v2393_v53 }
 0x9be   :  { %v2435_v57 = vmul.f32 %v6262_v56, %v2415_v1  ;;  %v2396_v16 = vadd.f32 1.4214138, %v2392_v29  ;;  %v2414_v28 = vmul.f32 %v6256_v40, %v2410_v58  ;;  %v2401_v44 = vmul.f32 %v6258_v54, %v2397_v26 }
 0x9c0   :  { %v2439_v33 = vsub.f32 1.0, %v2435_v57  ;;  %v2400_v34 = vmul.f32 %v6260_v63, %v2396_v16  ;;  %v2434_v27 = vmul.f32 %v6264_v48, %v2414_v28  ;;  %v2405_v20 = vadd.f32 -0.28449672, %v2401_v44 }
 0x9c2   :  { %v2447_v21 = vsub.f32 0.0, %v2439_v33  ;;  %v2404_v11 = vadd.f32 -0.28449672, %v2400_v34  ;;  %v2438_v52 = vsub.f32 1.0, %v2434_v27  ;;  %v2409_v22 = vmul.f32 %v6258_v54, %v2405_v20 }
 0x9c4   :  { %v2451_v9 = vsel %vm2443_vm5, %v2439_v33, %v2447_v21  ;;  %v2408_v31 = vmul.f32 %v6260_v63, %v2404_v11  ;;  %v2446_v59 = vsub.f32 0.0, %v2438_v52  ;;  %v2413_v13 = vadd.f32 0.2548296, %v2409_v22 }
 0x9c5   :  { %v2455_v40 = vadd.f32 1.0, %v2451_v9 }
 0x9c6   :  { %v2412_v38 = vadd.f32 0.2548296, %v2408_v31  ;;  %v2450_v19 = vsel %vm2442_vm6, %v2438_v52, %v2446_v59  ;;  %v2417_v45 = vmul.f32 %v6258_v54, %v2413_v13  ;;  %v7175_v13 = vld [vmem:[%s7808_s5 + $0x70] sm:$0xff] }
 0x9c7   :  { %v2454_v7 = vadd.f32 1.0, %v2450_v19  ;;  %v2459_v5 = vmul.f32 %v2455_v40, %v2355_v55  ;;  %5946 = vmatprep.subr.mxu1 %v7175_v13  ;;  %v7187_v40 = vld [vmem:[%s7808_s5 + $0x50] sm:$0xff]  ;;  %v7194_v19 = vld [vmem:[%s7808_s5 + $0x40] sm:$0xff] }
 0x9c8   :  { %v2416_v41 = vmul.f32 %v6260_v63, %v2412_v38  ;;  %v2437_v46 = vmul.f32 %v6266_v18, %v2417_v45  ;;  %v2356_v63 = vmul.f32 0.5, %v7122_v36  ;;  %v7180_v38 = vld [vmem:[%s7808_s5 + $0x60] sm:$0xff]  ;;  %5947 = vmatpush3.msra.mxu1 %v7175_v13 }
 0x9c9   :  { %v2458_v14 = vmul.f32 %v2454_v7, %v2354_v2  ;;  %5948 = vmatprep.subr.mxu1 %v7180_v38 }
 0x9ca   :  { %v2436_v42 = vmul.f32 %v6268_v24, %v2416_v41  ;;  %v2441_v50 = vsub.f32 1.0, %v2437_v46  ;;  %5949 = vmatpush3.msra.mxu1 %v7180_v38 }
 0x9cb   :  { %5940 = vmatprep.mubr.msk.f32.mxu0 %vm2474_vm7, %v2458_v14  ;;  %5950 = vmatprep.subr.mxu1 %v7187_v40 }
 0x9cc   :  { %v2440_v10 = vsub.f32 1.0, %v2436_v42  ;;  %v2449_v8 = vsub.f32 0.0, %v2441_v50  ;;  %5941 = vmatmul.mubr.msk.f32.vlgmr.msra.gmra.mxu0 %vm2474_vm7, %v2459_v5  ;;  %5951 = vmatpush3.msra.mxu1 %v7187_v40 }
 0x9cd   :  { %5952 = vmatprep.subr.mxu1 %v7194_v19 }
 0x9ce   :  { %v2448_v32 = vsub.f32 0.0, %v2440_v10  ;;  %v2453_v54 = vsel %vm2445_vm8, %v2441_v50, %v2449_v8  ;;  %5953 = vmatpush3.msra.mxu1 %v7194_v19 }
 0x9cf   :  { %v2457_v12 = vadd.f32 1.0, %v2453_v54 }
 0x9d0   :  { %v2452_v3 = vsel %vm2444_vm9, %v2440_v10, %v2448_v32  ;;  %v5447_v32 = vld [vmem:[#allocation5 + $0x8] ss:$0 sm:$0xff] }
 0x9d1   :  { %v2456_v15 = vadd.f32 1.0, %v2452_v3  ;;  %v2461_v0 = vmul.f32 %v2457_v12, %v2357_v35 }
 0x9d3   :  { %v2460_v62 = vmul.f32 %v2456_v15, %v2356_v63  ;;  %v5448_v63 = vld [vmem:[#allocation5 + $0x9] ss:$0 sm:$0xff] }
 0x9d5   :  { %5943 = vmatprep.mubr.msk.f32.mxu0 %vm2474_vm7, %v2460_v62 }
 0x9d6   :  { %5944 = vmatmul.mubr.msk.f32.gmra.mxu0 %vm2474_vm7, %v2461_v0 }
 0xa8c   :  { %v5942_v23 = vpop.f32.mrf.mxu0 }
 0xa8d   :  { %v2559_v37 = vadd.f32 %v5942_v23, %v5434_v39 }
 0xa8e   :  { %v2553_v4 = vpop.f32.mrf.mxu0 }
 0xa8f   :  { %v7145_v25 = vadd.f32 %v2559_v37, %v7041_v47  ;;  %v2554_v49 = vadd.f32 %v5434_v39, %v2553_v4 }
 0xa91   :  { %v7148_v61 = vadd.f32 %v2554_v49, %v7044_v43  ;;  %v2597_v17 = vsel %vm88_vm1, %v7145_v25, 0.0 }
 0xa92   :  { %2598 = vadd.xlane.f32.xlu1 %v2597_v17 }
 0xa93   :  { %v2594_v36 = vsel %vm88_vm1, %v7148_v61, 0.0 }
 0xa94   :  { %2595 = vadd.xlane.f32.xlu0 %v2594_v36 }
 0xa96   :  { %v5945_v60 = vpop.f32.mrf.mxu0 }
 0xa97   :  { %v2569_v51 = vadd.f32 %v5945_v60, %v5434_v39  ;;  %v5449_v60 = vld [vmem:[#allocation5 + $0xa] ss:$0 sm:$0xff] }
 0xa98   :  { %v2563_v53 = vpop.f32.mrf.mxu0 }
 0xa99   :  { %v7155_v1 = vadd.f32 %v2569_v51, %v7054_v30  ;;  %v2564_v47 = vadd.f32 %v5434_v39, %v2563_v53 }
 0xa9b   :  { %v7158_v29 = vadd.f32 %v2564_v47, %v7051_v6  ;;  %v2603_v43 = vsel %vm88_vm1, %v7155_v1, 0.0 }
 0xa9c   :  { %2604 = vadd.xlane.f32.xlu1 %v2603_v43 }
 0xa9d   :  { %v2600_v56 = vsel %vm88_vm1, %v7158_v29, 0.0 }
 0xa9e   :  { %2601 = vadd.xlane.f32.xlu0 %v2600_v56 }
 0xb1b   :  { %v2599_v58 = vpop.xlane.xlu1 %2598 }
 0xb1c   :  { %v2607_v26 = vmul.f32 0.03125, %v2599_v58 }
 0xb1d   :  { %v2596_v57 = vpop.xlane.xlu0 %2595 }
 0xb1e   :  { %v2611_v16 = vsub.f32 %v7145_v25, %v2607_v26  ;;  %v2606_v28 = vmul.f32 0.03125, %v2596_v57 }
 0xb20   :  { %v2610_v30 = vsub.f32 %v7148_v61, %v2606_v28  ;;  %v2615_v44 = vmul.f32 %v2611_v16, %v2611_v16 }
 0xb22   :  { %v2621_v6 = vsel %vm88_vm1, %v2615_v44, 0.0  ;;  %v2614_v48 = vmul.f32 %v2610_v30, %v2610_v30 }
 0xb23   :  { %2622 = vadd.xlane.f32.xlu1 %v2621_v6 }
 0xb24   :  { %v2618_v33 = vsel %vm88_vm1, %v2614_v48, 0.0 }
 0xb25   :  { %v2605_v34 = vpop.xlane.xlu1 %2604  ;;  %2619 = vadd.xlane.f32.xlu0 %v2618_v33 }
 0xb26   :  { %v2609_v27 = vmul.f32 0.03125, %v2605_v34 }
 0xb27   :  { %v2602_v20 = vpop.xlane.xlu0 %2601 }
 0xb28   :  { %v2613_v21 = vsub.f32 %v7155_v1, %v2609_v27  ;;  %v2608_v11 = vmul.f32 0.03125, %v2602_v20 }
 0xb2a   :  { %v2612_v52 = vsub.f32 %v7158_v29, %v2608_v11  ;;  %v2617_v22 = vmul.f32 %v2613_v21, %v2613_v21 }
 0xb2c   :  { %v2627_v9 = vsel %vm88_vm1, %v2617_v22, 0.0  ;;  %v2616_v31 = vmul.f32 %v2612_v52, %v2612_v52 }
 0xb2d   :  { %2628 = vadd.xlane.f32.xlu1 %v2627_v9 }
 0xb2e   :  { %v2624_v59 = vsel %vm88_vm1, %v2616_v31, 0.0 }
 0xb2f   :  { %2625 = vadd.xlane.f32.xlu0 %v2624_v59 }
 0xbac   :  { %v2623_v45 = vpop.xlane.xlu1 %2622 }
 0xbad   :  { %v2631_v18 = vmul.f32 0.03125, %v2623_v45 }
 0xbae   :  { %v2620_v2 = vpop.xlane.xlu0 %2619 }
 0xbaf   :  { %v2635_v7 = vadd.f32 1e-05, %v2631_v18  ;;  %v2630_v41 = vmul.f32 0.03125, %v2620_v2 }
 0xbb1   :  { %6269 = vrsqrt.f32 %v2635_v7  ;;  %v2634_v24 = vadd.f32 1e-05, %v2630_v41 }
 0xbb3   :  { %6271 = vrsqrt.f32 %v2634_v24 }
 0xbb6   :  { %v2629_v55 = vpop.xlane.xlu1 %2628 }
 0xbb7   :  { %v2633_v46 = vmul.f32 0.03125, %v2629_v55 }
 0xbb8   :  { %v2626_v14 = vpop.xlane.xlu0 %2625 }
 0xbb9   :  { %v2637_v42 = vadd.f32 1e-05, %v2633_v46  ;;  %v2632_v5 = vmul.f32 0.03125, %v2626_v14 }
 0xbbb   :  { %6273 = vrsqrt.f32 %v2637_v42  ;;  %v2636_v50 = vadd.f32 1e-05, %v2632_v5 }
 0xbbd   :  { %6275 = vrsqrt.f32 %v2636_v50 }
 0xbbe   :  { %v6270_v10 = vpop.eup %6269 }
 0xbbf   :  { %v2643_v8 = vmul.f32 %v6270_v10, %v2611_v16 }
 0xbc0   :  { %v6272_v54 = vpop.eup %6271 }
 0xbc1   :  { %v2642_v12 = vmul.f32 %v6272_v54, %v2610_v30  ;;  %v2651_v3 = vmul.f32 %v5447_v32, %v2643_v8 }
 0xbc3   :  { %v2650_v15 = vmul.f32 %v5447_v32, %v2642_v12  ;;  %v2659_v62 = vadd.f32 %v5448_v63, %v2651_v3 }
 0xbc5   :  { %v2658_v35 = vadd.f32 %v5448_v63, %v2650_v15 }
 0xbc7   :  { %5954 = vmatprep.mubr.msk.f32.mxu1 %vm88_vm1, %v2658_v35 }
 0xbc8   :  { %v6274_v0 = vpop.eup %6273  ;;  %5955 = vmatmul.mubr.msk.f32.vlgmr.msra.gmra.mxu1 %vm88_vm1, %v2659_v62 }
 0xbc9   :  { %v2645_v39 = vmul.f32 %v6274_v0, %v2613_v21 }
 0xbca   :  { %v6276_v23 = vpop.eup %6275 }
 0xbcb   :  { %v2644_v37 = vmul.f32 %v6276_v23, %v2612_v52  ;;  %v2653_v4 = vmul.f32 %v5447_v32, %v2645_v39 }
 0xbcd   :  { %v2652_v49 = vmul.f32 %v5447_v32, %v2644_v37  ;;  %v2661_v36 = vadd.f32 %v5448_v63, %v2653_v4 }
 0xbcf   :  { %v2660_v17 = vadd.f32 %v5448_v63, %v2652_v49 }
 0xbd1   :  { %5957 = vmatprep.mubr.msk.f32.mxu1 %vm88_vm1, %v2660_v17 }
 0xbd2   :  { %5958 = vmatmul.mubr.msk.f32.gmra.mxu1 %vm88_vm1, %v2661_v36 }
 0xc88   :  { %v5956_v51 = vpop.f32.mrf.mxu1 }
 0xc89   :  { %v7204_v53 = vadd.f32 %v5956_v51, %v5449_v60 }
 0xc8a   :  { %v2744_v47 = vpop.f32.mrf.mxu1 }
 0xc8b   :  { %v7206_v43 = vadd.f32 %v5449_v60, %v2744_v47  ;;  %3129 = vrot.lane.b32.xlu1 %v7204_v53, %s6487_s18  ;;  %2767 = vrot.lane.b32.xlu0 %v7204_v53, %s6488_s19 }
 0xc8d   :  { %5964 = vmatprep.mubr.msk.f32.mxu1 %vm395_vm2, %v7206_v43 }
 0xc8f   :  { %2947 = vrot.lane.b32.xlu0 %v7204_v53, %s6489_s4  ;;  %2765 = vrot.lane.b32.xlu1 %v7206_v43, %s6488_s19 }
 0xc92   :  { %v5959_v56 = vpop.f32.mrf.mxu1 }
 0xc93   :  { %2943 = vrot.lane.b32.xlu0 %v7204_v53, %s6490_s20  ;;  %2945 = vrot.lane.b32.xlu1 %v7206_v43, %s6489_s4  ;;  %v7230_v57 = vadd.f32 %v5959_v56, %v5449_v60 }
 0xc94   :  { %v2754_v58 = vpop.f32.mrf.mxu1 }
 0xc95   :  { %v7222_v26 = vadd.f32 %v5449_v60, %v2754_v58 }
 0xc97   :  { %5971 = vmatprep.mubr.msk.f32.mxu0 %vm395_vm2, %v7222_v26  ;;  %3127 = vrot.lane.b32.xlu0 %v7206_v43, %s6487_s18 }
 0xc98   :  { %2941 = vrot.lane.b32.xlu1 %v7206_v43, %s6490_s20 }
 0xc9b   :  { %3038 = vrot.lane.b32.xlu0 %v7230_v57, %s6489_s4 }
 0xc9c   :  { %3123 = vrot.lane.b32.xlu1 %v7206_v43, %s6491_s0 }
 0xc9f   :  { %3034 = vrot.lane.b32.xlu0 %v7230_v57, %s6490_s20 }
 0xca0   :  { %2856 = vrot.lane.b32.xlu1 %v7230_v57, %s6488_s19 }
 0xca3   :  { %3125 = vrot.lane.b32.xlu0 %v7204_v53, %s6491_s0 }
 0xca4   :  { %3220 = vrot.lane.b32.xlu1 %v7230_v57, %s6487_s18 }
 0xca7   :  { %3036 = vrot.lane.b32.xlu0 %v7222_v26, %s6489_s4 }
 0xca8   :  { %2854 = vrot.lane.b32.xlu1 %v7222_v26, %s6488_s19 }
 0xcab   :  { %3309 = vrot.lane.b32.xlu0 %v7206_v43, %s6492_s21 }
 0xcac   :  { %3311 = vrot.lane.b32.xlu1 %v7204_v53, %s6492_s21 }
 0xcaf   :  { %3218 = vrot.lane.b32.xlu0 %v7222_v26, %s6487_s18 }
 0xcb0   :  { %3402 = vrot.lane.b32.xlu1 %v7230_v57, %s6492_s21 }
 0xcb3   :  { %3216 = vrot.lane.b32.xlu0 %v7230_v57, %s6491_s0 }
 0xcb4   :  { %3032 = vrot.lane.b32.xlu1 %v7222_v26, %s6490_s20 }
 0xcb7   :  { %3307 = vrot.lane.b32.xlu0 %v7204_v53, %s6493_s22 }
 0xcb8   :  { %3305 = vrot.lane.b32.xlu1 %v7206_v43, %s6493_s22 }
 0xcbb   :  { %3396 = vrot.lane.b32.xlu0 %v7222_v26, %s6493_s22 }
 0xcbc   :  { %3214 = vrot.lane.b32.xlu1 %v7222_v26, %s6491_s0 }
 0xcbf   :  { %3681 = vrot.lane.b32.xlu0 %v7204_v53, %s6494_s23 }
 0xcc0   :  { %3400 = vrot.lane.b32.xlu1 %v7222_v26, %s6492_s21 }
 0xcc3   :  { %3942 = vrot.lane.b32.xlu0 %v7230_v57, %s6495_s24 }
 0xcc4   :  { %3398 = vrot.lane.b32.xlu1 %v7230_v57, %s6493_s22 }
 0xcc7   :  { %3766 = vrot.lane.b32.xlu0 %v7222_v26, %s6494_s23 }
 0xcc8   :  { %3679 = vrot.lane.b32.xlu1 %v7206_v43, %s6494_s23 }
 0xccb   :  { %3940 = vrot.lane.b32.xlu0 %v7222_v26, %s6495_s24 }
 0xccc   :  { %3768 = vrot.lane.b32.xlu1 %v7230_v57, %s6494_s23 }
 0xcd0   :  { %3855 = vrot.lane.b32.xlu1 %v7204_v53, %s6495_s24 }
 0xcd4   :  { %3853 = vrot.lane.b32.xlu1 %v7206_v43, %s6495_s24 }
 0xcd8   :  { %4029 = vrot.lane.b32.xlu1 %v7204_v53, %s6496_s7 }
 0xcdc   :  { %4027 = vrot.lane.b32.xlu1 %v7206_v43, %s6496_s7 }
 0xcfd   :  { %v2768_v16 = vpop.permute.xlu0 %2767  ;;  %v3130_v28 = vpop.permute.xlu1 %3129 }
 0xcfe   :  { %5960 = vmatprep.subr.msk.mxu1 %vm395_vm2, %v2768_v16 }
 0xcff   :  { %5961 = vmatpush3.xpose.msk.msra.mxu1 %vm395_vm2, %v2768_v16 }
 0xd01   :  { %v2948_v30 = vpop.permute.xlu0 %2947  ;;  %v2766_v44 = vpop.permute.xlu1 %2765 }
 0xd02   :  { %5962 = vmatprep.subr.msk.mxu1 %vm395_vm2, %v2766_v44 }
 0xd03   :  { %5963 = vmatpush3.xpose.msk.msra.mxu1 %vm395_vm2, %v2766_v44 }
 0xd04   :  { %5974 = vmatprep.subr.msk.mxu1 %vm395_vm2, %v2948_v30 }
 0xd05   :  { %v2944_v6 = vpop.permute.xlu0 %2943  ;;  %v2946_v48 = vpop.permute.xlu1 %2945 }
 0xd06   :  { %5965 = vmatmul.mubr.msk.f32.vlgmr.msra.gmra.mxu1 %vm395_vm2, %v7204_v53 }
 0xd07   :  { %5975 = vmatpush3.xpose.msk.msra.mxu1 %vm395_vm2, %v2948_v30 }
 0xd08   :  { %5976 = vmatprep.subr.msk.mxu1 %vm395_vm2, %v2946_v48 }
 0xd09   :  { %v3128_v33 = vpop.permute.xlu0 %3127 }
 0xd0a   :  { %v2942_v34 = vpop.permute.xlu1 %2941 }
 0xd0b   :  { %5978 = vmatprep.mubr.msk.f32.mxu1 %vm395_vm2, %v2942_v34  ;;  %5977 = vmatpush3.xpose.msk.msra.mxu1 %vm395_vm2, %v2946_v48 }
 0xd0c   :  { %5988 = vmatprep.subr.msk.mxu1 %vm395_vm2, %v3130_v28 }
 0xd0d   :  { %v3039_v27 = vpop.permute.xlu0 %3038 }
 0xd0e   :  { %v3124_v20 = vpop.permute.xlu1 %3123  ;;  %5979 = vmatmul.mubr.msk.f32.vlgmr.msra.gmra.mxu1 %vm395_vm2, %v2944_v6 }
 0xd0f   :  { %5989 = vmatpush3.xpose.msk.msra.mxu1 %vm395_vm2, %v3130_v28  ;;  %5992 = vmatprep.mubr.msk.f32.mxu1 %vm395_vm2, %v3124_v20 }
 0xd10   :  { %5990 = vmatprep.subr.msk.mxu1 %vm395_vm2, %v3128_v33 }
 0xd11   :  { %v3035_v21 = vpop.permute.xlu0 %3034 }
 0xd12   :  { %v2857_v11 = vpop.permute.xlu1 %2856 }
 0xd13   :  { %5967 = vmatprep.subr.msk.mxu0 %vm395_vm2, %v2857_v11  ;;  %5991 = vmatpush3.xpose.msk.msra.mxu1 %vm395_vm2, %v3128_v33 }
 0xd14   :  { %5968 = vmatpush3.xpose.msk.msra.mxu0 %vm395_vm2, %v2857_v11 }
 0xd15   :  { %v3126_v52 = vpop.permute.xlu0 %3125 }
 0xd16   :  { %v3221_v22 = vpop.permute.xlu1 %3220  ;;  %5993 = vmatmul.mubr.msk.f32.vlgmr.msra.gmra.mxu1 %vm395_vm2, %v3126_v52 }
 0xd19   :  { %v3037_v9 = vpop.permute.xlu0 %3036 }
 0xd1a   :  { %v2855_v31 = vpop.permute.xlu1 %2854 }
 0xd1b   :  { %5969 = vmatprep.subr.msk.mxu0 %vm395_vm2, %v2855_v31 }
 0xd1c   :  { %5970 = vmatpush3.xpose.msk.msra.mxu0 %vm395_vm2, %v2855_v31 }
 0xd1d   :  { %5981 = vmatprep.subr.msk.mxu0 %vm395_vm2, %v3039_v27  ;;  %v3310_v59 = vpop.permute.xlu0 %3309 }
 0xd1e   :  { %v3312_v45 = vpop.permute.xlu1 %3311 }
 0xd1f   :  { %5972 = vmatmul.mubr.msk.f32.vlgmr.msra.gmra.mxu0 %vm395_vm2, %v7230_v57  ;;  %6002 = vmatprep.subr.msk.mxu1 %vm395_vm2, %v3312_v45 }
 0xd20   :  { %5982 = vmatpush3.xpose.msk.msra.mxu0 %vm395_vm2, %v3039_v27  ;;  %6003 = vmatpush3.xpose.msk.msra.mxu1 %vm395_vm2, %v3312_v45 }
 0xd21   :  { %5983 = vmatprep.subr.msk.mxu0 %vm395_vm2, %v3037_v9  ;;  %6004 = vmatprep.subr.msk.mxu1 %vm395_vm2, %v3310_v59  ;;  %v3219_v18 = vpop.permute.xlu0 %3218 }
 0xd22   :  { %v3403_v2 = vpop.permute.xlu1 %3402 }
 0xd24   :  { %5984 = vmatpush3.xpose.msk.msra.mxu0 %vm395_vm2, %v3037_v9  ;;  %6005 = vmatpush3.xpose.msk.msra.mxu1 %vm395_vm2, %v3310_v59 }
 0xd25   :  { %5995 = vmatprep.subr.msk.mxu0 %vm395_vm2, %v3221_v22  ;;  %v3217_v7 = vpop.permute.xlu0 %3216 }
 0xd26   :  { %v3033_v41 = vpop.permute.xlu1 %3032 }
 0xd27   :  { %5985 = vmatprep.mubr.msk.f32.mxu0 %vm395_vm2, %v3033_v41 }
 0xd28   :  { %5986 = vmatmul.mubr.msk.f32.vlgmr.msra.gmra.mxu0 %vm395_vm2, %v3035_v21 }
 0xd29   :  { %5996 = vmatpush3.xpose.msk.msra.mxu0 %vm395_vm2, %v3221_v22  ;;  %v3308_v24 = vpop.permute.xlu0 %3307 }
 0xd2a   :  { %5997 = vmatprep.subr.msk.mxu0 %vm395_vm2, %v3219_v18  ;;  %v3306_v55 = vpop.permute.xlu1 %3305 }
 0xd2b   :  { %6006 = vmatprep.mubr.msk.f32.mxu1 %vm395_vm2, %v3306_v55 }
 0xd2c   :  { %6007 = vmatmul.mubr.msk.f32.vlgmr.msra.gmra.mxu1 %vm395_vm2, %v3308_v24 }
 0xd2d   :  { %5998 = vmatpush3.xpose.msk.msra.mxu0 %vm395_vm2, %v3219_v18  ;;  %v3397_v46 = vpop.permute.xlu0 %3396 }
 0xd2e   :  { %6009 = vmatprep.subr.msk.mxu0 %vm395_vm2, %v3403_v2  ;;  %v3215_v14 = vpop.permute.xlu1 %3214 }
 0xd2f   :  { %5999 = vmatprep.mubr.msk.f32.mxu0 %vm395_vm2, %v3215_v14 }
 0xd30   :  { %6000 = vmatmul.mubr.msk.f32.vlgmr.msra.gmra.mxu0 %vm395_vm2, %v3217_v7 }
 0xd31   :  { %6010 = vmatpush3.xpose.msk.msra.mxu0 %vm395_vm2, %v3403_v2  ;;  %6013 = vmatprep.mubr.msk.f32.mxu0 %vm395_vm2, %v3397_v46  ;;  %v3682_v42 = vpop.permute.xlu0 %3681 }
 0xd32   :  { %v3401_v5 = vpop.permute.xlu1 %3400  ;;  %6016 = vmatprep.subr.mxu1 %v3682_v42 }
 0xd33   :  { %6011 = vmatprep.subr.msk.mxu0 %vm395_vm2, %v3401_v5  ;;  %6017 = vmatpush3.msra.mxu1 %v3682_v42 }
 0xd35   :  { %6012 = vmatpush3.xpose.msk.msra.mxu0 %vm395_vm2, %v3401_v5 }
 0xd36   :  { %v3399_v50 = vpop.permute.xlu1 %3398 }
 0xd38   :  { %6014 = vmatmul.mubr.msk.f32.vlgmr.msra.gmra.mxu0 %vm395_vm2, %v3399_v50 }
 0xd3a   :  { %v3680_v10 = vpop.permute.xlu1 %3679 }
 0xd3b   :  { %6018 = vmatprep.subr.mxu1 %v3680_v10 }
 0xd3c   :  { %6019 = vmatpush3.msra.mxu1 %v3680_v10 }
 0xd3e   :  { %v7340_v8 = vpop.permute.xlu1 %3768 }
 0xd3f   :  { %6023 = vmatprep.subr.mxu1 %v7340_v8 }
 0xd42   :  { %v3856_v32 = vpop.permute.xlu1 %3855 }
 0xd43   :  { %6030 = vmatprep.subr.mxu0 %v3856_v32 }
 0xd44   :  { %6031 = vmatpush3.msra.mxu0 %v3856_v32  ;;  %v7418_v32 = vpop.permute.xlu0 %3942 }
 0xd46   :  { %v3854_v54 = vpop.permute.xlu1 %3853 }
 0xd47   :  { %6032 = vmatprep.subr.mxu0 %v3854_v54 }
 0xd48   :  { %6033 = vmatpush3.msra.mxu0 %v3854_v54  ;;  %v7420_v54 = vpop.permute.xlu0 %3766 }
 0xd4a   :  { %v7343_v12 = vpop.permute.xlu1 %4029 }
 0xd4b   :  { %6044 = vmatprep.subr.mxu0 %v7343_v12 }
 0xdc6   :  { %v5966_v3 = vpop.f32.mrf.mxu1 }
 0xdc7   :  { %v7346_v63 = vmul.f32 0.35355338, %v5966_v3  ;;  %v7422_v3 = vpop.permute.xlu1 %4027 }
 0xdc8   :  { %v2843_v15 = vpop.f32.mrf.mxu1 }
 0xdc9   :  { %v7348_v35 = vmul.f32 0.35355338, %v2843_v15  ;;  %v3506_v62 = vsel %vm1130_vm3, %v7346_v63, -inf  ;;  %v7424_v15 = vpop.permute.xlu0 %3940 }
 0xdca   :  { %3507 = vmax.xlane.f32.xlu1 %v3506_v62 }
 0xdcb   :  { %v3503_v0 = vsel %vm1130_vm3, %v7348_v35, -inf }
 0xdcc   :  { %3504 = vmax.xlane.f32.xlu0 %v3503_v0 }
 0xdce   :  { %v5980_v39 = vpop.f32.mrf.mxu1 }
 0xdcf   :  { %v7354_v23 = vmul.f32 0.35355338, %v5980_v39 }
 0xdd0   :  { %v3023_v4 = vpop.f32.mrf.mxu1 }
 0xdd1   :  { %v3518_v37 = vsel %vm1130_vm3, %v7354_v23, -inf  ;;  %v7372_v44 = vmul.f32 0.35355338, %v3023_v4 }
 0xdd2   :  { %3519 = vmax.xlane.f32.xlu1 %v3518_v37 }
 0xdd3   :  { %v3515_v34 = vsel %vm1130_vm3, %v7372_v44, -inf }
 0xdd6   :  { %v5994_v49 = vpop.f32.mrf.mxu1 }
 0xdd7   :  { %v7358_v17 = vmul.f32 0.35355338, %v5994_v49 }
 0xdd8   :  { %v3205_v36 = vpop.f32.mrf.mxu1 }
 0xdd9   :  { %v7360_v60 = vmul.f32 0.35355338, %v3205_v36  ;;  %v3530_v51 = vsel %vm1130_vm3, %v7358_v17, -inf }
 0xdda   :  { %3531 = vmax.xlane.f32.xlu1 %v3530_v51 }
 0xddb   :  { %v3527_v47 = vsel %vm1130_vm3, %v7360_v60, -inf }
 0xdde   :  { %3528 = vmax.xlane.f32.xlu1 %v3527_v47 }
 0xddf   :  { %v5973_v56 = vpop.f32.mrf.mxu0 }
 0xde0   :  { %v7366_v58 = vmul.f32 0.35355338, %v5973_v56 }
 0xde1   :  { %v2932_v16 = vpop.f32.mrf.mxu0 }
 0xde2   :  { %v7368_v28 = vmul.f32 0.35355338, %v2932_v16  ;;  %v3512_v30 = vsel %vm1130_vm3, %v7366_v58, -inf }
 0xde3   :  { %3513 = vmax.xlane.f32.xlu0 %v3512_v30 }
 0xde4   :  { %v3509_v6 = vsel %vm1130_vm3, %v7368_v28, -inf }
 0xde7   :  { %3510 = vmax.xlane.f32.xlu0 %v3509_v6 }
 0xde8   :  { %v5987_v48 = vpop.f32.mrf.mxu0 }
 0xde9   :  { %v7376_v33 = vmul.f32 0.35355338, %v5987_v48 }
 0xdea   :  { %v3114_v27 = vpop.f32.mrf.mxu0 }
 0xdeb   :  { %3516 = vmax.xlane.f32.xlu0 %v3515_v34  ;;  %v7382_v11 = vmul.f32 0.35355338, %v3114_v27  ;;  %v3524_v22 = vsel %vm1130_vm3, %v7376_v33, -inf }
 0xdec   :  { %v6008_v20 = vpop.f32.mrf.mxu1 }
 0xded   :  { %v7380_v21 = vmul.f32 0.35355338, %v6008_v20  ;;  %v3521_v18 = vsel %vm1130_vm3, %v7382_v11, -inf }
 0xdee   :  { %v3387_v52 = vpop.f32.mrf.mxu1 }
 0xdef   :  { %v7386_v9 = vmul.f32 0.35355338, %v3387_v52  ;;  %3525 = vmax.xlane.f32.xlu0 %v3524_v22  ;;  %v3542_v31 = vsel %vm1130_vm3, %v7380_v21, -inf }
 0xdf0   :  { %3543 = vmax.xlane.f32.xlu1 %v3542_v31  ;;  %v6001_v59 = vpop.f32.mrf.mxu0 }
 0xdf1   :  { %v7390_v45 = vmul.f32 0.35355338, %v6001_v59  ;;  %v3539_v7 = vsel %vm1130_vm3, %v7386_v9, -inf }
 0xdf2   :  { %v3296_v2 = vpop.f32.mrf.mxu0 }
 0xdf3   :  { %3522 = vmax.xlane.f32.xlu0 %v3521_v18  ;;  %v7396_v41 = vmul.f32 0.35355338, %v3296_v2  ;;  %v3536_v24 = vsel %vm1130_vm3, %v7390_v45, -inf }
 0xdf4   :  { %3540 = vmax.xlane.f32.xlu1 %v3539_v7 }
 0xdf5   :  { %v3533_v42 = vsel %vm1130_vm3, %v7396_v41, -inf }
 0xdf7   :  { %3537 = vmax.xlane.f32.xlu0 %v3536_v24 }
 0xdf8   :  { %v6015_v55 = vpop.f32.mrf.mxu0 }
 0xdf9   :  { %v7400_v46 = vmul.f32 0.35355338, %v6015_v55 }
 0xdfa   :  { %v3478_v14 = vpop.f32.mrf.mxu0 }
 0xdfb   :  { %v7404_v5 = vmul.f32 0.35355338, %v3478_v14  ;;  %3534 = vmax.xlane.f32.xlu0 %v3533_v42  ;;  %v3548_v50 = vsel %vm1130_vm3, %v7400_v46, -inf }
 0xdfc   :  { %3549 = vmax.xlane.f32.xlu1 %v3548_v50 }
 0xdfd   :  { %v3545_v10 = vsel %vm1130_vm3, %v7404_v5, -inf }
 0xdff   :  { %3546 = vmax.xlane.f32.xlu0 %v3545_v10 }
 0xe0d   :  { %4203 = vrot.lane.b32.xlu1 %v7204_v53, %s6497_s25 }
 0xe11   :  { %4201 = vrot.lane.b32.xlu1 %v7206_v43, %s6497_s25 }
 0xe15   :  { %4116 = vrot.lane.b32.xlu0 %v7230_v57, %s6496_s7 }
 0xe19   :  { %4114 = vrot.lane.b32.xlu0 %v7222_v26, %s6496_s7 }
 0xe53   :  { %v3508_v62 = vpop.xlane.xlu1 %3507 }
 0xe54   :  { %v3552_v53 = vsub.f32 %v7346_v63, %v3508_v62 }
 0xe55   :  { %v3505_v0 = vpop.xlane.xlu0 %3504 }
 0xe56   :  { %v3569_v39 = vmul.f32 1.442695, %v3552_v53  ;;  %v3551_v43 = vsub.f32 %v7348_v35, %v3505_v0 }
 0xe58   :  { %6277 = vpow2.f32 %v3569_v39  ;;  %v3567_v37 = vmul.f32 1.442695, %v3551_v43 }
 0xe5a   :  { %6279 = vpow2.f32 %v3567_v37 }
 0xe5b   :  { %v3520_v4 = vpop.xlane.xlu1 %3519 }
 0xe5c   :  { %v3556_v49 = vsub.f32 %v7354_v23, %v3520_v4 }
 0xe5e   :  { %v3577_v36 = vmul.f32 1.442695, %v3556_v49 }
 0xe60   :  { %6281 = vpow2.f32 %v3577_v36 }
 0xe63   :  { %v3532_v16 = vpop.xlane.xlu1 %3531 }
 0xe64   :  { %v3560_v20 = vsub.f32 %v7358_v17, %v3532_v16 }
 0xe65   :  { %v7429_v51 = vpop.eup %6277 }
 0xe66   :  { %v3602_v47 = vsel %vm1130_vm3, %v7429_v51, 0.0  ;;  %v3585_v18 = vmul.f32 1.442695, %v3560_v20 }
 0xe67   :  { %v7433_v56 = vpop.eup %6279  ;;  %3603 = vadd.xlane.f32.xlu1 %v3602_v47  ;;  %v3529_v52 = vpop.xlane.xlu1 %3528 }
 0xe68   :  { %v3599_v63 = vsel %vm1130_vm3, %v7433_v56, 0.0 }
 0xe69   :  { %3600 = vadd.xlane.f32.xlu0 %v3599_v63 }
 0xe6c   :  { %v3514_v35 = vpop.xlane.xlu0 %3513 }
 0xe6d   :  { %v3554_v30 = vsub.f32 %v7366_v58, %v3514_v35  ;;  %v7438_v6 = vpop.eup %6281  ;;  %v3559_v58 = vsub.f32 %v7360_v60, %v3529_v52 }
 0xe6e   :  { %v3614_v48 = vsel %vm1130_vm3, %v7438_v6, 0.0 }
 0xe6f   :  { %v3573_v23 = vmul.f32 1.442695, %v3554_v30  ;;  %3615 = vadd.xlane.f32.xlu1 %v3614_v48  ;;  %v3583_v14 = vmul.f32 1.442695, %v3559_v58 }
 0xe70   :  { %v3511_v34 = vpop.xlane.xlu0 %3510 }
 0xe71   :  { %6283 = vpow2.f32 %v3573_v23  ;;  %v3553_v27 = vsub.f32 %v7368_v28, %v3511_v34 }
 0xe73   :  { %v3571_v22 = vmul.f32 1.442695, %v3553_v27 }
 0xe74   :  { %v3517_v31 = vpop.xlane.xlu0 %3516 }
 0xe75   :  { %6285 = vpow2.f32 %v3571_v22  ;;  %v3555_v59 = vsub.f32 %v7372_v44, %v3517_v31 }
 0xe77   :  { %v3575_v2 = vmul.f32 1.442695, %v3555_v59 }
 0xe78   :  { %v3526_v7 = vpop.xlane.xlu0 %3525 }
 0xe79   :  { %6287 = vpow2.f32 %v3575_v2  ;;  %v3558_v24 = vsub.f32 %v7376_v33, %v3526_v7  ;;  %v3544_v55 = vpop.xlane.xlu1 %3543 }
 0xe7a   :  { %6289 = vpow2.f32 %v3585_v18  ;;  %v3564_v17 = vsub.f32 %v7380_v21, %v3544_v55 }
 0xe7b   :  { %v3581_v28 = vmul.f32 1.442695, %v3558_v24 }
 0xe7c   :  { %v3523_v42 = vpop.xlane.xlu0 %3522  ;;  %v3593_v60 = vmul.f32 1.442695, %v3564_v17 }
 0xe7d   :  { %6291 = vpow2.f32 %v3581_v28  ;;  %v3557_v50 = vsub.f32 %v7382_v11, %v3523_v42  ;;  %v3541_v10 = vpop.xlane.xlu1 %3540 }
 0xe7e   :  { %v7449_v44 = vpop.eup %6283  ;;  %6293 = vpow2.f32 %v3583_v14  ;;  %v3563_v53 = vsub.f32 %v7386_v9, %v3541_v10 }
 0xe7f   :  { %v3579_v62 = vmul.f32 1.442695, %v3557_v50  ;;  %v3608_v33 = vsel %vm1130_vm3, %v7449_v44, 0.0 }
 0xe80   :  { %v3538_v0 = vpop.xlane.xlu0 %3537  ;;  %3609 = vadd.xlane.f32.xlu0 %v3608_v33  ;;  %v3591_v11 = vmul.f32 1.442695, %v3563_v53 }
 0xe81   :  { %6295 = vpow2.f32 %v3579_v62  ;;  %v3562_v21 = vsub.f32 %v7390_v45, %v3538_v0 }
 0xe82   :  { %v7455_v39 = vpop.eup %6285  ;;  %6297 = vpow2.f32 %v3593_v60 }
 0xe83   :  { %v3589_v43 = vmul.f32 1.442695, %v3562_v21  ;;  %v3605_v37 = vsel %vm1130_vm3, %v7455_v39, 0.0 }
 0xe84   :  { %v3535_v4 = vpop.xlane.xlu0 %3534  ;;  %3606 = vadd.xlane.f32.xlu0 %v3605_v37 }
 0xe85   :  { %6299 = vpow2.f32 %v3589_v43  ;;  %v3561_v9 = vsub.f32 %v7396_v41, %v3535_v4  ;;  %v3550_v49 = vpop.xlane.xlu1 %3549 }
 0xe86   :  { %v7460_v36 = vpop.eup %6287  ;;  %v3566_v47 = vsub.f32 %v7400_v46, %v3550_v49  ;;  %6301 = vpow2.f32 %v3591_v11 }
 0xe87   :  { %v3587_v45 = vmul.f32 1.442695, %v3561_v9  ;;  %v3611_v63 = vsel %vm1130_vm3, %v7460_v36, 0.0  ;;  %v7465_v35 = vpop.eup %6289 }
 0xe88   :  { %v3597_v16 = vmul.f32 1.442695, %v3566_v47  ;;  %v3547_v30 = vpop.xlane.xlu0 %3546  ;;  %3612 = vadd.xlane.f32.xlu1 %v3611_v63  ;;  %v3626_v27 = vsel %vm1130_vm3, %v7465_v35, 0.0 }
 0xe89   :  { %6303 = vpow2.f32 %v3587_v45  ;;  %v3565_v23 = vsub.f32 %v7404_v5, %v3547_v30  ;;  %v7518_v42 = vpop.permute.xlu1 %4203 }
 0xe8a   :  { %v7468_v48 = vpop.eup %6291  ;;  %6305 = vpow2.f32 %v3597_v16 }
 0xe8b   :  { %v7470_v41 = vpop.eup %6293  ;;  %v3595_v34 = vmul.f32 1.442695, %v3565_v23  ;;  %v3620_v46 = vsel %vm1130_vm3, %v7468_v48, 0.0 }
 0xe8c   :  { %3621 = vadd.xlane.f32.xlu0 %v3620_v46  ;;  %3627 = vadd.xlane.f32.xlu1 %v3626_v27  ;;  %v3623_v52 = vsel %vm1130_vm3, %v7470_v41, 0.0  ;;  %v7520_v50 = vpop.permute.xlu0 %4116 }
 0xe8d   :  { %6307 = vpow2.f32 %v3595_v34 }
 0xe8e   :  { %v7476_v20 = vpop.eup %6295 }
 0xe8f   :  { %v3617_v5 = vsel %vm1130_vm3, %v7476_v20, 0.0  ;;  %v7482_v22 = vpop.eup %6297 }
 0xe90   :  { %3618 = vadd.xlane.f32.xlu0 %v3617_v5  ;;  %3624 = vadd.xlane.f32.xlu1 %v3623_v52  ;;  %v3638_v58 = vsel %vm1130_vm3, %v7482_v22, 0.0  ;;  %v7524_v10 = vpop.permute.xlu0 %4114 }
 0xe92   :  { %v7484_v31 = vpop.eup %6299 }
 0xe93   :  { %v3632_v59 = vsel %vm1130_vm3, %v7484_v31, 0.0  ;;  %v7490_v18 = vpop.eup %6301 }
 0xe94   :  { %3633 = vadd.xlane.f32.xlu0 %v3632_v59  ;;  %3639 = vadd.xlane.f32.xlu1 %v3638_v58  ;;  %v3635_v24 = vsel %vm1130_vm3, %v7490_v18, 0.0 }
 0xe96   :  { %v7492_v2 = vpop.eup %6303 }
 0xe97   :  { %v3629_v7 = vsel %vm1130_vm3, %v7492_v2, 0.0  ;;  %v7498_v55 = vpop.eup %6305 }
 0xe98   :  { %3630 = vadd.xlane.f32.xlu0 %v3629_v7  ;;  %3636 = vadd.xlane.f32.xlu1 %v3635_v24  ;;  %v3644_v17 = vsel %vm1130_vm3, %v7498_v55, 0.0 }
 0xe9a   :  { %v7500_v14 = vpop.eup %6307 }
 0xe9b   :  { %v3641_v28 = vsel %vm1130_vm3, %v7500_v14, 0.0 }
 0xe9c   :  { %3642 = vadd.xlane.f32.xlu0 %v3641_v28  ;;  %3645 = vadd.xlane.f32.xlu1 %v3644_v17 }
 0xead   :  { %4288 = vrot.lane.b32.xlu1 %v7222_v26, %s6497_s25  ;;  %v7522_v26 = vpop.permute.xlu1 %4201 }
 0xeb1   :  { %4447 = vrot.lane.b32.xlu1 %v7180_v38, %s6498_s26 }
 0xeb2   :  { %4290 = vrot.lane.b32.xlu0 %v7230_v57, %s6497_s25 }
 0xeb5   :  { %4445 = vrot.lane.b32.xlu1 %v7187_v40, %s6498_s26 }
 0xeb6   :  { %4449 = vrot.lane.b32.xlu0 %v7175_v13, %s6498_s26 }
 0xeba   :  { %4443 = vrot.lane.b32.xlu0 %v7194_v19, %s6498_s26 }
 0xef0   :  { %v3604_v38 = vpop.xlane.xlu1 %3603 }
 0xef1   :  { %6309 = vrcp.f32 %v3604_v38 }
 0xef2   :  { %v3601_v57 = vpop.xlane.xlu0 %3600 }
 0xef3   :  { %6311 = vrcp.f32 %v3601_v57 }
 0xef8   :  { %v3616_v53 = vpop.xlane.xlu1 %3615 }
 0xefe   :  { %v6310_v60 = vpop.eup %6309 }
 0xeff   :  { %v3650_v13 = vmul.f32 %v6310_v60, %v7429_v51 }
 0xf00   :  { %v6312_v40 = vpop.eup %6311 }
 0xf01   :  { %v3648_v62 = vmul.f32 %v6312_v40, %v7433_v56 }
 0xf03   :  { %6020 = vmatprep.mubr.msk.f32.mxu1 %vm1130_vm3, %v3648_v62 }
 0xf04   :  { %6021 = vmatmul.mubr.msk.f32.vlgmr.msra.gmra.mxu1 %vm1130_vm3, %v3650_v13 }
 0xf05   :  { %6024 = vmatpush3.msra.mxu1 %v7340_v8 }
 0xf06   :  { %6025 = vmatprep.subr.mxu1 %v7420_v54 }
 0xf07   :  { %6026 = vmatpush3.msra.mxu1 %v7420_v54 }
 0xf08   :  { %6037 = vmatprep.subr.mxu1 %v7418_v32 }
 0xf09   :  { %v3610_v19 = vpop.xlane.xlu0 %3609 }
 0xf0a   :  { %6313 = vrcp.f32 %v3610_v19 }
 0xf0d   :  { %v3607_v33 = vpop.xlane.xlu0 %3606 }
 0xf0e   :  { %6315 = vrcp.f32 %v3607_v33 }
 0xf0f   :  { %6317 = vrcp.f32 %v3616_v53 }
 0xf11   :  { %v3613_v56 = vpop.xlane.xlu1 %3612 }
 0xf12   :  { %6319 = vrcp.f32 %v3613_v56 }
 0xf15   :  { %v3622_v51 = vpop.xlane.xlu0 %3621  ;;  %v3628_v0 = vpop.xlane.xlu1 %3627 }
 0xf16   :  { %6321 = vrcp.f32 %v3622_v51 }
 0xf17   :  { %6323 = vrcp.f32 %v3628_v0  ;;  %v6314_v11 = vpop.eup %6313 }
 0xf18   :  { %v3654_v9 = vmul.f32 %v6314_v11, %v7449_v44 }
 0xf19   :  { %v3619_v21 = vpop.xlane.xlu0 %3618  ;;  %v3625_v8 = vpop.xlane.xlu1 %3624 }
 0xf1a   :  { %6325 = vrcp.f32 %v3619_v21 }
 0xf1b   :  { %v6316_v43 = vpop.eup %6315  ;;  %6327 = vrcp.f32 %v3625_v8 }
 0xf1c   :  { %v3652_v54 = vmul.f32 %v6316_v43, %v7455_v39  ;;  %v6318_v49 = vpop.eup %6317 }
 0xf1d   :  { %v3634_v37 = vpop.xlane.xlu0 %3633  ;;  %v3640_v4 = vpop.xlane.xlu1 %3639  ;;  %v3658_v16 = vmul.f32 %v6318_v49, %v7438_v6 }
 0xf1e   :  { %6027 = vmatprep.mubr.msk.f32.mxu1 %vm1130_vm3, %v3652_v54  ;;  %6329 = vrcp.f32 %v3634_v37 }
 0xf1f   :  { %v6320_v47 = vpop.eup %6319  ;;  %6028 = vmatmul.mubr.msk.f32.vlgmr.msra.gmra.mxu1 %vm1130_vm3, %v3654_v9  ;;  %6331 = vrcp.f32 %v3640_v4 }
 0xf20   :  { %6038 = vmatpush3.msra.mxu1 %v7418_v32  ;;  %v3656_v45 = vmul.f32 %v6320_v47, %v7460_v36 }
 0xf21   :  { %6039 = vmatprep.subr.mxu1 %v7424_v15  ;;  %v3631_v63 = vpop.xlane.xlu0 %3630  ;;  %v3637_v39 = vpop.xlane.xlu1 %3636 }
 0xf22   :  { %6333 = vrcp.f32 %v3631_v63  ;;  %6040 = vmatpush3.msra.mxu1 %v7424_v15  ;;  %6034 = vmatprep.mubr.msk.f32.mxu0 %vm1130_vm3, %v3656_v45 }
 0xf23   :  { %6335 = vrcp.f32 %v3637_v39  ;;  %6051 = vmatprep.subr.mxu1 %v7520_v50  ;;  %6035 = vmatmul.mubr.msk.f32.vlgmr.msra.gmra.mxu0 %vm1130_vm3, %v3658_v16  ;;  %v6322_v32 = vpop.eup %6321 }
 0xf24   :  { %6045 = vmatpush3.msra.mxu0 %v7343_v12  ;;  %v6324_v30 = vpop.eup %6323  ;;  %v3662_v12 = vmul.f32 %v6322_v32, %v7468_v48 }
 0xf25   :  { %6046 = vmatprep.subr.mxu0 %v7422_v3  ;;  %v3643_v44 = vpop.xlane.xlu0 %3642  ;;  %v3646_v36 = vpop.xlane.xlu1 %3645  ;;  %v3666_v46 = vmul.f32 %v6324_v30, %v7465_v35 }
 0xf26   :  { %6337 = vrcp.f32 %v3643_v44  ;;  %6047 = vmatpush3.msra.mxu0 %v7422_v3 }
 0xf27   :  { %v6326_v6 = vpop.eup %6325  ;;  %6339 = vrcp.f32 %v3646_v36  ;;  %6058 = vmatprep.subr.mxu0 %v7518_v42 }
 0xf28   :  { %v6328_v15 = vpop.eup %6327  ;;  %v3660_v23 = vmul.f32 %v6326_v6, %v7476_v20 }
 0xf29   :  { %v3664_v34 = vmul.f32 %v6328_v15, %v7470_v41  ;;  %v4291_v27 = vpop.permute.xlu0 %4290  ;;  %v4289_v24 = vpop.permute.xlu1 %4288 }
 0xf2a   :  { %6041 = vmatprep.mubr.msk.f32.mxu1 %vm1130_vm3, %v3660_v23 }
 0xf2b   :  { %6048 = vmatprep.mubr.msk.f32.mxu0 %vm1130_vm3, %v3664_v34  ;;  %6042 = vmatmul.mubr.msk.f32.vlgmr.msra.gmra.mxu1 %vm1130_vm3, %v3662_v12  ;;  %v6330_v3 = vpop.eup %6329  ;;  %v5502_v12 = vld [vmem:[#allocation5 + $0xb] ss:$0 sm:$0xff] }
 0xf2c   :  { %6049 = vmatmul.mubr.msk.f32.vlgmr.msra.gmra.mxu0 %vm1130_vm3, %v3666_v46  ;;  %6052 = vmatpush3.msra.mxu1 %v7520_v50  ;;  %v6332_v41 = vpop.eup %6331  ;;  %v3670_v52 = vmul.f32 %v6330_v3, %v7484_v31 }
 0xf2d   :  { %6059 = vmatpush3.msra.mxu0 %v7518_v42  ;;  %6053 = vmatprep.subr.mxu1 %v7524_v10  ;;  %v3674_v59 = vmul.f32 %v6332_v41, %v7482_v22  ;;  %v4450_v22 = vpop.permute.xlu0 %4449  ;;  %v4448_v31 = vpop.permute.xlu1 %4447 }
 0xf2e   :  { %6060 = vmatprep.subr.mxu0 %v7522_v26  ;;  %6054 = vmatpush3.msra.mxu1 %v7524_v10 }
 0xf2f   :  { %v6334_v35 = vpop.eup %6333  ;;  %6061 = vmatpush3.msra.mxu0 %v7522_v26  ;;  %6065 = vmatprep.subr.mxu1 %v4291_v27 }
 0xf30   :  { %v6336_v48 = vpop.eup %6335  ;;  %v3668_v20 = vmul.f32 %v6334_v35, %v7492_v2  ;;  %6072 = vmatprep.subr.mxu0 %v4450_v22 }
 0xf31   :  { %v3672_v5 = vmul.f32 %v6336_v48, %v7490_v18  ;;  %v4446_v28 = vpop.permute.xlu1 %4445  ;;  %v4444_v17 = vpop.permute.xlu0 %4443 }
 0xf32   :  { %6055 = vmatprep.mubr.msk.f32.mxu1 %vm1130_vm3, %v3668_v20 }
 0xf33   :  { %v6338_v58 = vpop.eup %6337  ;;  %6062 = vmatprep.mubr.msk.f32.mxu0 %vm1130_vm3, %v3672_v5  ;;  %6056 = vmatmul.mubr.msk.f32.vlgmr.msra.gmra.mxu1 %vm1130_vm3, %v3670_v52 }
 0xf34   :  { %v6340_v7 = vpop.eup %6339  ;;  %6063 = vmatmul.mubr.msk.f32.vlgmr.msra.gmra.mxu0 %vm1130_vm3, %v3674_v59  ;;  %6066 = vmatpush3.msra.mxu1 %v4291_v27  ;;  %v3676_v2 = vmul.f32 %v6338_v58, %v7500_v14 }
 0xf35   :  { %6067 = vmatprep.subr.mxu1 %v4289_v24  ;;  %v3678_v18 = vmul.f32 %v6340_v7, %v7498_v55  ;;  %6073 = vmatpush3.msra.mxu0 %v4450_v22 }
 0xf36   :  { %6068 = vmatpush3.msra.mxu1 %v4289_v24  ;;  %6069 = vmatprep.mubr.msk.f32.mxu1 %vm1130_vm3, %v3676_v2 }
 0xf37   :  { %6070 = vmatmul.mubr.msk.f32.vlgmr.msra.gmra.mxu1 %vm1130_vm3, %v3678_v18  ;;  %6074 = vmatprep.subr.mxu0 %v4448_v31 }
 0xf38   :  { %6075 = vmatpush3.msra.mxu0 %v4448_v31 }
 0xf39   :  { %6076 = vmatprep.subr.mxu0 %v4446_v28 }
 0xf3a   :  { %6077 = vmatpush3.msra.mxu0 %v4446_v28 }
 0xf3b   :  { %6078 = vmatprep.subr.mxu0 %v4444_v17 }
 0xf3c   :  { %6079 = vmatpush3.msra.mxu0 %v4444_v17 }
 0xfc4   :  { %v6022_v14 = vpop.f32.mrf.mxu1 }
 0xfc6   :  { %v3757_v42 = vpop.f32.mrf.mxu1 }
 0xfdf   :  { %v6029_v50 = vpop.f32.mrf.mxu1 }
 0xfe1   :  { %v3844_v10 = vpop.f32.mrf.mxu1 }
 0xfe3   :  { %v6036_v55 = vpop.f32.mrf.mxu0 }
 0xfe4   :  { %4381 = vrot.lane.b32.xlu0 %v6036_v55, %s6482_s11 }
 0xfe5   :  { %v3931_v26 = vpop.f32.mrf.mxu0 }
 0xfe8   :  { %4379 = vrot.lane.b32.xlu0 %v3931_v26, %s6482_s11 }
 0xfeb   :  { %v6043_v38 = vpop.f32.mrf.mxu1 }
 0xfec   :  { %v6050_v57 = vpop.f32.mrf.mxu0  ;;  %4385 = vrot.lane.b32.xlu1 %v6043_v38, %s6482_s11 }
 0xfed   :  { %v4018_v60 = vpop.f32.mrf.mxu1 }
 0xfee   :  { %4383 = vrot.lane.b32.xlu0 %v4018_v60, %s6482_s11  ;;  %v4105_v40 = vpop.f32.mrf.mxu0 }
 0xff0   :  { %4395 = vrot.lane.b32.xlu1 %v4105_v40, %s6499_s27 }
 0xff2   :  { %4397 = vrot.lane.b32.xlu0 %v6050_v57, %s6499_s27 }
 0xff3   :  { %v6057_v62 = vpop.f32.mrf.mxu1 }
 0xff4   :  { %v6064_v13 = vpop.f32.mrf.mxu0 }
 0xff5   :  { %4413 = vrot.lane.b32.xlu1 %v6064_v13, %s6500_s28  ;;  %v4192_v19 = vpop.f32.mrf.mxu1 }
 0xff6   :  { %4399 = vrot.lane.b32.xlu0 %v4192_v19, %s6499_s27  ;;  %v4279_v33 = vpop.f32.mrf.mxu0 }
 0xff7   :  { %v6071_v53 = vpop.f32.mrf.mxu1 }
 0xff9   :  { %4411 = vrot.lane.b32.xlu1 %v4279_v33, %s6500_s28  ;;  %v4366_v56 = vpop.f32.mrf.mxu1  ;;  %v5445_v33 = vld [vmem:[%s7808_s5 + $0x68] sm:$0xff] }
 0xffa   :  { %4415 = vrot.lane.b32.xlu0 %v4366_v56, %s6500_s28  ;;  %v5444_v56 = vld [vmem:[%s7808_s5 + $0x58] sm:$0xff] }
 0xffd   :  { %4401 = vrot.lane.b32.xlu1 %v6057_v62, %s6499_s27 }
0x1001   :  { %4417 = vrot.lane.b32.xlu1 %v6071_v53, %s6500_s28  ;;  %v5446_v53 = vld [vmem:[%s7808_s5 + $0x78] sm:$0xff] }
0x1002   :  { %6086 = vmatprep.subr.mxu1 %v5446_v53 }
0x1003   :  { %6087 = vmatpush3.msra.mxu1 %v5446_v53 }
0x1004   :  { %6088 = vmatprep.subr.mxu1 %v5445_v33 }
0x1005   :  { %6089 = vmatpush3.msra.mxu1 %v5445_v33 }
0x1006   :  { %6090 = vmatprep.subr.mxu1 %v5444_v56 }
0x1007   :  { %6091 = vmatpush3.msra.mxu1 %v5444_v56 }
0x1056   :  { %v4382_v51 = vpop.permute.xlu0 %4381 }
0x1057   :  { %v4424_v4 = vsel %vm395_vm2, %v6022_v14, %v4382_v51  ;;  %v6389_v51 = vld [vmem:[%s7805_s2 + $0x28] sm:$0xff] }
0x105a   :  { %v4380_v0 = vpop.permute.xlu0 %4379 }
0x105b   :  { %v4423_v9 = vsel %vm395_vm2, %v3757_v42, %v4380_v0  ;;  %v6390_v0 = vld [vmem:[%s7805_s2 + $0x38] sm:$0xff] }
0x105e   :  { %v4386_v21 = vpop.permute.xlu1 %4385 }
0x105f   :  { %v4426_v6 = vsel %vm395_vm2, %v6029_v50, %v4386_v21  ;;  %v5443_v21 = vld [vmem:[%s7808_s5 + $0x48] sm:$0xff] }
0x1060   :  { %v4384_v8 = vpop.permute.xlu0 %4383  ;;  %6092 = vmatprep.subr.mxu1 %v5443_v21 }
0x1061   :  { %v4425_v47 = vsel %vm395_vm2, %v3844_v10, %v4384_v8  ;;  %v6391_v8 = vld [vmem:[%s7805_s2 + $0x18] sm:$0xff]  ;;  %6093 = vmatpush3.msra.mxu1 %v5443_v21 }
0x1062   :  { %v4396_v11 = vpop.permute.xlu1 %4395 }
0x1063   :  { %v4427_v45 = vsel %vm1130_vm3, %v4423_v9, %v4396_v11  ;;  %v6392_v11 = vld [vmem:[%s7805_s2 + $0x8] sm:$0xff] }
0x1064   :  { %v4398_v43 = vpop.permute.xlu0 %4397 }
0x1065   :  { %v4428_v49 = vsel %vm1130_vm3, %v4424_v4, %v4398_v43 }
0x1067   :  { %v4414_v54 = vpop.permute.xlu1 %4413 }
0x1068   :  { %v4400_v37 = vpop.permute.xlu0 %4399  ;;  %v4432_v44 = vsel %vm2059_vm4, %v4428_v49, %v4414_v54 }
0x1069   :  { %v4429_v39 = vsel %vm1130_vm3, %v4425_v47, %v4400_v37 }
0x106b   :  { %v4412_v63 = vpop.permute.xlu1 %4411 }
0x106c   :  { %v4431_v16 = vsel %vm2059_vm4, %v4427_v45, %v4412_v63  ;;  %v4416_v32 = vpop.permute.xlu0 %4415 }
0x106d   :  { %v4433_v36 = vsel %vm2059_vm4, %v4429_v39, %v4416_v32  ;;  %6080 = vmatprep.mubr.msk.f32.mxu0 %vm88_vm1, %v4431_v16 }
0x106e   :  { %6081 = vmatmul.mubr.msk.f32.vlgmr.msra.gmra.mxu0 %vm88_vm1, %v4432_v44 }
0x106f   :  { %6083 = vmatprep.mubr.msk.f32.mxu0 %vm88_vm1, %v4433_v36  ;;  %v4402_v30 = vpop.permute.xlu1 %4401 }
0x1070   :  { %v4430_v15 = vsel %vm1130_vm3, %v4426_v6, %v4402_v30  ;;  %v5507_v30 = vld [vmem:[#allocation5 + $0xc] ss:$0 sm:$0xff] }
0x1073   :  { %v4418_v23 = vpop.permute.xlu1 %4417 }
0x1074   :  { %v4434_v34 = vsel %vm2059_vm4, %v4430_v15, %v4418_v23 }
0x1075   :  { %6084 = vmatmul.mubr.msk.f32.gmra.mxu0 %vm88_vm1, %v4434_v34  ;;  %v5508_v34 = vld [vmem:[#allocation5 + $0xd] ss:$0 sm:$0xff] }
0x112e   :  { %v6082_v46 = vpop.f32.mrf.mxu0 }
0x112f   :  { %v4539_v3 = vadd.f32 %v6082_v46, %v5502_v12 }
0x1130   :  { %v4533_v41 = vpop.f32.mrf.mxu0 }
0x1131   :  { %v7605_v27 = vadd.f32 %v4539_v3, %v7145_v25  ;;  %v4534_v35 = vadd.f32 %v5502_v12, %v4533_v41 }
0x1133   :  { %v7608_v48 = vadd.f32 %v4534_v35, %v7148_v61  ;;  %v4559_v20 = vsel %vm88_vm1, %v7605_v27, 0.0 }
0x1134   :  { %4560 = vadd.xlane.f32.xlu1 %v4559_v20 }
0x1135   :  { %v6085_v5 = vpop.f32.mrf.mxu0  ;;  %v4556_v52 = vsel %vm88_vm1, %v7608_v48, 0.0 }
0x1136   :  { %4557 = vadd.xlane.f32.xlu0 %v4556_v52  ;;  %v4549_v58 = vadd.f32 %v6085_v5, %v5502_v12 }
0x1137   :  { %v4543_v59 = vpop.f32.mrf.mxu0 }
0x1138   :  { %v4544_v7 = vadd.f32 %v5502_v12, %v4543_v59  ;;  %v7618_v25 = vadd.f32 %v4549_v58, %v7155_v1 }
0x113a   :  { %v7615_v24 = vadd.f32 %v4544_v7, %v7158_v29  ;;  %v4565_v2 = vsel %vm88_vm1, %v7618_v25, 0.0 }
0x113c   :  { %v4562_v61 = vsel %vm88_vm1, %v7615_v24, 0.0 }
0x113d   :  { %4563 = vadd.xlane.f32.xlu0 %v4562_v61  ;;  %v5521_v61 = vld [vmem:[%s7809_s6 + $0x78] sm:$0xff] }
0x113e   :  { %6100 = vmatprep.subr.mxu0 %v5521_v61 }
0x113f   :  { %6101 = vmatpush3.msra.mxu0 %v5521_v61 }
0x1141   :  { %4566 = vadd.xlane.f32.xlu0 %v4565_v2  ;;  %v5520_v2 = vld [vmem:[%s7809_s6 + $0x70] sm:$0xff] }
0x1142   :  { %6102 = vmatprep.subr.mxu0 %v5520_v2 }
0x1143   :  { %6103 = vmatpush3.msra.mxu0 %v5520_v2 }
0x11bd   :  { %v4561_v18 = vpop.xlane.xlu1 %4560 }
0x11be   :  { %v4569_v22 = vmul.f32 0.03125, %v4561_v18  ;;  %v5519_v18 = vld [vmem:[%s7809_s6 + $0x68] sm:$0xff] }
0x11bf   :  { %v4558_v31 = vpop.xlane.xlu0 %4557  ;;  %6104 = vmatprep.subr.mxu0 %v5519_v18 }
0x11c0   :  { %v4573_v28 = vsub.f32 %v7605_v27, %v4569_v22  ;;  %v4568_v17 = vmul.f32 0.03125, %v4558_v31  ;;  %6105 = vmatpush3.msra.mxu0 %v5519_v18  ;;  %v5518_v22 = vld [vmem:[%s7809_s6 + $0x60] sm:$0xff]  ;;  %v5517_v31 = vld [vmem:[%s7809_s6 + $0x58] sm:$0xff] }
0x11c1   :  { %6106 = vmatprep.subr.mxu0 %v5518_v22 }
0x11c2   :  { %v4572_v29 = vsub.f32 %v7608_v48, %v4568_v17  ;;  %v4577_v14 = vmul.f32 %v4573_v28, %v4573_v28  ;;  %6107 = vmatpush3.msra.mxu0 %v5518_v22  ;;  %v5515_v17 = vld [vmem:[%s7809_s6 + $0x48] sm:$0xff] }
0x11c3   :  { %6108 = vmatprep.subr.mxu0 %v5517_v31 }
0x11c4   :  { %v4583_v1 = vsel %vm88_vm1, %v4577_v14, 0.0  ;;  %v4576_v42 = vmul.f32 %v4572_v29, %v4572_v29  ;;  %6109 = vmatpush3.msra.mxu0 %v5517_v31 }
0x11c5   :  { %4584 = vadd.xlane.f32.xlu1 %v4583_v1 }
0x11c6   :  { %v4564_v55 = vpop.xlane.xlu0 %4563  ;;  %v4580_v50 = vsel %vm88_vm1, %v4576_v42, 0.0  ;;  %v5509_v42 = vld [vmem:[#allocation5 + $0xe] ss:$0 sm:$0xff] }
0x11c7   :  { %v4570_v26 = vmul.f32 0.03125, %v4564_v55  ;;  %4581 = vadd.xlane.f32.xlu0 %v4580_v50 }
0x11c9   :  { %v4574_v10 = vsub.f32 %v7615_v24, %v4570_v26 }
0x11ca   :  { %v4567_v38 = vpop.xlane.xlu0 %4566 }
0x11cb   :  { %v4571_v57 = vmul.f32 0.03125, %v4567_v38  ;;  %v4578_v60 = vmul.f32 %v4574_v10, %v4574_v10 }
0x11cd   :  { %v4575_v40 = vsub.f32 %v7618_v25, %v4571_v57  ;;  %v4586_v62 = vsel %vm88_vm1, %v4578_v60, 0.0 }
0x11ce   :  { %4587 = vadd.xlane.f32.xlu0 %v4586_v62 }
0x11cf   :  { %v4579_v13 = vmul.f32 %v4575_v40, %v4575_v40 }
0x11d1   :  { %v4589_v19 = vsel %vm88_vm1, %v4579_v13, 0.0 }
0x11d2   :  { %4590 = vadd.xlane.f32.xlu1 %v4589_v19 }
0x11e3   :  { %4959 = vrot.lane.b32.xlu1 %v6389_v51, %s6488_s19 }
0x11e4   :  { %4961 = vrot.lane.b32.xlu0 %v6390_v0, %s6488_s19 }
0x11e7   :  { %4957 = vrot.lane.b32.xlu1 %v6391_v8, %s6488_s19 }
0x11eb   :  { %4955 = vrot.lane.b32.xlu1 %v6392_v11, %s6488_s19 }
0x124e   :  { %v4585_v43 = vpop.xlane.xlu1 %4584 }
0x124f   :  { %v4593_v54 = vmul.f32 0.03125, %v4585_v43 }
0x1250   :  { %v4582_v37 = vpop.xlane.xlu0 %4581 }
0x1251   :  { %v4597_v4 = vadd.f32 1e-05, %v4593_v54  ;;  %v4592_v9 = vmul.f32 0.03125, %v4582_v37 }
0x1253   :  { %6341 = vrsqrt.f32 %v4597_v4  ;;  %v4596_v49 = vadd.f32 1e-05, %v4592_v9 }
0x1255   :  { %6343 = vrsqrt.f32 %v4596_v49 }
0x1257   :  { %v4588_v47 = vpop.xlane.xlu0 %4587 }
0x1258   :  { %v4594_v45 = vmul.f32 0.03125, %v4588_v47 }
0x125a   :  { %v4598_v63 = vadd.f32 1e-05, %v4594_v45 }
0x125b   :  { %v4591_v39 = vpop.xlane.xlu1 %4590  ;;  %v4962_v14 = vpop.permute.xlu0 %4961 }
0x125c   :  { %6345 = vrsqrt.f32 %v4598_v63  ;;  %v4595_v16 = vmul.f32 0.03125, %v4591_v39  ;;  %6122 = vmatprep.subr.mxu1 %v4962_v14 }
0x125e   :  { %v4599_v32 = vadd.f32 1e-05, %v4595_v16 }
0x125f   :  { %v4960_v1 = vpop.permute.xlu1 %4959 }
0x1260   :  { %v6342_v44 = vpop.eup %6341  ;;  %6347 = vrsqrt.f32 %v4599_v32 }
0x1261   :  { %v4605_v36 = vmul.f32 %v6342_v44, %v4573_v28  ;;  %v5516_v28 = vld [vmem:[%s7809_s6 + $0x50] sm:$0xff] }
0x1262   :  { %v6344_v6 = vpop.eup %6343  ;;  %6110 = vmatprep.subr.mxu0 %v5516_v28 }
0x1263   :  { %v4604_v15 = vmul.f32 %v6344_v6, %v4572_v29  ;;  %v4613_v23 = vmul.f32 %v5507_v30, %v4605_v36  ;;  %6111 = vmatpush3.msra.mxu0 %v5516_v28  ;;  %v5514_v29 = vld [vmem:[%s7809_s6 + $0x40] sm:$0xff] }
0x1264   :  { %6112 = vmatprep.subr.mxu0 %v5515_v17 }
0x1265   :  { %v4612_v12 = vmul.f32 %v5507_v30, %v4604_v15  ;;  %v4621_v3 = vadd.f32 %v5508_v34, %v4613_v23  ;;  %6113 = vmatpush3.msra.mxu0 %v5515_v17 }
0x1266   :  { %6114 = vmatprep.subr.mxu0 %v5514_v29 }
0x1267   :  { %v4620_v46 = vadd.f32 %v5508_v34, %v4612_v12  ;;  %6115 = vmatpush3.msra.mxu0 %v5514_v29 }
0x1269   :  { %v6346_v41 = vpop.eup %6345  ;;  %6094 = vmatprep.mubr.msk.f32.mxu1 %vm88_vm1, %v4620_v46 }
0x126a   :  { %6095 = vmatmul.mubr.msk.f32.vlgmr.msra.gmra.mxu1 %vm88_vm1, %v4621_v3  ;;  %v4606_v35 = vmul.f32 %v6346_v41, %v4574_v10 }
0x126b   :  { %6123 = vmatpush3.msra.mxu1 %v4962_v14 }
0x126c   :  { %v4614_v20 = vmul.f32 %v5507_v30, %v4606_v35  ;;  %6124 = vmatprep.subr.mxu1 %v4960_v1 }
0x126d   :  { %v6348_v5 = vpop.eup %6347  ;;  %6125 = vmatpush3.msra.mxu1 %v4960_v1 }
0x126e   :  { %v4622_v52 = vadd.f32 %v5508_v34, %v4614_v20  ;;  %v4607_v59 = vmul.f32 %v6348_v5, %v4575_v40 }
0x1270   :  { %6097 = vmatprep.mubr.msk.f32.mxu1 %vm88_vm1, %v4622_v52  ;;  %v4615_v58 = vmul.f32 %v5507_v30, %v4607_v59 }
0x1272   :  { %v4623_v7 = vadd.f32 %v5508_v34, %v4615_v58 }
0x1274   :  { %6098 = vmatmul.mubr.msk.f32.gmra.mxu1 %vm88_vm1, %v4623_v7 }
0x132a   :  { %v6096_v55 = vpop.f32.mrf.mxu1 }
0x132b   :  { %v7688_v50 = vadd.f32 %v6096_v55, %v5509_v42 }
0x132c   :  { %v4706_v26 = vpop.f32.mrf.mxu1 }
0x132d   :  { %v7691_v10 = vmul.f32 0.70710677, %v7688_v50  ;;  %v7693_v38 = vadd.f32 %v5509_v42, %v4706_v26 }
0x132f   :  { %v4734_v57 = vand.u32 2147483647, %v7691_v10  ;;  %v7697_v60 = vmul.f32 0.70710677, %v7693_v38  ;;  %vm4814_vm10 = vcmp.ge.f32.partialorder %v7691_v10, 0.0  ;;  %v4726_v10 = vmul.f32 0.5, %v7688_v50 }
0x1331   :  { %v4738_v40 = vmul.f32 0.3275911, %v4734_v57  ;;  %v4733_v62 = vand.u32 2147483647, %v7697_v60  ;;  %v4790_v43 = vsub.f32 0.0, %v4734_v57  ;;  %vm4813_vm11 = vcmp.ge.f32.partialorder %v7697_v60, 0.0 }
0x1333   :  { %v4742_v13 = vadd.f32 1.0, %v4738_v40  ;;  %v4737_v19 = vmul.f32 0.3275911, %v4733_v62  ;;  %v4789_v9 = vsub.f32 0.0, %v4733_v62  ;;  %v4794_v47 = vmul.f32 %v4790_v43, %v4734_v57 }
0x1334   :  { %v6099_v53 = vpop.f32.mrf.mxu1 }
0x1335   :  { %6349 = vrcp.f32 %v4742_v13  ;;  %v4741_v33 = vadd.f32 1.0, %v4737_v19  ;;  %v7700_v56 = vadd.f32 %v6099_v53, %v5509_v42  ;;  %v4793_v39 = vmul.f32 %v4789_v9, %v4733_v62 }
0x1336   :  { %v4716_v51 = vpop.f32.mrf.mxu1  ;;  %v4799_v32 = vmul.f32 1.442695, %v4794_v47 }
0x1337   :  { %v7702_v0 = vadd.f32 %v5509_v42, %v4716_v51  ;;  %6351 = vrcp.f32 %v4741_v33  ;;  %v7705_v21 = vmul.f32 0.70710677, %v7700_v56  ;;  %v4797_v6 = vmul.f32 1.442695, %v4793_v39 }
0x1339   :  { %v7708_v8 = vmul.f32 0.70710677, %v7702_v0  ;;  %v4736_v11 = vand.u32 2147483647, %v7705_v21  ;;  %vm4816_vm12 = vcmp.ge.f32.partialorder %v7705_v21, 0.0  ;;  %v4727_v50 = vmul.f32 0.5, %v7702_v0 }
0x133b   :  { %v4735_v54 = vand.u32 2147483647, %v7708_v8  ;;  %v4740_v37 = vmul.f32 0.3275911, %v4736_v11  ;;  %v4792_v15 = vsub.f32 0.0, %v4736_v11  ;;  %vm4815_vm13 = vcmp.ge.f32.partialorder %v7708_v8, 0.0 }
0x133c   :  { %v5522_v8 = vld [vmem:[#allocation5 + $0xf] ss:$0 sm:$0xff] }
0x133d   :  { %v4739_v4 = vmul.f32 0.3275911, %v4735_v54  ;;  %v4744_v49 = vadd.f32 1.0, %v4740_v37  ;;  %v4791_v34 = vsub.f32 0.0, %v4735_v54  ;;  %v4796_v41 = vmul.f32 %v4792_v15, %v4736_v11 }
0x133e   :  { %v4725_v15 = vmul.f32 0.5, %v7693_v38 }
0x133f   :  { %v4743_v45 = vadd.f32 1.0, %v4739_v4  ;;  %6353 = vrcp.f32 %v4744_v49  ;;  %v4795_v20 = vmul.f32 %v4791_v34, %v4735_v54  ;;  %v4803_v2 = vmul.f32 1.442695, %v4796_v41 }
0x1341   :  { %6355 = vrcp.f32 %v4743_v45  ;;  %v4801_v31 = vmul.f32 1.442695, %v4795_v20 }
0x1342   :  { %v6350_v63 = vpop.eup %6349  ;;  %6357 = vpow2.f32 %v4799_v32 }
0x1343   :  { %v4754_v16 = vmul.f32 1.0614054, %v6350_v63  ;;  %6359 = vpow2.f32 %v4797_v6 }
0x1344   :  { %v6352_v44 = vpop.eup %6351  ;;  %6361 = vpow2.f32 %v4803_v2 }
0x1345   :  { %v4758_v36 = vadd.f32 -1.4531521, %v4754_v16  ;;  %v4753_v30 = vmul.f32 1.0614054, %v6352_v44  ;;  %6363 = vpow2.f32 %v4801_v31 }
0x1347   :  { %v4762_v23 = vmul.f32 %v6350_v63, %v4758_v36  ;;  %v4757_v12 = vadd.f32 -1.4531521, %v4753_v30 }
0x1349   :  { %v4766_v46 = vadd.f32 1.4214138, %v4762_v23  ;;  %v4761_v3 = vmul.f32 %v6352_v44, %v4757_v12 }
0x134b   :  { %v4770_v35 = vmul.f32 %v6350_v63, %v4766_v46  ;;  %v4765_v5 = vadd.f32 1.4214138, %v4761_v3 }
0x134c   :  { %v6354_v52 = vpop.eup %6353 }
0x134d   :  { %v4774_v59 = vadd.f32 -0.28449672, %v4770_v35  ;;  %v4769_v7 = vmul.f32 %v6352_v44, %v4765_v5  ;;  %v4756_v61 = vmul.f32 1.0614054, %v6354_v52 }
0x134e   :  { %v6356_v58 = vpop.eup %6355 }
0x134f   :  { %v4778_v18 = vmul.f32 %v6350_v63, %v4774_v59  ;;  %v4755_v22 = vmul.f32 1.0614054, %v6356_v58  ;;  %v4773_v28 = vadd.f32 -0.28449672, %v4769_v7  ;;  %v4760_v17 = vadd.f32 -1.4531521, %v4756_v61  ;;  %v6358_v57 = vpop.eup %6357 }
0x1350   :  { %v6360_v51 = vpop.eup %6359  ;;  %v4728_v61 = vmul.f32 0.5, %v7700_v56 }
0x1351   :  { %v4782_v29 = vadd.f32 0.2548296, %v4778_v18  ;;  %v4759_v14 = vadd.f32 -1.4531521, %v4755_v22  ;;  %v4777_v1 = vmul.f32 %v6352_v44, %v4773_v28  ;;  %v4764_v42 = vmul.f32 %v6354_v52, %v4760_v17  ;;  %v6362_v6 = vpop.eup %6361  ;;  %v4958_v22 = vpop.permute.xlu1 %4957 }
0x1352   :  { %v6364_v12 = vpop.eup %6363  ;;  %6126 = vmatprep.subr.mxu1 %v4958_v22 }
0x1353   :  { %v4786_v55 = vmul.f32 %v6350_v63, %v4782_v29  ;;  %v4763_v26 = vmul.f32 %v6356_v58, %v4759_v14  ;;  %v4781_v40 = vadd.f32 0.2548296, %v4777_v1  ;;  %v4768_v62 = vadd.f32 1.4214138, %v4764_v42  ;;  %6127 = vmatpush3.msra.mxu1 %v4958_v22 }
0x1355   :  { %v4806_v13 = vmul.f32 %v6358_v57, %v4786_v55  ;;  %v4767_v19 = vadd.f32 1.4214138, %v4763_v26  ;;  %v4785_v53 = vmul.f32 %v6352_v44, %v4781_v40  ;;  %v4772_v33 = vmul.f32 %v6354_v52, %v4768_v62  ;;  %v4956_v21 = vpop.permute.xlu1 %4955 }
0x1356   :  { %6128 = vmatprep.subr.mxu1 %v4956_v21 }
0x1357   :  { %v4810_v11 = vsub.f32 1.0, %v4806_v13  ;;  %v4771_v43 = vmul.f32 %v6356_v58, %v4767_v19  ;;  %v4805_v54 = vmul.f32 %v6360_v51, %v4785_v53  ;;  %v4776_v37 = vadd.f32 -0.28449672, %v4772_v33  ;;  %6129 = vmatpush3.msra.mxu1 %v4956_v21 }
0x1359   :  { %v4818_v4 = vsub.f32 0.0, %v4810_v11  ;;  %v4775_v9 = vadd.f32 -0.28449672, %v4771_v43  ;;  %v4809_v49 = vsub.f32 1.0, %v4805_v54  ;;  %v4780_v47 = vmul.f32 %v6354_v52, %v4776_v37 }
0x135b   :  { %v4822_v45 = vsel %vm4814_vm10, %v4810_v11, %v4818_v4  ;;  %v4779_v63 = vmul.f32 %v6356_v58, %v4775_v9  ;;  %v4817_v39 = vsub.f32 0.0, %v4809_v49  ;;  %v4784_v16 = vadd.f32 0.2548296, %v4780_v47 }
0x135c   :  { %v4826_v44 = vadd.f32 1.0, %v4822_v45 }
0x135d   :  { %v4783_v32 = vadd.f32 0.2548296, %v4779_v63  ;;  %v4821_v36 = vsel %vm4813_vm11, %v4809_v49, %v4817_v39  ;;  %v4788_v30 = vmul.f32 %v6354_v52, %v4784_v16 }
0x135e   :  { %v4825_v23 = vadd.f32 1.0, %v4821_v36  ;;  %v4830_v35 = vmul.f32 %v4826_v44, %v4726_v10 }
0x135f   :  { %v4787_v34 = vmul.f32 %v6356_v58, %v4783_v32  ;;  %v4808_v46 = vmul.f32 %v6362_v6, %v4788_v30 }
0x1360   :  { %v4829_v3 = vmul.f32 %v4825_v23, %v4725_v15 }
0x1361   :  { %v4807_v41 = vmul.f32 %v6364_v12, %v4787_v34  ;;  %v4812_v20 = vsub.f32 1.0, %v4808_v46 }
0x1362   :  { %6116 = vmatprep.mubr.msk.f32.mxu0 %vm2474_vm7, %v4829_v3 }
0x1363   :  { %v4811_v5 = vsub.f32 1.0, %v4807_v41  ;;  %v4820_v60 = vsub.f32 0.0, %v4812_v20  ;;  %6117 = vmatmul.mubr.msk.f32.vlgmr.msra.gmra.mxu0 %vm2474_vm7, %v4830_v35 }
0x1365   :  { %v4819_v52 = vsub.f32 0.0, %v4811_v5  ;;  %v4824_v38 = vsel %vm4816_vm12, %v4812_v20, %v4820_v60 }
0x1366   :  { %v4828_v59 = vadd.f32 1.0, %v4824_v38 }
0x1367   :  { %v4823_v58 = vsel %vm4815_vm13, %v4811_v5, %v4819_v52 }
0x1368   :  { %v4827_v7 = vadd.f32 1.0, %v4823_v58  ;;  %v4832_v18 = vmul.f32 %v4828_v59, %v4728_v61 }
0x136a   :  { %v4831_v2 = vmul.f32 %v4827_v7, %v4727_v50 }
0x136c   :  { %6119 = vmatprep.mubr.msk.f32.mxu0 %vm2474_vm7, %v4831_v2 }
0x136d   :  { %6120 = vmatmul.mubr.msk.f32.gmra.mxu0 %vm2474_vm7, %v4832_v18 }
0x1423   :  { %v6118_v31 = vpop.f32.mrf.mxu0 }
0x1424   :  { %v4930_v28 = vadd.f32 %v6118_v31, %v5522_v8 }
0x1425   :  { %v4924_v17 = vpop.f32.mrf.mxu0 }
0x1426   :  { %v4925_v0 = vadd.f32 %v5522_v8, %v4924_v17  ;;  %v4944_v56 = vadd.f32 %v4930_v28, %v7605_v27  ;;  %v5527_v27 = vld [vmem:[%s7806_s3 + $0x1] ss:$0 sm:$0xff] }
0x1428   :  { %v4943_v29 = vadd.f32 %v4925_v0, %v7608_v48 }
0x142a   :  { %6130 = vmatprep.mubr.msk.f32.mxu1 %vm88_vm1, %v4943_v29 }
0x142b   :  { %6131 = vmatmul.mubr.msk.f32.vlgmr.msra.gmra.mxu1 %vm88_vm1, %v4944_v56 }
0x142d   :  { %v6121_v14 = vpop.f32.mrf.mxu0 }
0x142e   :  { %v4940_v1 = vadd.f32 %v6121_v14, %v5522_v8 }
0x142f   :  { %v4934_v42 = vpop.f32.mrf.mxu0 }
0x1430   :  { %v4935_v55 = vadd.f32 %v5522_v8, %v4934_v42  ;;  %v4946_v57 = vadd.f32 %v4940_v1, %v7618_v25 }
0x1432   :  { %v4945_v26 = vadd.f32 %v4935_v55, %v7615_v24 }
0x1434   :  { %6133 = vmatprep.mubr.msk.f32.mxu1 %vm88_vm1, %v4945_v26 }
0x1435   :  { %6134 = vmatmul.mubr.msk.f32.gmra.mxu1 %vm88_vm1, %v4946_v57 }
0x14eb   :  { %v6132_v48 = vpop.f32.mrf.mxu1 }
0x14ec   :  { %v7735_v40 = vadd.f32 %v6132_v48, %v5527_v27 }
0x14ed   :  { %v5045_v62 = vpop.f32.mrf.mxu1 }
0x14ee   :  { %v7738_v13 = vmul.f32 0.70710677, %v7735_v40  ;;  %v7740_v19 = vadd.f32 %v5527_v27, %v5045_v62 }
0x14f0   :  { %v5073_v24 = vand.u32 2147483647, %v7738_v13  ;;  %v7744_v25 = vmul.f32 0.70710677, %v7740_v19  ;;  %vm5153_vm14 = vcmp.ge.f32.partialorder %v7738_v13, 0.0 }
0x14f2   :  { %v5077_v53 = vmul.f32 0.3275911, %v5073_v24  ;;  %v5072_v33 = vand.u32 2147483647, %v7744_v25  ;;  %v5129_v39 = vsub.f32 0.0, %v5073_v24  ;;  %vm5152_vm15 = vcmp.ge.f32.partialorder %v7744_v25, 0.0 }
0x14f4   :  { %v5081_v51 = vadd.f32 1.0, %v5077_v53  ;;  %v5076_v11 = vmul.f32 0.3275911, %v5072_v33  ;;  %v5128_v36 = vsub.f32 0.0, %v5072_v33  ;;  %v5133_v30 = vmul.f32 %v5129_v39, %v5073_v24 }
0x14f5   :  { %v6135_v43 = vpop.f32.mrf.mxu1 }
0x14f6   :  { %v7747_v54 = vadd.f32 %v6135_v43, %v5527_v27  ;;  %6365 = vrcp.f32 %v5081_v51  ;;  %v5080_v37 = vadd.f32 1.0, %v5076_v11  ;;  %v5132_v23 = vmul.f32 %v5128_v36, %v5072_v33 }
0x14f7   :  { %v5055_v4 = vpop.f32.mrf.mxu1  ;;  %v5138_v34 = vmul.f32 1.442695, %v5133_v30  ;;  %v5065_v30 = vmul.f32 0.5, %v7735_v40 }
0x14f8   :  { %v7750_v9 = vmul.f32 0.70710677, %v7747_v54  ;;  %v7752_v49 = vadd.f32 %v5527_v27, %v5055_v4  ;;  %6367 = vrcp.f32 %v5080_v37  ;;  %v5136_v41 = vmul.f32 1.442695, %v5132_v23 }
0x14fa   :  { %v5075_v47 = vand.u32 2147483647, %v7750_v9  ;;  %v7756_v45 = vmul.f32 0.70710677, %v7752_v49  ;;  %vm5155_vm0 = vcmp.ge.f32.partialorder %v7750_v9, 0.0 }
0x14fc   :  { %v5079_v63 = vmul.f32 0.3275911, %v5075_v47  ;;  %v5074_v16 = vand.u32 2147483647, %v7756_v45  ;;  %v5131_v10 = vsub.f32 0.0, %v5075_v47  ;;  %vm5154_vm2 = vcmp.ge.f32.partialorder %v7756_v45, 0.0 }
0x14fe   :  { %v5083_v32 = vadd.f32 1.0, %v5079_v63  ;;  %v5078_v44 = vmul.f32 0.3275911, %v5074_v16  ;;  %v5130_v20 = vsub.f32 0.0, %v5074_v16  ;;  %v5135_v60 = vmul.f32 %v5131_v10, %v5075_v47 }
0x1500   :  { %6369 = vrcp.f32 %v5083_v32  ;;  %v5082_v6 = vadd.f32 1.0, %v5078_v44  ;;  %v5134_v50 = vmul.f32 %v5130_v20, %v5074_v16  ;;  %v5142_v61 = vmul.f32 1.442695, %v5135_v60 }
0x1502   :  { %6371 = vrcp.f32 %v5082_v6  ;;  %v5140_v28 = vmul.f32 1.442695, %v5134_v50 }
0x1503   :  { %v6366_v15 = vpop.eup %6365  ;;  %6373 = vpow2.f32 %v5138_v34 }
0x1504   :  { %v5093_v12 = vmul.f32 1.0614054, %v6366_v15  ;;  %6375 = vpow2.f32 %v5136_v41  ;;  %v5064_v41 = vmul.f32 0.5, %v7740_v19 }
0x1505   :  { %v6368_v46 = vpop.eup %6367  ;;  %6377 = vpow2.f32 %v5142_v61 }
0x1506   :  { %v5097_v3 = vadd.f32 -1.4531521, %v5093_v12  ;;  %v5092_v35 = vmul.f32 1.0614054, %v6368_v46  ;;  %6379 = vpow2.f32 %v5140_v28 }
0x1508   :  { %v5101_v5 = vmul.f32 %v6366_v15, %v5097_v3  ;;  %v5096_v52 = vadd.f32 -1.4531521, %v5092_v35 }
0x150a   :  { %v5105_v38 = vadd.f32 1.4214138, %v5101_v5  ;;  %v5100_v59 = vmul.f32 %v6368_v46, %v5096_v52 }
0x150c   :  { %v5109_v7 = vmul.f32 %v6366_v15, %v5105_v38  ;;  %v5104_v2 = vadd.f32 1.4214138, %v5100_v59 }
0x150d   :  { %v6370_v58 = vpop.eup %6369 }
0x150e   :  { %v5095_v18 = vmul.f32 1.0614054, %v6370_v58  ;;  %v5113_v22 = vadd.f32 -0.28449672, %v5109_v7  ;;  %v5108_v8 = vmul.f32 %v6368_v46, %v5104_v2  ;;  %v5066_v7 = vmul.f32 0.5, %v7752_v49 }
0x150f   :  { %v6372_v21 = vpop.eup %6371 }
0x1510   :  { %v5099_v31 = vadd.f32 -1.4531521, %v5095_v18  ;;  %v5117_v17 = vmul.f32 %v6366_v15, %v5113_v22  ;;  %v5094_v0 = vmul.f32 1.0614054, %v6372_v21  ;;  %v5112_v29 = vadd.f32 -0.28449672, %v5108_v8  ;;  %v6374_v27 = vpop.eup %6373 }
0x1511   :  { %v6376_v11 = vpop.eup %6375  ;;  %v5067_v18 = vmul.f32 0.5, %v7747_v54 }
0x1512   :  { %v5103_v56 = vmul.f32 %v6370_v58, %v5099_v31  ;;  %v5121_v14 = vadd.f32 0.2548296, %v5117_v17  ;;  %v5098_v1 = vadd.f32 -1.4531521, %v5094_v0  ;;  %v5116_v42 = vmul.f32 %v6368_v46, %v5112_v29  ;;  %v6378_v34 = vpop.eup %6377 }
0x1513   :  { %v6380_v20 = vpop.eup %6379 }
0x1514   :  { %v5107_v55 = vadd.f32 1.4214138, %v5103_v56  ;;  %v5125_v26 = vmul.f32 %v6366_v15, %v5121_v14  ;;  %v5102_v57 = vmul.f32 %v6372_v21, %v5098_v1  ;;  %v5120_v48 = vadd.f32 0.2548296, %v5116_v42 }
0x1516   :  { %v5111_v62 = vmul.f32 %v6370_v58, %v5107_v55  ;;  %v5145_v24 = vmul.f32 %v6374_v27, %v5125_v26  ;;  %v5106_v53 = vadd.f32 1.4214138, %v5102_v57  ;;  %v5124_v33 = vmul.f32 %v6368_v46, %v5120_v48 }
0x1518   :  { %v5115_v51 = vadd.f32 -0.28449672, %v5111_v62  ;;  %v5149_v43 = vsub.f32 1.0, %v5145_v24  ;;  %v5110_v37 = vmul.f32 %v6372_v21, %v5106_v53  ;;  %v5144_v4 = vmul.f32 %v6376_v11, %v5124_v33  ;;  %v74_v33 = vld [vmem:[%s7805_s2 + $0x30] sm:$0xff] }
0x1519   :  { %6136 = vmatprep.subr.mxu1 %v74_v33  ;;  %v72_v11 = vld [vmem:[%s7805_s2 + $0x10] sm:$0xff] }
0x151a   :  { %v5119_v47 = vmul.f32 %v6370_v58, %v5115_v51  ;;  %v5157_v63 = vsub.f32 0.0, %v5149_v43  ;;  %v5114_v39 = vadd.f32 -0.28449672, %v5110_v37  ;;  %v5148_v16 = vsub.f32 1.0, %v5144_v4  ;;  %v73_v51 = vld [vmem:[%s7805_s2 + $0x20] sm:$0xff]  ;;  %6137 = vmatpush3.msra.mxu1 %v74_v33 }
0x151b   :  { %6138 = vmatprep.subr.mxu1 %v73_v51 }
0x151c   :  { %v5123_v32 = vadd.f32 0.2548296, %v5119_v47  ;;  %v5161_v44 = vsel %vm5153_vm14, %v5149_v43, %v5157_v63  ;;  %v5118_v36 = vmul.f32 %v6372_v21, %v5114_v39  ;;  %v5156_v15 = vsub.f32 0.0, %v5148_v16  ;;  %6139 = vmatpush3.msra.mxu1 %v73_v51  ;;  %v71_v43 = vld [vmem:[%s7805_s2] sm:$0xff] }
0x151d   :  { %v5165_v6 = vadd.f32 1.0, %v5161_v44  ;;  %6140 = vmatprep.subr.mxu1 %v72_v11 }
0x151e   :  { %v5127_v23 = vmul.f32 %v6370_v58, %v5123_v32  ;;  %v5122_v12 = vadd.f32 0.2548296, %v5118_v36  ;;  %v5160_v46 = vsel %vm5152_vm15, %v5148_v16, %v5156_v15  ;;  %6141 = vmatpush3.msra.mxu1 %v72_v11 }
0x151f   :  { %v5169_v10 = vmul.f32 %v5165_v6, %v5065_v30  ;;  %v5164_v35 = vadd.f32 1.0, %v5160_v46  ;;  %6142 = vmatprep.subr.mxu1 %v71_v43 }
0x1520   :  { %v5147_v3 = vmul.f32 %v6378_v34, %v5127_v23  ;;  %v5126_v13 = vmul.f32 %v6372_v21, %v5122_v12  ;;  %6143 = vmatpush3.msra.mxu1 %v71_v43  ;;  %v5532_v12 = vld [vmem:[%s7806_s3 + $0x2] ss:$0 sm:$0xff] }
0x1521   :  { %v5175_v5 = vsel %vm88_vm1, %v5169_v10, 0.0  ;;  %v5168_v40 = vmul.f32 %v5164_v35, %v5064_v41  ;;  %v5533_v41 = vld [vmem:[%s7806_s3 + $0x3] ss:$0 sm:$0xff]  ;;  %s6501_s3 = smov [#allocation8]  }
0x1522   :  { %v5151_v60 = vsub.f32 1.0, %v5147_v3  ;;  %5176 = vadd.xlane.f32.xlu1 %v5175_v5  ;;  %v5146_v52 = vmul.f32 %v6380_v20, %v5126_v13  ;;  %s5352_s14 = sshll.u32 %s6501_s3, 4  ;;  %s5353_s14 = int_to_ptr.vmem [resolvable:$true] %s5352_s14 }
0x1523   :  { %v5172_v59 = vsel %vm88_vm1, %v5168_v40, 0.0  ;;  %s6453_s15 = scalar_lea.vmem %s5353_s14, 512  ;;  %p6458_p2 = scmp.lt.s32.totalorder %s5353_s14, %s5353_s14 }
0x1524   :  { %v5159_v38 = vsub.f32 0.0, %v5151_v60  ;;  %v5150_v58 = vsub.f32 1.0, %v5146_v52  ;;  %5173 = vadd.xlane.f32.xlu0 %v5172_v59  ;;  %p6454_p1 = scmp.ne.s32.totalorder %s5353_s14, %s6453_s15  ;;  %p6459_p3 = scmp.lt.s32.totalorder %s6453_s15, %s6453_s15 }
0x1526   :  { %v5158_v25 = vsub.f32 0.0, %v5150_v58  ;;  %v5163_v50 = vsel %vm5155_vm0, %v5151_v60, %v5159_v38  ;;  %p6460_p4 = por %p6459_p3, %p6458_p2 }
0x1527   :  { %v5167_v2 = vadd.f32 1.0, %v5163_v50  ;;  %v5338_v50 = vld [vmem:[#allocation7 + $0x8] sm:$0xff] }
0x1528   :  { %v5162_v19 = vsel %vm5154_vm2, %v5150_v58, %v5158_v25  ;;  %p6461_p5 = pnand %p6460_p4, %p6454_p1 }
0x1529   :  { %v5166_v61 = vadd.f32 1.0, %v5162_v19  ;;  %v5171_v8 = vmul.f32 %v5167_v2, %v5067_v18 }
0x152b   :  { %v5170_v22 = vmul.f32 %v5166_v61, %v5066_v7  ;;  %v5181_v31 = vsel %vm88_vm1, %v5171_v8, 0.0  ;;  %v5337_v7 = vld [vmem:[#allocation7] sm:$0xff] }
0x152d   :  { %v5178_v21 = vsel %vm88_vm1, %v5170_v22, 0.0 }
0x152e   :  { %5179 = vadd.xlane.f32.xlu0 %v5178_v21 }
0x1532   :  { %5182 = vadd.xlane.f32.xlu0 %v5181_v31 }
0x15ab   :  { %v5177_v9 = vpop.xlane.xlu1 %5176 }
0x15ac   :  { %v5185_v28 = vmul.f32 0.03125, %v5177_v9 }
0x15ad   :  { %v5174_v0 = vpop.xlane.xlu0 %5173 }
0x15ae   :  { %v5189_v17 = vsub.f32 %v5169_v10, %v5185_v28  ;;  %v5184_v45 = vmul.f32 0.03125, %v5174_v0 }
0x15b0   :  { %v5193_v29 = vmul.f32 %v5189_v17, %v5189_v17  ;;  %v5188_v56 = vsub.f32 %v5168_v40, %v5184_v45 }
0x15b2   :  { %v5199_v49 = vsel %vm88_vm1, %v5193_v29, 0.0  ;;  %v5192_v14 = vmul.f32 %v5188_v56, %v5188_v56 }
0x15b3   :  { %5200 = vadd.xlane.f32.xlu1 %v5199_v49 }
0x15b4   :  { %v5196_v54 = vsel %vm88_vm1, %v5192_v14, 0.0 }
0x15b5   :  { %5197 = vadd.xlane.f32.xlu0 %v5196_v54 }
0x15b7   :  { %v5180_v1 = vpop.xlane.xlu0 %5179 }
0x15b8   :  { %v5186_v42 = vmul.f32 0.03125, %v5180_v1 }
0x15ba   :  { %v5190_v55 = vsub.f32 %v5170_v22, %v5186_v42 }
0x15bb   :  { %v5183_v26 = vpop.xlane.xlu0 %5182 }
0x15bc   :  { %v5187_v57 = vmul.f32 0.03125, %v5183_v26  ;;  %v5194_v27 = vmul.f32 %v5190_v55, %v5190_v55 }
0x15be   :  { %v5191_v48 = vsub.f32 %v5171_v8, %v5187_v57  ;;  %v5202_v62 = vsel %vm88_vm1, %v5194_v27, 0.0 }
0x15bf   :  { %5203 = vadd.xlane.f32.xlu0 %v5202_v62 }
0x15c0   :  { %v5195_v24 = vmul.f32 %v5191_v48, %v5191_v48 }
0x15c2   :  { %v5205_v53 = vsel %vm88_vm1, %v5195_v24, 0.0 }
0x15c3   :  { %5206 = vadd.xlane.f32.xlu1 %v5205_v53 }
0x163c   :  { %v5201_v37 = vpop.xlane.xlu1 %5200 }
0x163d   :  { %v5209_v4 = vmul.f32 0.03125, %v5201_v37 }
0x163e   :  { %v5198_v63 = vpop.xlane.xlu0 %5197 }
0x163f   :  { %v5213_v47 = vadd.f32 1e-05, %v5209_v4  ;;  %v5208_v39 = vmul.f32 0.03125, %v5198_v63 }
0x1641   :  { %6381 = vrsqrt.f32 %v5213_v47  ;;  %v5212_v16 = vadd.f32 1e-05, %v5208_v39 }
0x1643   :  { %6383 = vrsqrt.f32 %v5212_v16 }
0x1648   :  { %v5204_v32 = vpop.xlane.xlu0 %5203 }
0x1649   :  { %v5210_v44 = vmul.f32 0.03125, %v5204_v32 }
0x164b   :  { %v5214_v36 = vadd.f32 1e-05, %v5210_v44 }
0x164c   :  { %v5207_v30 = vpop.xlane.xlu1 %5206 }
0x164d   :  { %6385 = vrsqrt.f32 %v5214_v36  ;;  %v5211_v6 = vmul.f32 0.03125, %v5207_v30 }
0x164e   :  { %v6382_v15 = vpop.eup %6381 }
0x164f   :  { %v5221_v23 = vmul.f32 %v6382_v15, %v5189_v17  ;;  %v5215_v34 = vadd.f32 1e-05, %v5211_v6 }
0x1650   :  { %v6384_v10 = vpop.eup %6383 }
0x1651   :  { %6387 = vrsqrt.f32 %v5215_v34  ;;  %v5220_v46 = vmul.f32 %v6384_v10, %v5188_v56  ;;  %v5229_v3 = vmul.f32 %v5532_v12, %v5221_v23 }
0x1653   :  { %v5228_v35 = vmul.f32 %v5532_v12, %v5220_v46  ;;  %v5237_v20 = vadd.f32 %v5533_v41, %v5229_v3 }
0x1655   :  { %v5236_v13 = vadd.f32 %v5533_v41, %v5228_v35 }
0x1657   :  { %6144 = vmatprep.mubr.msk.f32.mxu1 %vm88_vm1, %v5236_v13 }
0x1658   :  { %6145 = vmatmul.mubr.msk.f32.vlgmr.msra.gmra.mxu1 %vm88_vm1, %v5237_v20 }
0x165a   :  { %v6386_v5 = vpop.eup %6385 }
0x165b   :  { %v5222_v60 = vmul.f32 %v6386_v5, %v5190_v55 }
0x165d   :  { %v5230_v40 = vmul.f32 %v5532_v12, %v5222_v60 }
0x165e   :  { %v6388_v52 = vpop.eup %6387 }
0x165f   :  { %v5238_v38 = vadd.f32 %v5533_v41, %v5230_v40  ;;  %v5223_v59 = vmul.f32 %v6388_v52, %v5191_v48 }
0x1661   :  { %6147 = vmatprep.mubr.msk.f32.mxu1 %vm88_vm1, %v5238_v38  ;;  %v5231_v58 = vmul.f32 %v5532_v12, %v5223_v59 }
0x1663   :  { %v5239_v25 = vadd.f32 %v5533_v41, %v5231_v58 }
0x1665   :  { %6148 = vmatmul.mubr.msk.f32.gmra.mxu1 %vm88_vm1, %v5239_v25 }
0x1718   :  { %v6146_v19 = vpop.f32.mrf.mxu1 }
0x1719   :  { %v5340_v61 = vadd.f32 %v6146_v19, %v5338_v50 }
0x171a   :  { %v5318_v2 = vpop.f32.mrf.mxu1 }
0x171b   :  { %5344 = vst [vmem:[#allocation8 + $0x8] sm:$0xff] %v5340_v61  ;;  %v5339_v18 = vadd.f32 %v5337_v7, %v5318_v2 }
0x171d   :  { %5343 = vst [vmem:[#allocation8] sm:$0xff] %v5339_v18 }
0x1725   :  { %v6149_v22 = vpop.f32.mrf.mxu1 }
0x1726   :  { %v5342_v21 = vadd.f32 %v6149_v22, %v5338_v50 }
0x1727   :  { %v5328_v8 = vpop.f32.mrf.mxu1 }
0x1728   :  { %5346 = vst [vmem:[#allocation8 + $0x18] sm:$0xff] %v5342_v21  ;;  %v5341_v31 = vadd.f32 %v5337_v7, %v5328_v8 }
0x172a   :  { %5345 = vst [vmem:[#allocation8 + $0x10] sm:$0xff] %v5341_v31 }
0x172b   :  { %6464 = shalt.err (!%p6461_p5)
}
0x172c   :  { %5358 = dma.vmem_to_hbm [thread:$0]  %s5353_s14, 512, %s7811_s8, [#allocation4], %s6481_s10, %s6481_s10, %s6482_s11  }
0x172d   :  { %6477 = dma.done.wait [#allocation4], 512  }
0x172e   :  { %6478 = vsyncadd [#allocation4], 4294966784 }
0x172f   :  { %5362 = vsyncpa [#allocation3], 1 }
0x1730   :  { %5363 = vsyncpa [#allocation6], 1 }
0x1731   :  { %5364 = vsyncpa [#allocation4], 1 }

</bundles_post_ra>
